<compile_context>
chip_gen: v6e
topology: v6e:2x2x1
jax: 0.10.0
libtpu: 0.0.40
codegen_flags: <defaults>
</compile_context>

<pallas_src>
import functools

import jax
import jax.numpy as jnp
from jax import lax
from jax.experimental import pallas as pl
from jax.experimental.pallas import tpu as pltpu


VMEM_LIMIT = 40 * 1024 * 1024   # well below v7x's 64 MiB physical VMEM


# ----------------------------------------------------------------------------
# fc1: y = relu(x @ W + b), Dout tiled so the weight DMA pipelines.
# ----------------------------------------------------------------------------
def _linear_relu_kernel(x_ref, w_ref, b_ref, o_ref):
    y = jnp.dot(x_ref[...], w_ref[...], preferred_element_type=jnp.float32)
    y = jnp.maximum(y + b_ref[...], 0.0)
    o_ref[...] = y.astype(o_ref.dtype)


def linear_relu(x, w, b, out_dtype=jnp.bfloat16, tile_n=2048):
    B, Din = x.shape
    Dout = w.shape[1]
    # Pad the contraction dim to a multiple of 128 (MXU K alignment).
    Dp = ((Din + 127) // 128) * 128
    if Dp != Din:
        x = jnp.pad(x, ((0, 0), (0, Dp - Din)))
        w = jnp.pad(w, ((0, Dp - Din), (0, 0)))
    tile_n = min(tile_n, Dout)
    while Dout % tile_n:
        tile_n //= 2
    if tile_n < 128:
        tile_n = Dout
    return pl.pallas_call(
        _linear_relu_kernel,
        out_shape=jax.ShapeDtypeStruct((B, Dout), out_dtype),
        grid=(Dout // tile_n,),
        in_specs=[
            pl.BlockSpec((B, Dp), lambda j: (0, 0)),
            pl.BlockSpec((Dp, tile_n), lambda j: (0, j)),
            pl.BlockSpec((1, tile_n), lambda j: (0, j)),
        ],
        out_specs=pl.BlockSpec((B, tile_n), lambda j: (0, j)),
        compiler_params=pltpu.CompilerParams(
            dimension_semantics=("parallel",),
            vmem_limit_bytes=VMEM_LIMIT),
    )(x.astype(jnp.bfloat16), w.astype(jnp.bfloat16), b.astype(jnp.float32))


# ----------------------------------------------------------------------------
# Fused Upsample(4x nearest) + ConstantPad1d(K//2) + Conv1d(K) + bias + act
# via polyphase decomposition:
#
#   out[co, 4*q + p] = sum_{s, ci} Wp[p][co, s*Cin + ci] * x[ci, q + s - 3]
#
# Per grid step (one Cout tile x one batch group x one length tile):
#   * build the stacked operand xs = concat_s x_window[:, s : s+TQ]  (7*Cin, N)
#     where N = NB*TQ (NB batch elements folded into the MXU N dim for the
#     short early layers),
#   * ONE bf16 MXU dot per phase: (Cout_t, 7*Cin) @ (7*Cin, N) -> f32,
#   * bias + ReLU/tanh in f32, store bf16.
# Output is written phase-major (B, 4, Cout, L/4) so every store is lane-dense;
# the interleave back to (B, Cout, L) is one XLA transpose that fuses with the
# next layer's halo pad.
# ----------------------------------------------------------------------------
def _upconv_kernel(x_ref, w_ref, b_ref, o_ref, *, TQ, NB, up, n_taps, act,
                   tiled):
    if tiled:
        start = pl.multiple_of(pl.program_id(2) * TQ, 128)
        width = TQ + 128
    parts = []
    for bi in range(NB):
        if tiled:
            xw = x_ref[bi, :, pl.ds(start, width)]        # (Cin, TQ+128)
        else:
            xw = x_ref[bi]                                # (Cin, TQ+n_taps-1)
        parts.append(
            jnp.concatenate([xw[:, s:s + TQ] for s in range(n_taps)], axis=0))
    xs = parts[0] if NB == 1 else jnp.concatenate(parts, axis=1)
    bias = b_ref[...]                                     # (Cout_t, 1) f32
    for p in range(up):
        acc = jnp.dot(w_ref[p], xs, preferred_element_type=jnp.float32)
        acc = acc + bias
        if act == "relu":
            acc = jnp.maximum(acc, 0.0)
        elif act == "tanh":
            acc = jnp.tanh(acc)
        acc = acc.astype(o_ref.dtype)
        for bi in range(NB):
            o_ref[bi, p] = acc[:, bi * TQ:(bi + 1) * TQ]


def _fold_polyphase(w, up, pad):
    """(Cout, Cin, K) conv weights -> (up, Cout, n_taps*Cin) polyphase weights."""
    Cout, Cin, K = w.shape
    s_min = -((pad + up - 1) // up)                       # floor(-pad/up)
    s_max = (up - 1 + K - 1 - pad) // up
    n_taps = s_max - s_min + 1
    ks = jnp.arange(K)
    ps = jnp.arange(up)
    tap = (ps[:, None] + ks[None, :] - pad) // up - s_min            # (up, K)
    sel = (tap[:, :, None] == jnp.arange(n_taps)[None, None, :])
    sel = sel.astype(jnp.float32)                                    # (up, K, n_taps)
    wp = jnp.einsum('oik,pkt->ptoi', w.astype(jnp.float32), sel)     # (up,T,Co,Ci)
    w_poly = wp.transpose(0, 2, 1, 3).reshape(up, Cout, n_taps * Cin)
    return w_poly.astype(jnp.bfloat16), n_taps, -s_min


def upsample_conv(x, w, b, act, up=4, out_dtype=jnp.bfloat16):
    """x: (B, Cin, Lin); w: (Cout, Cin, K); b: (Cout,) -> (B, Cout, up*Lin)."""
    B, Cin, Lin = x.shape
    Cout, _, K = w.shape
    pad = K // 2
    w_poly, n_taps, left = _fold_polyphase(w, up, pad)
    bias = b.reshape(Cout, 1).astype(jnp.float32)
    x = x.astype(jnp.bfloat16)

    # Tiling decisions.
    if Lin >= 256:
        tiled = True
        NB = 1
        TQ = 256 if Cout > 64 else 512      # keeps the f32 acc <= ~32 vregs
        TQ = min(TQ, Lin)
        while Lin % TQ:
            TQ //= 2
        # single up-front pad folds the conv halo and the tiling halo
        x_in = jnp.pad(x, ((0, 0), (0, 0), (left, 128 - left)))
    else:
        tiled = False
        TQ = Lin
        NB = max(1, min(B, 256 // Lin))     # fold batch into the MXU N dim
        while B % NB:
            NB -= 1
        x_in = jnp.pad(x, ((0, 0), (0, 0), (left, n_taps - 1 - left)))
    Lpad = x_in.shape[2]
    n_jt = Lin // TQ
    n_bg = B // NB
    Cout_t = min(Cout, 128)                 # bound the weight block / acc
    while Cout % Cout_t:
        Cout_t //= 2
    n_co = Cout // Cout_t

    kernel = functools.partial(_upconv_kernel, TQ=TQ, NB=NB, up=up,
                               n_taps=n_taps, act=act, tiled=tiled)
    y_ph = pl.pallas_call(
        kernel,
        out_shape=jax.ShapeDtypeStruct((B, up, Cout, Lin), out_dtype),
        grid=(n_co, n_bg, n_jt),
        in_specs=[
            pl.BlockSpec((NB, Cin, Lpad), lambda co, bg, jt: (bg, 0, 0)),
            # weight block index only changes with `co` (outermost axis), so it
            # is (re)fetched at most n_co times.
            pl.BlockSpec((up, Cout_t, n_taps * Cin),
                         lambda co, bg, jt: (0, co, 0)),
            pl.BlockSpec((Cout_t, 1), lambda co, bg, jt: (co, 0)),
        ],
        out_specs=pl.BlockSpec((NB, up, Cout_t, TQ),
                               lambda co, bg, jt: (bg, 0, co, jt)),
        compiler_params=pltpu.CompilerParams(
            dimension_semantics=("parallel", "parallel", "parallel"),
            vmem_limit_bytes=VMEM_LIMIT),
    )(x_in, w_poly, bias)

    # Interleave the 4 phases back to full resolution: out[.., 4q+p] = y_ph[:, p, :, q]
    return y_ph.transpose(0, 2, 3, 1).reshape(B, Cout, up * Lin)


# ----------------------------------------------------------------------------
# Post-processing FIR (Conv1d(nc, nc, K), K up to 512) as a block-Toeplitz
# matmul on the signal viewed as (L/128, 128):
#   out2[m, :] = sum_{ci, a} X2[ci][m + a, :] @ W[ci, a]      (W blocks 128x128)
# i.e. ONE MXU dot per batch element on a lane-stacked operand.  No per-tap
# unroll, no lane rotates (K=512 would otherwise be 512 full-tile XLU shifts).
# ----------------------------------------------------------------------------
def _ppfilter_kernel(x_ref, w_ref, b_ref, o_ref, *, n_a, nc, n_rows):
    parts = []
    for ci in range(nc):
        for a in range(n_a):
            parts.append(x_ref[0, ci, a:a + n_rows, :])     # (n_rows, 128)
    s = parts[0] if len(parts) == 1 else jnp.concatenate(parts, axis=1)
    res = jnp.dot(s, w_ref[...], preferred_element_type=jnp.float32)
    res = res + b_ref[...]
    for co in range(nc):
        o_ref[0, co] = res[:, co * 128:(co + 1) * 128].astype(o_ref.dtype)


def _build_pp_weight(w):
    """(nc, nc, K) FIR taps -> block-Toeplitz (nc*n_a*128, nc*128) bf16 weight."""
    nc_o, nc_i, K = w.shape
    n_a = (K + 126) // 128 + 1
    a = jnp.arange(n_a)[:, None, None]
    r = jnp.arange(128)[None, :, None]
    l = jnp.arange(128)[None, None, :]
    kk = 128 * a + r - l                                    # (n_a, 128, 128)
    valid = (kk >= 0) & (kk < K)
    wg = w.astype(jnp.float32)[:, :, jnp.clip(kk, 0, K - 1)]  # (nco,nci,n_a,128,128)
    wg = jnp.where(valid[None, None], wg, 0.0)
    wstack = jnp.transpose(wg, (1, 2, 3, 0, 4)).reshape(nc_i * n_a * 128,
                                                        nc_o * 128)
    return wstack.astype(jnp.bfloat16), n_a


def post_proc_filter(x, w, b):
    """x: (B, nc, L); w: (nc, nc, K); b: (nc,).  Same-length FIR (PyTorch pad)."""
    B, nc, L = x.shape
    K = w.shape[2]
    assert L % 128 == 0
    n_rows = L // 128
    wstack, n_a = _build_pp_weight(w)
    n_rows_in = n_rows + n_a - 1
    pad_left = K // 2
    x_p = jnp.pad(x.astype(jnp.bfloat16),
                  ((0, 0), (0, 0), (pad_left, n_rows_in * 128 - L - pad_left)))
    x2 = x_p.reshape(B, nc, n_rows_in, 128)
    b_row = jnp.repeat(b.astype(jnp.float32), 128)[None, :]   # (1, nc*128)

    kernel = functools.partial(_ppfilter_kernel, n_a=n_a, nc=nc, n_rows=n_rows)
    out = pl.pallas_call(
        kernel,
        out_shape=jax.ShapeDtypeStruct((B, nc, n_rows, 128), jnp.float32),
        grid=(B,),
        in_specs=[
            pl.BlockSpec((1, nc, n_rows_in, 128), lambda bi: (bi, 0, 0, 0)),
            pl.BlockSpec((nc * n_a * 128, nc * 128), lambda bi: (0, 0)),
            pl.BlockSpec((1, nc * 128), lambda bi: (0, 0)),
        ],
        out_specs=pl.BlockSpec((1, nc, n_rows, 128), lambda bi: (bi, 0, 0, 0)),
        compiler_params=pltpu.CompilerParams(
            dimension_semantics=("parallel",),
            vmem_limit_bytes=VMEM_LIMIT),
    )(x2, wstack, b_row)
    return out.reshape(B, nc, L)


# ----------------------------------------------------------------------------
# Full generator forward (upsample=True branch).
# ----------------------------------------------------------------------------
def wavegan_forward(z, params, model_size, post_proc_filt_len):
    h = linear_relu(z, params["fc1_w"], params["fc1_b"])     # (B, 256*ms) bf16
    x = h.reshape(-1, 16 * model_size, 16)                   # (B, 16*ms, 16)
    for i in range(1, 6):
        act = "tanh" if i == 5 else "relu"
        x = upsample_conv(x, params[f"conv{i}_w"], params[f"conv{i}_b"], act)
    if post_proc_filt_len:
        return post_proc_filter(x, params["pp_w"], params["pp_b"])
    return x.astype(jnp.float32)


# Pure-JAX f32 reference for sanity checking the Pallas path.
def wavegan_reference(z, params, model_size, post_proc_filt_len):
    h = jnp.maximum(z @ params["fc1_w"] + params["fc1_b"], 0.0)
    x = h.reshape(-1, 16 * model_size, 16)
    for i in range(1, 6):
        w = params[f"conv{i}_w"]
        b = params[f"conv{i}_b"]
        K = w.shape[2]
        pad = K // 2
        x = jnp.repeat(x, 4, axis=-1)
        x = jnp.pad(x, ((0, 0), (0, 0), (pad, pad)))
        x = lax.conv_general_dilated(x, w, (1,), "VALID",
                                     dimension_numbers=("NCH", "OIH", "NCH"))
        x = x + b[None, :, None]
        x = jnp.tanh(x) if i == 5 else jnp.maximum(x, 0.0)
    pl_left = post_proc_filt_len // 2
    pl_right = post_proc_filt_len - pl_left - 1
    x = jnp.pad(x, ((0, 0), (0, 0), (pl_left, pl_right)))
    x = lax.conv_general_dilated(x, params["pp_w"], (1,), "VALID",
                                 dimension_numbers=("NCH", "OIH", "NCH"))
    return x + params["pp_b"][None, :, None]


def init_params(key, model_size, latent_dim, num_channels, post_proc_filt_len):
    ks = jax.random.split(key, 16)
    params = {}
    d_out = 256 * model_size
    params["fc1_w"] = (jax.random.normal(ks[0], (latent_dim, d_out), jnp.float32)
                       * (2.0 / latent_dim) ** 0.5)
    params["fc1_b"] = jax.random.normal(ks[12], (1, d_out), jnp.float32) * 0.01
    chans = [16 * model_size, 8 * model_size, 4 * model_size,
             2 * model_size, model_size, num_channels]
    for i in range(5):
        cin, cout = chans[i], chans[i + 1]
        fan_in = cin * 25
        params[f"conv{i + 1}_w"] = (jax.random.normal(ks[1 + 2 * i], (cout, cin, 25),
                                                      jnp.float32) / fan_in ** 0.5)
        params[f"conv{i + 1}_b"] = (jax.random.normal(ks[2 + 2 * i], (cout,),
                                                      jnp.float32) * 0.01)
    fan_in = num_channels * post_proc_filt_len
    params["pp_w"] = (jax.random.normal(ks[11],
                                        (num_channels, num_channels, post_proc_filt_len),
                                        jnp.float32) / fan_in ** 0.5)
    params["pp_b"] = jax.random.normal(ks[13], (num_channels,), jnp.float32) * 0.01
    return params


if __name__ == "__main__":
    # Small shapes consistent with the module structure
    # (original: model_size=64, latent_dim=100, batch=64, post_proc_filt_len=512).
    model_size = 4
    latent_dim = 16
    num_channels = 1
    post_proc_filt_len = 32
    batch = 2

    key = jax.random.PRNGKey(0)
    k_param, k_z = jax.random.split(key)
    params = init_params(k_param, model_size, latent_dim, num_channels,
                         post_proc_filt_len)
    z = jax.random.uniform(k_z, (batch, latent_dim), jnp.float32,
                           minval=-1.0, maxval=1.0)

    fwd = jax.jit(wavegan_forward, static_argnums=(2, 3))
    out = jax.block_until_ready(fwd(z, params, model_size, post_proc_filt_len))

    # Output length: 16 * 4^5 = 16384, preserved by the post-proc filter.
    assert out.shape == (batch, num_channels, 16384), out.shape

    ref = jax.block_until_ready(
        wavegan_reference(z, params, model_size, post_proc_filt_len))
    err = float(jnp.max(jnp.abs(out - ref)))
    # bf16 matmul operands / bf16 inter-layer activations -> a few 1e-2 abs.
    assert err < 5e-2, err
    print("KERNEL_OK")
</pallas_src>

<mosaic_0001>
module attributes {stable_mosaic.version = 11 : i64} {
  func.func @_linear_relu_kernel(%arg0: i32, %arg1: memref<2x128xbf16, #tpu.memory_space<vmem>>, %arg2: memref<128x1024xbf16, #tpu.memory_space<vmem>>, %arg3: memref<1x1024xf32, #tpu.memory_space<vmem>>, %arg4: memref<2x1024xbf16, #tpu.memory_space<vmem>>) attributes {dimension_semantics = [#tpu.dimension_semantics<parallel>], iteration_bounds = array<i64: 1>, scalar_prefetch = 0 : i64, scratch_operands = 0 : i64, tpu.core_type = #tpu.core_type<tc>, window_params = [{pipeline_mode = #tpu.pipeline_mode<synchronous>, transform_indices = @transform_0, window_bounds = array<i64: 2, 128>}, {transform_indices = @transform_1, window_bounds = array<i64: 128, 1024>}, {transform_indices = @transform_2, window_bounds = array<i64: 1, 1024>}, {transform_indices = @transform_3, window_bounds = array<i64: 2, 1024>}]} {
    %c0 = arith.constant 0 : index
    %c0_0 = arith.constant 0 : index
    %0 = vector.load %arg1[%c0, %c0_0] : memref<2x128xbf16, #tpu.memory_space<vmem>>, vector<2x128xbf16>
    %c0_1 = arith.constant 0 : index
    %c0_2 = arith.constant 0 : index
    %1 = vector.load %arg2[%c0_1, %c0_2] : memref<128x1024xbf16, #tpu.memory_space<vmem>>, vector<128x1024xbf16>
    %cst = arith.constant dense<0.000000e+00> : vector<2x1024xf32>
    %2 = tpu.matmul %0, %1, %cst {dimension_numbers = #tpu.dot_dimension_numbers<[1], [0], [0], [1], [0, 0, 1, 1], [], []>} : vector<2x128xbf16>, vector<128x1024xbf16>, vector<2x1024xf32> -> vector<2x1024xf32>
    %c0_3 = arith.constant 0 : index
    %c0_4 = arith.constant 0 : index
    %3 = vector.load %arg3[%c0_3, %c0_4] : memref<1x1024xf32, #tpu.memory_space<vmem>>, vector<1x1024xf32>
    %4 = vector.broadcast %3 : vector<1x1024xf32> to vector<2x1024xf32>
    %5 = arith.addf %2, %4 : vector<2x1024xf32>
    %cst_5 = arith.constant 0.000000e+00 : f32
    %6 = vector.broadcast %cst_5 : f32 to vector<2x1024xf32>
    %7 = arith.maximumf %5, %6 : vector<2x1024xf32>
    %8 = arith.truncf %7 : vector<2x1024xf32> to vector<2x1024xbf16>
    %c0_6 = arith.constant 0 : index
    %c0_7 = arith.constant 0 : index
    %9 = vector.load %arg4[%c0_6, %c0_7] : memref<2x1024xbf16, #tpu.memory_space<vmem>>, vector<2x1024xbf16>
    tpu.vector_store %arg4[%c0_6, %c0_7], %8 {strides = array<i32>} : memref<2x1024xbf16, #tpu.memory_space<vmem>>, vector<2x1024xbf16>,
    return
  }
  func.func @transform_0(%arg0: i32) -> (i32, i32) {
    %c0_i32 = arith.constant 0 : i32
    %c0_i32_0 = arith.constant 0 : i32
    %c0_i32_1 = arith.constant 0 : i32
    return %c0_i32, %c0_i32_0 : i32, i32
  }
  func.func @transform_1(%arg0: i32) -> (i32, i32) {
    %c0_i32 = arith.constant 0 : i32
    %c0_i32_0 = arith.constant 0 : i32
    return %c0_i32, %arg0 : i32, i32
  }
  func.func @transform_2(%arg0: i32) -> (i32, i32) {
    %c0_i32 = arith.constant 0 : i32
    %c0_i32_0 = arith.constant 0 : i32
    return %c0_i32, %arg0 : i32, i32
  }
  func.func @transform_3(%arg0: i32) -> (i32, i32) {
    %c0_i32 = arith.constant 0 : i32
    %c0_i32_0 = arith.constant 0 : i32
    return %c0_i32, %arg0 : i32, i32
  }
}

module attributes {stable_mosaic.version = 11 : i64} {
  func.func @_upconv_kernel(%arg0: i32, %arg1: i32, %arg2: i32, %arg3: memref<2x64x22xbf16, #tpu.memory_space<vmem>>, %arg4: memref<4x32x448xbf16, #tpu.memory_space<vmem>>, %arg5: memref<32x1xf32, #tpu.memory_space<vmem>>, %arg6: memref<2x4x32x16xbf16, #tpu.memory_space<vmem>>) attributes {dimension_semantics = [#tpu.dimension_semantics<parallel>, #tpu.dimension_semantics<parallel>, #tpu.dimension_semantics<parallel>], iteration_bounds = array<i64: 1, 1, 1>, scalar_prefetch = 0 : i64, scratch_operands = 0 : i64, tpu.core_type = #tpu.core_type<tc>, window_params = [{transform_indices = @transform_0, window_bounds = array<i64: 2, 64, 22>}, {transform_indices = @transform_1, window_bounds = array<i64: 4, 32, 448>}, {transform_indices = @transform_2, window_bounds = array<i64: 32, 1>}, {transform_indices = @transform_3, window_bounds = array<i64: 2, 4, 32, 16>}]} {
    %c0 = arith.constant 0 : index
    %c0_0 = arith.constant 0 : index
    %c0_1 = arith.constant 0 : index
    %0 = vector.load %arg3[%c0, %c0_0, %c0_1] : memref<2x64x22xbf16, #tpu.memory_space<vmem>>, vector<1x64x22xbf16>
    %1 = vector.shape_cast %0 : vector<1x64x22xbf16> to vector<64x22xbf16>
    %2 = vector.extract_strided_slice %1 {offsets = [0, 0], sizes = [64, 16], strides = [1, 1]} : vector<64x22xbf16> to vector<64x16xbf16>
    %3 = vector.extract_strided_slice %1 {offsets = [0, 1], sizes = [64, 16], strides = [1, 1]} : vector<64x22xbf16> to vector<64x16xbf16>
    %4 = vector.extract_strided_slice %1 {offsets = [0, 2], sizes = [64, 16], strides = [1, 1]} : vector<64x22xbf16> to vector<64x16xbf16>
    %5 = vector.extract_strided_slice %1 {offsets = [0, 3], sizes = [64, 16], strides = [1, 1]} : vector<64x22xbf16> to vector<64x16xbf16>
    %6 = vector.extract_strided_slice %1 {offsets = [0, 4], sizes = [64, 16], strides = [1, 1]} : vector<64x22xbf16> to vector<64x16xbf16>
    %7 = vector.extract_strided_slice %1 {offsets = [0, 5], sizes = [64, 16], strides = [1, 1]} : vector<64x22xbf16> to vector<64x16xbf16>
    %8 = vector.extract_strided_slice %1 {offsets = [0, 6], sizes = [64, 16], strides = [1, 1]} : vector<64x22xbf16> to vector<64x16xbf16>
    %9 = tpu.concatenate %2, %3, %4, %5, %6, %7, %8 in 0 : vector<64x16xbf16>, vector<64x16xbf16>, vector<64x16xbf16>, vector<64x16xbf16>, vector<64x16xbf16>, vector<64x16xbf16>, vector<64x16xbf16> -> vector<448x16xbf16>
    %c1 = arith.constant 1 : index
    %c0_2 = arith.constant 0 : index
    %c0_3 = arith.constant 0 : index
    %10 = vector.load %arg3[%c1, %c0_2, %c0_3] : memref<2x64x22xbf16, #tpu.memory_space<vmem>>, vector<1x64x22xbf16>
    %11 = vector.shape_cast %10 : vector<1x64x22xbf16> to vector<64x22xbf16>
    %12 = vector.extract_strided_slice %11 {offsets = [0, 0], sizes = [64, 16], strides = [1, 1]} : vector<64x22xbf16> to vector<64x16xbf16>
    %13 = vector.extract_strided_slice %11 {offsets = [0, 1], sizes = [64, 16], strides = [1, 1]} : vector<64x22xbf16> to vector<64x16xbf16>
    %14 = vector.extract_strided_slice %11 {offsets = [0, 2], sizes = [64, 16], strides = [1, 1]} : vector<64x22xbf16> to vector<64x16xbf16>
    %15 = vector.extract_strided_slice %11 {offsets = [0, 3], sizes = [64, 16], strides = [1, 1]} : vector<64x22xbf16> to vector<64x16xbf16>
    %16 = vector.extract_strided_slice %11 {offsets = [0, 4], sizes = [64, 16], strides = [1, 1]} : vector<64x22xbf16> to vector<64x16xbf16>
    %17 = vector.extract_strided_slice %11 {offsets = [0, 5], sizes = [64, 16], strides = [1, 1]} : vector<64x22xbf16> to vector<64x16xbf16>
    %18 = vector.extract_strided_slice %11 {offsets = [0, 6], sizes = [64, 16], strides = [1, 1]} : vector<64x22xbf16> to vector<64x16xbf16>
    %19 = tpu.concatenate %12, %13, %14, %15, %16, %17, %18 in 0 : vector<64x16xbf16>, vector<64x16xbf16>, vector<64x16xbf16>, vector<64x16xbf16>, vector<64x16xbf16>, vector<64x16xbf16>, vector<64x16xbf16> -> vector<448x16xbf16>
    %20 = tpu.concatenate %9, %19 in 1 : vector<448x16xbf16>, vector<448x16xbf16> -> vector<448x32xbf16>
    %c0_4 = arith.constant 0 : index
    %c0_5 = arith.constant 0 : index
    %21 = vector.load %arg5[%c0_4, %c0_5] : memref<32x1xf32, #tpu.memory_space<vmem>>, vector<32x1xf32>
    %c0_6 = arith.constant 0 : index
    %c0_7 = arith.constant 0 : index
    %c0_8 = arith.constant 0 : index
    %22 = vector.load %arg4[%c0_6, %c0_7, %c0_8] : memref<4x32x448xbf16, #tpu.memory_space<vmem>>, vector<1x32x448xbf16>
    %23 = vector.shape_cast %22 : vector<1x32x448xbf16> to vector<32x448xbf16>
    %cst = arith.constant dense<0.000000e+00> : vector<32x32xf32>
    %24 = tpu.matmul %23, %20, %cst {dimension_numbers = #tpu.dot_dimension_numbers<[1], [0], [0], [1], [0, 0, 1, 1], [], []>} : vector<32x448xbf16>, vector<448x32xbf16>, vector<32x32xf32> -> vector<32x32xf32>
    %25 = vector.broadcast %21 : vector<32x1xf32> to vector<32x32xf32>
    %26 = arith.addf %24, %25 : vector<32x32xf32>
    %cst_9 = arith.constant 0.000000e+00 : f32
    %27 = vector.broadcast %cst_9 : f32 to vector<32x32xf32>
    %28 = arith.maximumf %26, %27 : vector<32x32xf32>
    %29 = arith.truncf %28 : vector<32x32xf32> to vector<32x32xbf16>
    %30 = vector.extract_strided_slice %29 {offsets = [0, 0], sizes = [32, 16], strides = [1, 1]} : vector<32x32xbf16> to vector<32x16xbf16>
    %c0_10 = arith.constant 0 : index
    %c0_11 = arith.constant 0 : index
    %c0_12 = arith.constant 0 : index
    %c0_13 = arith.constant 0 : index
    %31 = vector.load %arg6[%c0_10, %c0_11, %c0_12, %c0_13] : memref<2x4x32x16xbf16, #tpu.memory_space<vmem>>, vector<1x1x32x16xbf16>
    %32 = vector.shape_cast %31 : vector<1x1x32x16xbf16> to vector<32x16xbf16>
    %33 = vector.shape_cast %30 : vector<32x16xbf16> to vector<1x1x32x16xbf16>
    tpu.vector_store %arg6[%c0_10, %c0_11, %c0_12, %c0_13], %33 {strides = array<i32>} : memref<2x4x32x16xbf16, #tpu.memory_space<vmem>>, vector<1x1x32x16xbf16>,
    %34 = vector.extract_strided_slice %29 {offsets = [0, 16], sizes = [32, 16], strides = [1, 1]} : vector<32x32xbf16> to vector<32x16xbf16>
    %c1_14 = arith.constant 1 : index
    %c0_15 = arith.constant 0 : index
    %c0_16 = arith.constant 0 : index
    %c0_17 = arith.constant 0 : index
    %35 = vector.load %arg6[%c1_14, %c0_15, %c0_16, %c0_17] : memref<2x4x32x16xbf16, #tpu.memory_space<vmem>>, vector<1x1x32x16xbf16>
    %36 = vector.shape_cast %35 : vector<1x1x32x16xbf16> to vector<32x16xbf16>
    %37 = vector.shape_cast %34 : vector<32x16xbf16> to vector<1x1x32x16xbf16>
    tpu.vector_store %arg6[%c1_14, %c0_15, %c0_16, %c0_17], %37 {strides = array<i32>} : memref<2x4x32x16xbf16, #tpu.memory_space<vmem>>, vector<1x1x32x16xbf16>,
    %c1_18 = arith.constant 1 : index
    %c0_19 = arith.constant 0 : index
    %c0_20 = arith.constant 0 : index
    %38 = vector.load %arg4[%c1_18, %c0_19, %c0_20] : memref<4x32x448xbf16, #tpu.memory_space<vmem>>, vector<1x32x448xbf16>
    %39 = vector.shape_cast %38 : vector<1x32x448xbf16> to vector<32x448xbf16>
    %cst_21 = arith.constant dense<0.000000e+00> : vector<32x32xf32>
    %40 = tpu.matmul %39, %20, %cst_21 {dimension_numbers = #tpu.dot_dimension_numbers<[1], [0], [0], [1], [0, 0, 1, 1], [], []>} : vector<32x448xbf16>, vector<448x32xbf16>, vector<32x32xf32> -> vector<32x32xf32>
    %41 = vector.broadcast %21 : vector<32x1xf32> to vector<32x32xf32>
    %42 = arith.addf %40, %41 : vector<32x32xf32>
    %cst_22 = arith.constant 0.000000e+00 : f32
    %43 = vector.broadcast %cst_22 : f32 to vector<32x32xf32>
    %44 = arith.maximumf %42, %43 : vector<32x32xf32>
    %45 = arith.truncf %44 : vector<32x32xf32> to vector<32x32xbf16>
    %46 = vector.extract_strided_slice %45 {offsets = [0, 0], sizes = [32, 16], strides = [1, 1]} : vector<32x32xbf16> to vector<32x16xbf16>
    %c0_23 = arith.constant 0 : index
    %c1_24 = arith.constant 1 : index
    %c0_25 = arith.constant 0 : index
    %c0_26 = arith.constant 0 : index
    %47 = vector.load %arg6[%c0_23, %c1_24, %c0_25, %c0_26] : memref<2x4x32x16xbf16, #tpu.memory_space<vmem>>, vector<1x1x32x16xbf16>
    %48 = vector.shape_cast %47 : vector<1x1x32x16xbf16> to vector<32x16xbf16>
    %49 = vector.shape_cast %46 : vector<32x16xbf16> to vector<1x1x32x16xbf16>
    tpu.vector_store %arg6[%c0_23, %c1_24, %c0_25, %c0_26], %49 {strides = array<i32>} : memref<2x4x32x16xbf16, #tpu.memory_space<vmem>>, vector<1x1x32x16xbf16>,
    %50 = vector.extract_strided_slice %45 {offsets = [0, 16], sizes = [32, 16], strides = [1, 1]} : vector<32x32xbf16> to vector<32x16xbf16>
    %c1_27 = arith.constant 1 : index
    %c1_28 = arith.constant 1 : index
    %c0_29 = arith.constant 0 : index
    %c0_30 = arith.constant 0 : index
    %51 = vector.load %arg6[%c1_27, %c1_28, %c0_29, %c0_30] : memref<2x4x32x16xbf16, #tpu.memory_space<vmem>>, vector<1x1x32x16xbf16>
    %52 = vector.shape_cast %51 : vector<1x1x32x16xbf16> to vector<32x16xbf16>
    %53 = vector.shape_cast %50 : vector<32x16xbf16> to vector<1x1x32x16xbf16>
    tpu.vector_store %arg6[%c1_27, %c1_28, %c0_29, %c0_30], %53 {strides = array<i32>} : memref<2x4x32x16xbf16, #tpu.memory_space<vmem>>, vector<1x1x32x16xbf16>,
    %c2 = arith.constant 2 : index
    %c0_31 = arith.constant 0 : index
    %c0_32 = arith.constant 0 : index
    %54 = vector.load %arg4[%c2, %c0_31, %c0_32] : memref<4x32x448xbf16, #tpu.memory_space<vmem>>, vector<1x32x448xbf16>
    %55 = vector.shape_cast %54 : vector<1x32x448xbf16> to vector<32x448xbf16>
    %cst_33 = arith.constant dense<0.000000e+00> : vector<32x32xf32>
    %56 = tpu.matmul %55, %20, %cst_33 {dimension_numbers = #tpu.dot_dimension_numbers<[1], [0], [0], [1], [0, 0, 1, 1], [], []>} : vector<32x448xbf16>, vector<448x32xbf16>, vector<32x32xf32> -> vector<32x32xf32>
    %57 = vector.broadcast %21 : vector<32x1xf32> to vector<32x32xf32>
    %58 = arith.addf %56, %57 : vector<32x32xf32>
    %cst_34 = arith.constant 0.000000e+00 : f32
    %59 = vector.broadcast %cst_34 : f32 to vector<32x32xf32>
    %60 = arith.maximumf %58, %59 : vector<32x32xf32>
    %61 = arith.truncf %60 : vector<32x32xf32> to vector<32x32xbf16>
    %62 = vector.extract_strided_slice %61 {offsets = [0, 0], sizes = [32, 16], strides = [1, 1]} : vector<32x32xbf16> to vector<32x16xbf16>
    %c0_35 = arith.constant 0 : index
    %c2_36 = arith.constant 2 : index
    %c0_37 = arith.constant 0 : index
    %c0_38 = arith.constant 0 : index
    %63 = vector.load %arg6[%c0_35, %c2_36, %c0_37, %c0_38] : memref<2x4x32x16xbf16, #tpu.memory_space<vmem>>, vector<1x1x32x16xbf16>
    %64 = vector.shape_cast %63 : vector<1x1x32x16xbf16> to vector<32x16xbf16>
    %65 = vector.shape_cast %62 : vector<32x16xbf16> to vector<1x1x32x16xbf16>
    tpu.vector_store %arg6[%c0_35, %c2_36, %c0_37, %c0_38], %65 {strides = array<i32>} : memref<2x4x32x16xbf16, #tpu.memory_space<vmem>>, vector<1x1x32x16xbf16>,
    %66 = vector.extract_strided_slice %61 {offsets = [0, 16], sizes = [32, 16], strides = [1, 1]} : vector<32x32xbf16> to vector<32x16xbf16>
    %c1_39 = arith.constant 1 : index
    %c2_40 = arith.constant 2 : index
    %c0_41 = arith.constant 0 : index
    %c0_42 = arith.constant 0 : index
    %67 = vector.load %arg6[%c1_39, %c2_40, %c0_41, %c0_42] : memref<2x4x32x16xbf16, #tpu.memory_space<vmem>>, vector<1x1x32x16xbf16>
    %68 = vector.shape_cast %67 : vector<1x1x32x16xbf16> to vector<32x16xbf16>
    %69 = vector.shape_cast %66 : vector<32x16xbf16> to vector<1x1x32x16xbf16>
    tpu.vector_store %arg6[%c1_39, %c2_40, %c0_41, %c0_42], %69 {strides = array<i32>} : memref<2x4x32x16xbf16, #tpu.memory_space<vmem>>, vector<1x1x32x16xbf16>,
    %c3 = arith.constant 3 : index
    %c0_43 = arith.constant 0 : index
    %c0_44 = arith.constant 0 : index
    %70 = vector.load %arg4[%c3, %c0_43, %c0_44] : memref<4x32x448xbf16, #tpu.memory_space<vmem>>, vector<1x32x448xbf16>
    %71 = vector.shape_cast %70 : vector<1x32x448xbf16> to vector<32x448xbf16>
    %cst_45 = arith.constant dense<0.000000e+00> : vector<32x32xf32>
    %72 = tpu.matmul %71, %20, %cst_45 {dimension_numbers = #tpu.dot_dimension_numbers<[1], [0], [0], [1], [0, 0, 1, 1], [], []>} : vector<32x448xbf16>, vector<448x32xbf16>, vector<32x32xf32> -> vector<32x32xf32>
    %73 = vector.broadcast %21 : vector<32x1xf32> to vector<32x32xf32>
    %74 = arith.addf %72, %73 : vector<32x32xf32>
    %cst_46 = arith.constant 0.000000e+00 : f32
    %75 = vector.broadcast %cst_46 : f32 to vector<32x32xf32>
    %76 = arith.maximumf %74, %75 : vector<32x32xf32>
    %77 = arith.truncf %76 : vector<32x32xf32> to vector<32x32xbf16>
    %78 = vector.extract_strided_slice %77 {offsets = [0, 0], sizes = [32, 16], strides = [1, 1]} : vector<32x32xbf16> to vector<32x16xbf16>
    %c0_47 = arith.constant 0 : index
    %c3_48 = arith.constant 3 : index
    %c0_49 = arith.constant 0 : index
    %c0_50 = arith.constant 0 : index
    %79 = vector.load %arg6[%c0_47, %c3_48, %c0_49, %c0_50] : memref<2x4x32x16xbf16, #tpu.memory_space<vmem>>, vector<1x1x32x16xbf16>
    %80 = vector.shape_cast %79 : vector<1x1x32x16xbf16> to vector<32x16xbf16>
    %81 = vector.shape_cast %78 : vector<32x16xbf16> to vector<1x1x32x16xbf16>
    tpu.vector_store %arg6[%c0_47, %c3_48, %c0_49, %c0_50], %81 {strides = array<i32>} : memref<2x4x32x16xbf16, #tpu.memory_space<vmem>>, vector<1x1x32x16xbf16>,
    %82 = vector.extract_strided_slice %77 {offsets = [0, 16], sizes = [32, 16], strides = [1, 1]} : vector<32x32xbf16> to vector<32x16xbf16>
    %c1_51 = arith.constant 1 : index
    %c3_52 = arith.constant 3 : index
    %c0_53 = arith.constant 0 : index
    %c0_54 = arith.constant 0 : index
    %83 = vector.load %arg6[%c1_51, %c3_52, %c0_53, %c0_54] : memref<2x4x32x16xbf16, #tpu.memory_space<vmem>>, vector<1x1x32x16xbf16>
    %84 = vector.shape_cast %83 : vector<1x1x32x16xbf16> to vector<32x16xbf16>
    %85 = vector.shape_cast %82 : vector<32x16xbf16> to vector<1x1x32x16xbf16>
    tpu.vector_store %arg6[%c1_51, %c3_52, %c0_53, %c0_54], %85 {strides = array<i32>} : memref<2x4x32x16xbf16, #tpu.memory_space<vmem>>, vector<1x1x32x16xbf16>,
    return
  }
  func.func @transform_0(%arg0: i32, %arg1: i32, %arg2: i32) -> (i32, i32, i32) {
    %c0_i32 = arith.constant 0 : i32
    %c0_i32_0 = arith.constant 0 : i32
    %c0_i32_1 = arith.constant 0 : i32
    return %arg1, %c0_i32, %c0_i32_0 : i32, i32, i32
  }
  func.func @transform_1(%arg0: i32, %arg1: i32, %arg2: i32) -> (i32, i32, i32) {
    %c0_i32 = arith.constant 0 : i32
    %c0_i32_0 = arith.constant 0 : i32
    %c0_i32_1 = arith.constant 0 : i32
    return %c0_i32, %arg0, %c0_i32_0 : i32, i32, i32
  }
  func.func @transform_2(%arg0: i32, %arg1: i32, %arg2: i32) -> (i32, i32) {
    %c0_i32 = arith.constant 0 : i32
    %c0_i32_0 = arith.constant 0 : i32
    return %arg0, %c0_i32 : i32, i32
  }
  func.func @transform_3(%arg0: i32, %arg1: i32, %arg2: i32) -> (i32, i32, i32, i32) {
    %c0_i32 = arith.constant 0 : i32
    %c0_i32_0 = arith.constant 0 : i32
    return %arg1, %c0_i32, %arg0, %arg2 : i32, i32, i32, i32
  }
}

module attributes {stable_mosaic.version = 11 : i64} {
  func.func @_upconv_kernel(%arg0: i32, %arg1: i32, %arg2: i32, %arg3: memref<2x32x70xbf16, #tpu.memory_space<vmem>>, %arg4: memref<4x16x224xbf16, #tpu.memory_space<vmem>>, %arg5: memref<16x1xf32, #tpu.memory_space<vmem>>, %arg6: memref<2x4x16x64xbf16, #tpu.memory_space<vmem>>) attributes {dimension_semantics = [#tpu.dimension_semantics<parallel>, #tpu.dimension_semantics<parallel>, #tpu.dimension_semantics<parallel>], iteration_bounds = array<i64: 1, 1, 1>, scalar_prefetch = 0 : i64, scratch_operands = 0 : i64, tpu.core_type = #tpu.core_type<tc>, window_params = [{transform_indices = @transform_0, window_bounds = array<i64: 2, 32, 70>}, {transform_indices = @transform_1, window_bounds = array<i64: 4, 16, 224>}, {transform_indices = @transform_2, window_bounds = array<i64: 16, 1>}, {transform_indices = @transform_3, window_bounds = array<i64: 2, 4, 16, 64>}]} {
    %c0 = arith.constant 0 : index
    %c0_0 = arith.constant 0 : index
    %c0_1 = arith.constant 0 : index
    %0 = vector.load %arg3[%c0, %c0_0, %c0_1] : memref<2x32x70xbf16, #tpu.memory_space<vmem>>, vector<1x32x70xbf16>
    %1 = vector.shape_cast %0 : vector<1x32x70xbf16> to vector<32x70xbf16>
    %2 = vector.extract_strided_slice %1 {offsets = [0, 0], sizes = [32, 64], strides = [1, 1]} : vector<32x70xbf16> to vector<32x64xbf16>
    %3 = vector.extract_strided_slice %1 {offsets = [0, 1], sizes = [32, 64], strides = [1, 1]} : vector<32x70xbf16> to vector<32x64xbf16>
    %4 = vector.extract_strided_slice %1 {offsets = [0, 2], sizes = [32, 64], strides = [1, 1]} : vector<32x70xbf16> to vector<32x64xbf16>
    %5 = vector.extract_strided_slice %1 {offsets = [0, 3], sizes = [32, 64], strides = [1, 1]} : vector<32x70xbf16> to vector<32x64xbf16>
    %6 = vector.extract_strided_slice %1 {offsets = [0, 4], sizes = [32, 64], strides = [1, 1]} : vector<32x70xbf16> to vector<32x64xbf16>
    %7 = vector.extract_strided_slice %1 {offsets = [0, 5], sizes = [32, 64], strides = [1, 1]} : vector<32x70xbf16> to vector<32x64xbf16>
    %8 = vector.extract_strided_slice %1 {offsets = [0, 6], sizes = [32, 64], strides = [1, 1]} : vector<32x70xbf16> to vector<32x64xbf16>
    %9 = tpu.concatenate %2, %3, %4, %5, %6, %7, %8 in 0 : vector<32x64xbf16>, vector<32x64xbf16>, vector<32x64xbf16>, vector<32x64xbf16>, vector<32x64xbf16>, vector<32x64xbf16>, vector<32x64xbf16> -> vector<224x64xbf16>
    %c1 = arith.constant 1 : index
    %c0_2 = arith.constant 0 : index
    %c0_3 = arith.constant 0 : index
    %10 = vector.load %arg3[%c1, %c0_2, %c0_3] : memref<2x32x70xbf16, #tpu.memory_space<vmem>>, vector<1x32x70xbf16>
    %11 = vector.shape_cast %10 : vector<1x32x70xbf16> to vector<32x70xbf16>
    %12 = vector.extract_strided_slice %11 {offsets = [0, 0], sizes = [32, 64], strides = [1, 1]} : vector<32x70xbf16> to vector<32x64xbf16>
    %13 = vector.extract_strided_slice %11 {offsets = [0, 1], sizes = [32, 64], strides = [1, 1]} : vector<32x70xbf16> to vector<32x64xbf16>
    %14 = vector.extract_strided_slice %11 {offsets = [0, 2], sizes = [32, 64], strides = [1, 1]} : vector<32x70xbf16> to vector<32x64xbf16>
    %15 = vector.extract_strided_slice %11 {offsets = [0, 3], sizes = [32, 64], strides = [1, 1]} : vector<32x70xbf16> to vector<32x64xbf16>
    %16 = vector.extract_strided_slice %11 {offsets = [0, 4], sizes = [32, 64], strides = [1, 1]} : vector<32x70xbf16> to vector<32x64xbf16>
    %17 = vector.extract_strided_slice %11 {offsets = [0, 5], sizes = [32, 64], strides = [1, 1]} : vector<32x70xbf16> to vector<32x64xbf16>
    %18 = vector.extract_strided_slice %11 {offsets = [0, 6], sizes = [32, 64], strides = [1, 1]} : vector<32x70xbf16> to vector<32x64xbf16>
    %19 = tpu.concatenate %12, %13, %14, %15, %16, %17, %18 in 0 : vector<32x64xbf16>, vector<32x64xbf16>, vector<32x64xbf16>, vector<32x64xbf16>, vector<32x64xbf16>, vector<32x64xbf16>, vector<32x64xbf16> -> vector<224x64xbf16>
    %20 = tpu.concatenate %9, %19 in 1 : vector<224x64xbf16>, vector<224x64xbf16> -> vector<224x128xbf16>
    %c0_4 = arith.constant 0 : index
    %c0_5 = arith.constant 0 : index
    %21 = vector.load %arg5[%c0_4, %c0_5] : memref<16x1xf32, #tpu.memory_space<vmem>>, vector<16x1xf32>
    %c0_6 = arith.constant 0 : index
    %c0_7 = arith.constant 0 : index
    %c0_8 = arith.constant 0 : index
    %22 = vector.load %arg4[%c0_6, %c0_7, %c0_8] : memref<4x16x224xbf16, #tpu.memory_space<vmem>>, vector<1x16x224xbf16>
    %23 = vector.shape_cast %22 : vector<1x16x224xbf16> to vector<16x224xbf16>
    %cst = arith.constant dense<0.000000e+00> : vector<16x128xf32>
    %24 = tpu.matmul %23, %20, %cst {dimension_numbers = #tpu.dot_dimension_numbers<[1], [0], [0], [1], [0, 0, 1, 1], [], []>} : vector<16x224xbf16>, vector<224x128xbf16>, vector<16x128xf32> -> vector<16x128xf32>
    %25 = vector.broadcast %21 : vector<16x1xf32> to vector<16x128xf32>
    %26 = arith.addf %24, %25 : vector<16x128xf32>
    %cst_9 = arith.constant 0.000000e+00 : f32
    %27 = vector.broadcast %cst_9 : f32 to vector<16x128xf32>
    %28 = arith.maximumf %26, %27 : vector<16x128xf32>
    %29 = arith.truncf %28 : vector<16x128xf32> to vector<16x128xbf16>
    %30 = vector.extract_strided_slice %29 {offsets = [0, 0], sizes = [16, 64], strides = [1, 1]} : vector<16x128xbf16> to vector<16x64xbf16>
    %c0_10 = arith.constant 0 : index
    %c0_11 = arith.constant 0 : index
    %c0_12 = arith.constant 0 : index
    %c0_13 = arith.constant 0 : index
    %31 = vector.load %arg6[%c0_10, %c0_11, %c0_12, %c0_13] : memref<2x4x16x64xbf16, #tpu.memory_space<vmem>>, vector<1x1x16x64xbf16>
    %32 = vector.shape_cast %31 : vector<1x1x16x64xbf16> to vector<16x64xbf16>
    %33 = vector.shape_cast %30 : vector<16x64xbf16> to vector<1x1x16x64xbf16>
    tpu.vector_store %arg6[%c0_10, %c0_11, %c0_12, %c0_13], %33 {strides = array<i32>} : memref<2x4x16x64xbf16, #tpu.memory_space<vmem>>, vector<1x1x16x64xbf16>,
    %34 = vector.extract_strided_slice %29 {offsets = [0, 64], sizes = [16, 64], strides = [1, 1]} : vector<16x128xbf16> to vector<16x64xbf16>
    %c1_14 = arith.constant 1 : index
    %c0_15 = arith.constant 0 : index
    %c0_16 = arith.constant 0 : index
    %c0_17 = arith.constant 0 : index
    %35 = vector.load %arg6[%c1_14, %c0_15, %c0_16, %c0_17] : memref<2x4x16x64xbf16, #tpu.memory_space<vmem>>, vector<1x1x16x64xbf16>
    %36 = vector.shape_cast %35 : vector<1x1x16x64xbf16> to vector<16x64xbf16>
    %37 = vector.shape_cast %34 : vector<16x64xbf16> to vector<1x1x16x64xbf16>
    tpu.vector_store %arg6[%c1_14, %c0_15, %c0_16, %c0_17], %37 {strides = array<i32>} : memref<2x4x16x64xbf16, #tpu.memory_space<vmem>>, vector<1x1x16x64xbf16>,
    %c1_18 = arith.constant 1 : index
    %c0_19 = arith.constant 0 : index
    %c0_20 = arith.constant 0 : index
    %38 = vector.load %arg4[%c1_18, %c0_19, %c0_20] : memref<4x16x224xbf16, #tpu.memory_space<vmem>>, vector<1x16x224xbf16>
    %39 = vector.shape_cast %38 : vector<1x16x224xbf16> to vector<16x224xbf16>
    %cst_21 = arith.constant dense<0.000000e+00> : vector<16x128xf32>
    %40 = tpu.matmul %39, %20, %cst_21 {dimension_numbers = #tpu.dot_dimension_numbers<[1], [0], [0], [1], [0, 0, 1, 1], [], []>} : vector<16x224xbf16>, vector<224x128xbf16>, vector<16x128xf32> -> vector<16x128xf32>
    %41 = vector.broadcast %21 : vector<16x1xf32> to vector<16x128xf32>
    %42 = arith.addf %40, %41 : vector<16x128xf32>
    %cst_22 = arith.constant 0.000000e+00 : f32
    %43 = vector.broadcast %cst_22 : f32 to vector<16x128xf32>
    %44 = arith.maximumf %42, %43 : vector<16x128xf32>
    %45 = arith.truncf %44 : vector<16x128xf32> to vector<16x128xbf16>
    %46 = vector.extract_strided_slice %45 {offsets = [0, 0], sizes = [16, 64], strides = [1, 1]} : vector<16x128xbf16> to vector<16x64xbf16>
    %c0_23 = arith.constant 0 : index
    %c1_24 = arith.constant 1 : index
    %c0_25 = arith.constant 0 : index
    %c0_26 = arith.constant 0 : index
    %47 = vector.load %arg6[%c0_23, %c1_24, %c0_25, %c0_26] : memref<2x4x16x64xbf16, #tpu.memory_space<vmem>>, vector<1x1x16x64xbf16>
    %48 = vector.shape_cast %47 : vector<1x1x16x64xbf16> to vector<16x64xbf16>
    %49 = vector.shape_cast %46 : vector<16x64xbf16> to vector<1x1x16x64xbf16>
    tpu.vector_store %arg6[%c0_23, %c1_24, %c0_25, %c0_26], %49 {strides = array<i32>} : memref<2x4x16x64xbf16, #tpu.memory_space<vmem>>, vector<1x1x16x64xbf16>,
    %50 = vector.extract_strided_slice %45 {offsets = [0, 64], sizes = [16, 64], strides = [1, 1]} : vector<16x128xbf16> to vector<16x64xbf16>
    %c1_27 = arith.constant 1 : index
    %c1_28 = arith.constant 1 : index
    %c0_29 = arith.constant 0 : index
    %c0_30 = arith.constant 0 : index
    %51 = vector.load %arg6[%c1_27, %c1_28, %c0_29, %c0_30] : memref<2x4x16x64xbf16, #tpu.memory_space<vmem>>, vector<1x1x16x64xbf16>
    %52 = vector.shape_cast %51 : vector<1x1x16x64xbf16> to vector<16x64xbf16>
    %53 = vector.shape_cast %50 : vector<16x64xbf16> to vector<1x1x16x64xbf16>
    tpu.vector_store %arg6[%c1_27, %c1_28, %c0_29, %c0_30], %53 {strides = array<i32>} : memref<2x4x16x64xbf16, #tpu.memory_space<vmem>>, vector<1x1x16x64xbf16>,
    %c2 = arith.constant 2 : index
    %c0_31 = arith.constant 0 : index
    %c0_32 = arith.constant 0 : index
    %54 = vector.load %arg4[%c2, %c0_31, %c0_32] : memref<4x16x224xbf16, #tpu.memory_space<vmem>>, vector<1x16x224xbf16>
    %55 = vector.shape_cast %54 : vector<1x16x224xbf16> to vector<16x224xbf16>
    %cst_33 = arith.constant dense<0.000000e+00> : vector<16x128xf32>
    %56 = tpu.matmul %55, %20, %cst_33 {dimension_numbers = #tpu.dot_dimension_numbers<[1], [0], [0], [1], [0, 0, 1, 1], [], []>} : vector<16x224xbf16>, vector<224x128xbf16>, vector<16x128xf32> -> vector<16x128xf32>
    %57 = vector.broadcast %21 : vector<16x1xf32> to vector<16x128xf32>
    %58 = arith.addf %56, %57 : vector<16x128xf32>
    %cst_34 = arith.constant 0.000000e+00 : f32
    %59 = vector.broadcast %cst_34 : f32 to vector<16x128xf32>
    %60 = arith.maximumf %58, %59 : vector<16x128xf32>
    %61 = arith.truncf %60 : vector<16x128xf32> to vector<16x128xbf16>
    %62 = vector.extract_strided_slice %61 {offsets = [0, 0], sizes = [16, 64], strides = [1, 1]} : vector<16x128xbf16> to vector<16x64xbf16>
    %c0_35 = arith.constant 0 : index
    %c2_36 = arith.constant 2 : index
    %c0_37 = arith.constant 0 : index
    %c0_38 = arith.constant 0 : index
    %63 = vector.load %arg6[%c0_35, %c2_36, %c0_37, %c0_38] : memref<2x4x16x64xbf16, #tpu.memory_space<vmem>>, vector<1x1x16x64xbf16>
    %64 = vector.shape_cast %63 : vector<1x1x16x64xbf16> to vector<16x64xbf16>
    %65 = vector.shape_cast %62 : vector<16x64xbf16> to vector<1x1x16x64xbf16>
    tpu.vector_store %arg6[%c0_35, %c2_36, %c0_37, %c0_38], %65 {strides = array<i32>} : memref<2x4x16x64xbf16, #tpu.memory_space<vmem>>, vector<1x1x16x64xbf16>,
    %66 = vector.extract_strided_slice %61 {offsets = [0, 64], sizes = [16, 64], strides = [1, 1]} : vector<16x128xbf16> to vector<16x64xbf16>
    %c1_39 = arith.constant 1 : index
    %c2_40 = arith.constant 2 : index
    %c0_41 = arith.constant 0 : index
    %c0_42 = arith.constant 0 : index
    %67 = vector.load %arg6[%c1_39, %c2_40, %c0_41, %c0_42] : memref<2x4x16x64xbf16, #tpu.memory_space<vmem>>, vector<1x1x16x64xbf16>
    %68 = vector.shape_cast %67 : vector<1x1x16x64xbf16> to vector<16x64xbf16>
    %69 = vector.shape_cast %66 : vector<16x64xbf16> to vector<1x1x16x64xbf16>
    tpu.vector_store %arg6[%c1_39, %c2_40, %c0_41, %c0_42], %69 {strides = array<i32>} : memref<2x4x16x64xbf16, #tpu.memory_space<vmem>>, vector<1x1x16x64xbf16>,
    %c3 = arith.constant 3 : index
    %c0_43 = arith.constant 0 : index
    %c0_44 = arith.constant 0 : index
    %70 = vector.load %arg4[%c3, %c0_43, %c0_44] : memref<4x16x224xbf16, #tpu.memory_space<vmem>>, vector<1x16x224xbf16>
    %71 = vector.shape_cast %70 : vector<1x16x224xbf16> to vector<16x224xbf16>
    %cst_45 = arith.constant dense<0.000000e+00> : vector<16x128xf32>
    %72 = tpu.matmul %71, %20, %cst_45 {dimension_numbers = #tpu.dot_dimension_numbers<[1], [0], [0], [1], [0, 0, 1, 1], [], []>} : vector<16x224xbf16>, vector<224x128xbf16>, vector<16x128xf32> -> vector<16x128xf32>
    %73 = vector.broadcast %21 : vector<16x1xf32> to vector<16x128xf32>
    %74 = arith.addf %72, %73 : vector<16x128xf32>
    %cst_46 = arith.constant 0.000000e+00 : f32
    %75 = vector.broadcast %cst_46 : f32 to vector<16x128xf32>
    %76 = arith.maximumf %74, %75 : vector<16x128xf32>
    %77 = arith.truncf %76 : vector<16x128xf32> to vector<16x128xbf16>
    %78 = vector.extract_strided_slice %77 {offsets = [0, 0], sizes = [16, 64], strides = [1, 1]} : vector<16x128xbf16> to vector<16x64xbf16>
    %c0_47 = arith.constant 0 : index
    %c3_48 = arith.constant 3 : index
    %c0_49 = arith.constant 0 : index
    %c0_50 = arith.constant 0 : index
    %79 = vector.load %arg6[%c0_47, %c3_48, %c0_49, %c0_50] : memref<2x4x16x64xbf16, #tpu.memory_space<vmem>>, vector<1x1x16x64xbf16>
    %80 = vector.shape_cast %79 : vector<1x1x16x64xbf16> to vector<16x64xbf16>
    %81 = vector.shape_cast %78 : vector<16x64xbf16> to vector<1x1x16x64xbf16>
    tpu.vector_store %arg6[%c0_47, %c3_48, %c0_49, %c0_50], %81 {strides = array<i32>} : memref<2x4x16x64xbf16, #tpu.memory_space<vmem>>, vector<1x1x16x64xbf16>,
    %82 = vector.extract_strided_slice %77 {offsets = [0, 64], sizes = [16, 64], strides = [1, 1]} : vector<16x128xbf16> to vector<16x64xbf16>
    %c1_51 = arith.constant 1 : index
    %c3_52 = arith.constant 3 : index
    %c0_53 = arith.constant 0 : index
    %c0_54 = arith.constant 0 : index
    %83 = vector.load %arg6[%c1_51, %c3_52, %c0_53, %c0_54] : memref<2x4x16x64xbf16, #tpu.memory_space<vmem>>, vector<1x1x16x64xbf16>
    %84 = vector.shape_cast %83 : vector<1x1x16x64xbf16> to vector<16x64xbf16>
    %85 = vector.shape_cast %82 : vector<16x64xbf16> to vector<1x1x16x64xbf16>
    tpu.vector_store %arg6[%c1_51, %c3_52, %c0_53, %c0_54], %85 {strides = array<i32>} : memref<2x4x16x64xbf16, #tpu.memory_space<vmem>>, vector<1x1x16x64xbf16>,
    return
  }
  func.func @transform_0(%arg0: i32, %arg1: i32, %arg2: i32) -> (i32, i32, i32) {
    %c0_i32 = arith.constant 0 : i32
    %c0_i32_0 = arith.constant 0 : i32
    %c0_i32_1 = arith.constant 0 : i32
    return %arg1, %c0_i32, %c0_i32_0 : i32, i32, i32
  }
  func.func @transform_1(%arg0: i32, %arg1: i32, %arg2: i32) -> (i32, i32, i32) {
    %c0_i32 = arith.constant 0 : i32
    %c0_i32_0 = arith.constant 0 : i32
    %c0_i32_1 = arith.constant 0 : i32
    return %c0_i32, %arg0, %c0_i32_0 : i32, i32, i32
  }
  func.func @transform_2(%arg0: i32, %arg1: i32, %arg2: i32) -> (i32, i32) {
    %c0_i32 = arith.constant 0 : i32
    %c0_i32_0 = arith.constant 0 : i32
    return %arg0, %c0_i32 : i32, i32
  }
  func.func @transform_3(%arg0: i32, %arg1: i32, %arg2: i32) -> (i32, i32, i32, i32) {
    %c0_i32 = arith.constant 0 : i32
    %c0_i32_0 = arith.constant 0 : i32
    return %arg1, %c0_i32, %arg0, %arg2 : i32, i32, i32, i32
  }
}

module attributes {stable_mosaic.version = 11 : i64} {
  func.func @_upconv_kernel(%arg0: i32, %arg1: i32, %arg2: i32, %arg3: memref<1x16x384xbf16, #tpu.memory_space<vmem>>, %arg4: memref<4x8x112xbf16, #tpu.memory_space<vmem>>, %arg5: memref<8x1xf32, #tpu.memory_space<vmem>>, %arg6: memref<1x4x8x256xbf16, #tpu.memory_space<vmem>>) attributes {dimension_semantics = [#tpu.dimension_semantics<parallel>, #tpu.dimension_semantics<parallel>, #tpu.dimension_semantics<parallel>], iteration_bounds = array<i64: 1, 2, 1>, scalar_prefetch = 0 : i64, scratch_operands = 0 : i64, tpu.core_type = #tpu.core_type<tc>, window_params = [{transform_indices = @transform_0, window_bounds = array<i64: 1, 16, 384>}, {transform_indices = @transform_1, window_bounds = array<i64: 4, 8, 112>}, {transform_indices = @transform_2, window_bounds = array<i64: 8, 1>}, {transform_indices = @transform_3, window_bounds = array<i64: 1, 4, 8, 256>}]} {
    %c256_i32 = arith.constant 256 : i32
    %0 = arith.muli %arg2, %c256_i32 : i32
    %1 = tpu.assume_multiple %0, 128 : i32
    %c0 = arith.constant 0 : index
    %c0_0 = arith.constant 0 : index
    %2 = arith.index_cast %1 : i32 to index
    %3 = vector.load %arg3[%c0, %c0_0, %2] : memref<1x16x384xbf16, #tpu.memory_space<vmem>>, vector<1x16x384xbf16>
    %4 = vector.shape_cast %3 : vector<1x16x384xbf16> to vector<16x384xbf16>
    %5 = vector.extract_strided_slice %4 {offsets = [0, 0], sizes = [16, 256], strides = [1, 1]} : vector<16x384xbf16> to vector<16x256xbf16>
    %6 = vector.extract_strided_slice %4 {offsets = [0, 1], sizes = [16, 256], strides = [1, 1]} : vector<16x384xbf16> to vector<16x256xbf16>
    %7 = vector.extract_strided_slice %4 {offsets = [0, 2], sizes = [16, 256], strides = [1, 1]} : vector<16x384xbf16> to vector<16x256xbf16>
    %8 = vector.extract_strided_slice %4 {offsets = [0, 3], sizes = [16, 256], strides = [1, 1]} : vector<16x384xbf16> to vector<16x256xbf16>
    %9 = vector.extract_strided_slice %4 {offsets = [0, 4], sizes = [16, 256], strides = [1, 1]} : vector<16x384xbf16> to vector<16x256xbf16>
    %10 = vector.extract_strided_slice %4 {offsets = [0, 5], sizes = [16, 256], strides = [1, 1]} : vector<16x384xbf16> to vector<16x256xbf16>
    %11 = vector.extract_strided_slice %4 {offsets = [0, 6], sizes = [16, 256], strides = [1, 1]} : vector<16x384xbf16> to vector<16x256xbf16>
    %12 = tpu.concatenate %5, %6, %7, %8, %9, %10, %11 in 0 : vector<16x256xbf16>, vector<16x256xbf16>, vector<16x256xbf16>, vector<16x256xbf16>, vector<16x256xbf16>, vector<16x256xbf16>, vector<16x256xbf16> -> vector<112x256xbf16>
    %c0_1 = arith.constant 0 : index
    %c0_2 = arith.constant 0 : index
    %13 = vector.load %arg5[%c0_1, %c0_2] : memref<8x1xf32, #tpu.memory_space<vmem>>, vector<8x1xf32>
    %c0_3 = arith.constant 0 : index
    %c0_4 = arith.constant 0 : index
    %c0_5 = arith.constant 0 : index
    %14 = vector.load %arg4[%c0_3, %c0_4, %c0_5] : memref<4x8x112xbf16, #tpu.memory_space<vmem>>, vector<1x8x112xbf16>
    %15 = vector.shape_cast %14 : vector<1x8x112xbf16> to vector<8x112xbf16>
    %cst = arith.constant dense<0.000000e+00> : vector<8x256xf32>
    %16 = tpu.matmul %15, %12, %cst {dimension_numbers = #tpu.dot_dimension_numbers<[1], [0], [0], [1], [0, 0, 1, 1], [], []>} : vector<8x112xbf16>, vector<112x256xbf16>, vector<8x256xf32> -> vector<8x256xf32>
    %17 = vector.broadcast %13 : vector<8x1xf32> to vector<8x256xf32>
    %18 = arith.addf %16, %17 : vector<8x256xf32>
    %cst_6 = arith.constant 0.000000e+00 : f32
    %19 = vector.broadcast %cst_6 : f32 to vector<8x256xf32>
    %20 = arith.maximumf %18, %19 : vector<8x256xf32>
    %21 = arith.truncf %20 : vector<8x256xf32> to vector<8x256xbf16>
    %c0_7 = arith.constant 0 : index
    %c0_8 = arith.constant 0 : index
    %c0_9 = arith.constant 0 : index
    %c0_10 = arith.constant 0 : index
    %22 = vector.load %arg6[%c0_7, %c0_8, %c0_9, %c0_10] : memref<1x4x8x256xbf16, #tpu.memory_space<vmem>>, vector<1x1x8x256xbf16>
    %23 = vector.shape_cast %22 : vector<1x1x8x256xbf16> to vector<8x256xbf16>
    %24 = vector.shape_cast %21 : vector<8x256xbf16> to vector<1x1x8x256xbf16>
    tpu.vector_store %arg6[%c0_7, %c0_8, %c0_9, %c0_10], %24 {strides = array<i32>} : memref<1x4x8x256xbf16, #tpu.memory_space<vmem>>, vector<1x1x8x256xbf16>,
    %c1 = arith.constant 1 : index
    %c0_11 = arith.constant 0 : index
    %c0_12 = arith.constant 0 : index
    %25 = vector.load %arg4[%c1, %c0_11, %c0_12] : memref<4x8x112xbf16, #tpu.memory_space<vmem>>, vector<1x8x112xbf16>
    %26 = vector.shape_cast %25 : vector<1x8x112xbf16> to vector<8x112xbf16>
    %cst_13 = arith.constant dense<0.000000e+00> : vector<8x256xf32>
    %27 = tpu.matmul %26, %12, %cst_13 {dimension_numbers = #tpu.dot_dimension_numbers<[1], [0], [0], [1], [0, 0, 1, 1], [], []>} : vector<8x112xbf16>, vector<112x256xbf16>, vector<8x256xf32> -> vector<8x256xf32>
    %28 = vector.broadcast %13 : vector<8x1xf32> to vector<8x256xf32>
    %29 = arith.addf %27, %28 : vector<8x256xf32>
    %cst_14 = arith.constant 0.000000e+00 : f32
    %30 = vector.broadcast %cst_14 : f32 to vector<8x256xf32>
    %31 = arith.maximumf %29, %30 : vector<8x256xf32>
    %32 = arith.truncf %31 : vector<8x256xf32> to vector<8x256xbf16>
    %c0_15 = arith.constant 0 : index
    %c1_16 = arith.constant 1 : index
    %c0_17 = arith.constant 0 : index
    %c0_18 = arith.constant 0 : index
    %33 = vector.load %arg6[%c0_15, %c1_16, %c0_17, %c0_18] : memref<1x4x8x256xbf16, #tpu.memory_space<vmem>>, vector<1x1x8x256xbf16>
    %34 = vector.shape_cast %33 : vector<1x1x8x256xbf16> to vector<8x256xbf16>
    %35 = vector.shape_cast %32 : vector<8x256xbf16> to vector<1x1x8x256xbf16>
    tpu.vector_store %arg6[%c0_15, %c1_16, %c0_17, %c0_18], %35 {strides = array<i32>} : memref<1x4x8x256xbf16, #tpu.memory_space<vmem>>, vector<1x1x8x256xbf16>,
    %c2 = arith.constant 2 : index
    %c0_19 = arith.constant 0 : index
    %c0_20 = arith.constant 0 : index
    %36 = vector.load %arg4[%c2, %c0_19, %c0_20] : memref<4x8x112xbf16, #tpu.memory_space<vmem>>, vector<1x8x112xbf16>
    %37 = vector.shape_cast %36 : vector<1x8x112xbf16> to vector<8x112xbf16>
    %cst_21 = arith.constant dense<0.000000e+00> : vector<8x256xf32>
    %38 = tpu.matmul %37, %12, %cst_21 {dimension_numbers = #tpu.dot_dimension_numbers<[1], [0], [0], [1], [0, 0, 1, 1], [], []>} : vector<8x112xbf16>, vector<112x256xbf16>, vector<8x256xf32> -> vector<8x256xf32>
    %39 = vector.broadcast %13 : vector<8x1xf32> to vector<8x256xf32>
    %40 = arith.addf %38, %39 : vector<8x256xf32>
    %cst_22 = arith.constant 0.000000e+00 : f32
    %41 = vector.broadcast %cst_22 : f32 to vector<8x256xf32>
    %42 = arith.maximumf %40, %41 : vector<8x256xf32>
    %43 = arith.truncf %42 : vector<8x256xf32> to vector<8x256xbf16>
    %c0_23 = arith.constant 0 : index
    %c2_24 = arith.constant 2 : index
    %c0_25 = arith.constant 0 : index
    %c0_26 = arith.constant 0 : index
    %44 = vector.load %arg6[%c0_23, %c2_24, %c0_25, %c0_26] : memref<1x4x8x256xbf16, #tpu.memory_space<vmem>>, vector<1x1x8x256xbf16>
    %45 = vector.shape_cast %44 : vector<1x1x8x256xbf16> to vector<8x256xbf16>
    %46 = vector.shape_cast %43 : vector<8x256xbf16> to vector<1x1x8x256xbf16>
    tpu.vector_store %arg6[%c0_23, %c2_24, %c0_25, %c0_26], %46 {strides = array<i32>} : memref<1x4x8x256xbf16, #tpu.memory_space<vmem>>, vector<1x1x8x256xbf16>,
    %c3 = arith.constant 3 : index
    %c0_27 = arith.constant 0 : index
    %c0_28 = arith.constant 0 : index
    %47 = vector.load %arg4[%c3, %c0_27, %c0_28] : memref<4x8x112xbf16, #tpu.memory_space<vmem>>, vector<1x8x112xbf16>
    %48 = vector.shape_cast %47 : vector<1x8x112xbf16> to vector<8x112xbf16>
    %cst_29 = arith.constant dense<0.000000e+00> : vector<8x256xf32>
    %49 = tpu.matmul %48, %12, %cst_29 {dimension_numbers = #tpu.dot_dimension_numbers<[1], [0], [0], [1], [0, 0, 1, 1], [], []>} : vector<8x112xbf16>, vector<112x256xbf16>, vector<8x256xf32> -> vector<8x256xf32>
    %50 = vector.broadcast %13 : vector<8x1xf32> to vector<8x256xf32>
    %51 = arith.addf %49, %50 : vector<8x256xf32>
    %cst_30 = arith.constant 0.000000e+00 : f32
    %52 = vector.broadcast %cst_30 : f32 to vector<8x256xf32>
    %53 = arith.maximumf %51, %52 : vector<8x256xf32>
    %54 = arith.truncf %53 : vector<8x256xf32> to vector<8x256xbf16>
    %c0_31 = arith.constant 0 : index
    %c3_32 = arith.constant 3 : index
    %c0_33 = arith.constant 0 : index
    %c0_34 = arith.constant 0 : index
    %55 = vector.load %arg6[%c0_31, %c3_32, %c0_33, %c0_34] : memref<1x4x8x256xbf16, #tpu.memory_space<vmem>>, vector<1x1x8x256xbf16>
    %56 = vector.shape_cast %55 : vector<1x1x8x256xbf16> to vector<8x256xbf16>
    %57 = vector.shape_cast %54 : vector<8x256xbf16> to vector<1x1x8x256xbf16>
    tpu.vector_store %arg6[%c0_31, %c3_32, %c0_33, %c0_34], %57 {strides = array<i32>} : memref<1x4x8x256xbf16, #tpu.memory_space<vmem>>, vector<1x1x8x256xbf16>,
    return
  }
  func.func @transform_0(%arg0: i32, %arg1: i32, %arg2: i32) -> (i32, i32, i32) {
    %c0_i32 = arith.constant 0 : i32
    %c0_i32_0 = arith.constant 0 : i32
    %c0_i32_1 = arith.constant 0 : i32
    return %arg1, %c0_i32, %c0_i32_0 : i32, i32, i32
  }
  func.func @transform_1(%arg0: i32, %arg1: i32, %arg2: i32) -> (i32, i32, i32) {
    %c0_i32 = arith.constant 0 : i32
    %c0_i32_0 = arith.constant 0 : i32
    %c0_i32_1 = arith.constant 0 : i32
    return %c0_i32, %arg0, %c0_i32_0 : i32, i32, i32
  }
  func.func @transform_2(%arg0: i32, %arg1: i32, %arg2: i32) -> (i32, i32) {
    %c0_i32 = arith.constant 0 : i32
    %c0_i32_0 = arith.constant 0 : i32
    return %arg0, %c0_i32 : i32, i32
  }
  func.func @transform_3(%arg0: i32, %arg1: i32, %arg2: i32) -> (i32, i32, i32, i32) {
    %c0_i32 = arith.constant 0 : i32
    %c0_i32_0 = arith.constant 0 : i32
    return %arg1, %c0_i32, %arg0, %arg2 : i32, i32, i32, i32
  }
}

module attributes {stable_mosaic.version = 11 : i64} {
  func.func @_upconv_kernel(%arg0: i32, %arg1: i32, %arg2: i32, %arg3: memref<1x8x1152xbf16, #tpu.memory_space<vmem>>, %arg4: memref<4x4x56xbf16, #tpu.memory_space<vmem>>, %arg5: memref<4x1xf32, #tpu.memory_space<vmem>>, %arg6: memref<1x4x4x512xbf16, #tpu.memory_space<vmem>>) attributes {dimension_semantics = [#tpu.dimension_semantics<parallel>, #tpu.dimension_semantics<parallel>, #tpu.dimension_semantics<parallel>], iteration_bounds = array<i64: 1, 2, 2>, scalar_prefetch = 0 : i64, scratch_operands = 0 : i64, tpu.core_type = #tpu.core_type<tc>, window_params = [{transform_indices = @transform_0, window_bounds = array<i64: 1, 8, 1152>}, {transform_indices = @transform_1, window_bounds = array<i64: 4, 4, 56>}, {transform_indices = @transform_2, window_bounds = array<i64: 4, 1>}, {transform_indices = @transform_3, window_bounds = array<i64: 1, 4, 4, 512>}]} {
    %c512_i32 = arith.constant 512 : i32
    %0 = arith.muli %arg2, %c512_i32 : i32
    %1 = tpu.assume_multiple %0, 128 : i32
    %c0 = arith.constant 0 : index
    %c0_0 = arith.constant 0 : index
    %2 = arith.index_cast %1 : i32 to index
    %3 = vector.load %arg3[%c0, %c0_0, %2] : memref<1x8x1152xbf16, #tpu.memory_space<vmem>>, vector<1x8x640xbf16>
    %4 = vector.shape_cast %3 : vector<1x8x640xbf16> to vector<8x640xbf16>
    %5 = vector.extract_strided_slice %4 {offsets = [0, 0], sizes = [8, 512], strides = [1, 1]} : vector<8x640xbf16> to vector<8x512xbf16>
    %6 = vector.extract_strided_slice %4 {offsets = [0, 1], sizes = [8, 512], strides = [1, 1]} : vector<8x640xbf16> to vector<8x512xbf16>
    %7 = vector.extract_strided_slice %4 {offsets = [0, 2], sizes = [8, 512], strides = [1, 1]} : vector<8x640xbf16> to vector<8x512xbf16>
    %8 = vector.extract_strided_slice %4 {offsets = [0, 3], sizes = [8, 512], strides = [1, 1]} : vector<8x640xbf16> to vector<8x512xbf16>
    %9 = vector.extract_strided_slice %4 {offsets = [0, 4], sizes = [8, 512], strides = [1, 1]} : vector<8x640xbf16> to vector<8x512xbf16>
    %10 = vector.extract_strided_slice %4 {offsets = [0, 5], sizes = [8, 512], strides = [1, 1]} : vector<8x640xbf16> to vector<8x512xbf16>
    %11 = vector.extract_strided_slice %4 {offsets = [0, 6], sizes = [8, 512], strides = [1, 1]} : vector<8x640xbf16> to vector<8x512xbf16>
    %12 = tpu.concatenate %5, %6, %7, %8, %9, %10, %11 in 0 : vector<8x512xbf16>, vector<8x512xbf16>, vector<8x512xbf16>, vector<8x512xbf16>, vector<8x512xbf16>, vector<8x512xbf16>, vector<8x512xbf16> -> vector<56x512xbf16>
    %c0_1 = arith.constant 0 : index
    %c0_2 = arith.constant 0 : index
    %13 = vector.load %arg5[%c0_1, %c0_2] : memref<4x1xf32, #tpu.memory_space<vmem>>, vector<4x1xf32>
    %c0_3 = arith.constant 0 : index
    %c0_4 = arith.constant 0 : index
    %c0_5 = arith.constant 0 : index
    %14 = vector.load %arg4[%c0_3, %c0_4, %c0_5] : memref<4x4x56xbf16, #tpu.memory_space<vmem>>, vector<1x4x56xbf16>
    %15 = vector.shape_cast %14 : vector<1x4x56xbf16> to vector<4x56xbf16>
    %cst = arith.constant dense<0.000000e+00> : vector<4x512xf32>
    %16 = tpu.matmul %15, %12, %cst {dimension_numbers = #tpu.dot_dimension_numbers<[1], [0], [0], [1], [0, 0, 1, 1], [], []>} : vector<4x56xbf16>, vector<56x512xbf16>, vector<4x512xf32> -> vector<4x512xf32>
    %17 = vector.broadcast %13 : vector<4x1xf32> to vector<4x512xf32>
    %18 = arith.addf %16, %17 : vector<4x512xf32>
    %cst_6 = arith.constant 0.000000e+00 : f32
    %19 = vector.broadcast %cst_6 : f32 to vector<4x512xf32>
    %20 = arith.maximumf %18, %19 : vector<4x512xf32>
    %21 = arith.truncf %20 : vector<4x512xf32> to vector<4x512xbf16>
    %c0_7 = arith.constant 0 : index
    %c0_8 = arith.constant 0 : index
    %c0_9 = arith.constant 0 : index
    %c0_10 = arith.constant 0 : index
    %22 = vector.load %arg6[%c0_7, %c0_8, %c0_9, %c0_10] : memref<1x4x4x512xbf16, #tpu.memory_space<vmem>>, vector<1x1x4x512xbf16>
    %23 = vector.shape_cast %22 : vector<1x1x4x512xbf16> to vector<4x512xbf16>
    %24 = vector.shape_cast %21 : vector<4x512xbf16> to vector<1x1x4x512xbf16>
    tpu.vector_store %arg6[%c0_7, %c0_8, %c0_9, %c0_10], %24 {strides = array<i32>} : memref<1x4x4x512xbf16, #tpu.memory_space<vmem>>, vector<1x1x4x512xbf16>,
    %c1 = arith.constant 1 : index
    %c0_11 = arith.constant 0 : index
    %c0_12 = arith.constant 0 : index
    %25 = vector.load %arg4[%c1, %c0_11, %c0_12] : memref<4x4x56xbf16, #tpu.memory_space<vmem>>, vector<1x4x56xbf16>
    %26 = vector.shape_cast %25 : vector<1x4x56xbf16> to vector<4x56xbf16>
    %cst_13 = arith.constant dense<0.000000e+00> : vector<4x512xf32>
    %27 = tpu.matmul %26, %12, %cst_13 {dimension_numbers = #tpu.dot_dimension_numbers<[1], [0], [0], [1], [0, 0, 1, 1], [], []>} : vector<4x56xbf16>, vector<56x512xbf16>, vector<4x512xf32> -> vector<4x512xf32>
    %28 = vector.broadcast %13 : vector<4x1xf32> to vector<4x512xf32>
    %29 = arith.addf %27, %28 : vector<4x512xf32>
    %cst_14 = arith.constant 0.000000e+00 : f32
    %30 = vector.broadcast %cst_14 : f32 to vector<4x512xf32>
    %31 = arith.maximumf %29, %30 : vector<4x512xf32>
    %32 = arith.truncf %31 : vector<4x512xf32> to vector<4x512xbf16>
    %c0_15 = arith.constant 0 : index
    %c1_16 = arith.constant 1 : index
    %c0_17 = arith.constant 0 : index
    %c0_18 = arith.constant 0 : index
    %33 = vector.load %arg6[%c0_15, %c1_16, %c0_17, %c0_18] : memref<1x4x4x512xbf16, #tpu.memory_space<vmem>>, vector<1x1x4x512xbf16>
    %34 = vector.shape_cast %33 : vector<1x1x4x512xbf16> to vector<4x512xbf16>
    %35 = vector.shape_cast %32 : vector<4x512xbf16> to vector<1x1x4x512xbf16>
    tpu.vector_store %arg6[%c0_15, %c1_16, %c0_17, %c0_18], %35 {strides = array<i32>} : memref<1x4x4x512xbf16, #tpu.memory_space<vmem>>, vector<1x1x4x512xbf16>,
    %c2 = arith.constant 2 : index
    %c0_19 = arith.constant 0 : index
    %c0_20 = arith.constant 0 : index
    %36 = vector.load %arg4[%c2, %c0_19, %c0_20] : memref<4x4x56xbf16, #tpu.memory_space<vmem>>, vector<1x4x56xbf16>
    %37 = vector.shape_cast %36 : vector<1x4x56xbf16> to vector<4x56xbf16>
    %cst_21 = arith.constant dense<0.000000e+00> : vector<4x512xf32>
    %38 = tpu.matmul %37, %12, %cst_21 {dimension_numbers = #tpu.dot_dimension_numbers<[1], [0], [0], [1], [0, 0, 1, 1], [], []>} : vector<4x56xbf16>, vector<56x512xbf16>, vector<4x512xf32> -> vector<4x512xf32>
    %39 = vector.broadcast %13 : vector<4x1xf32> to vector<4x512xf32>
    %40 = arith.addf %38, %39 : vector<4x512xf32>
    %cst_22 = arith.constant 0.000000e+00 : f32
    %41 = vector.broadcast %cst_22 : f32 to vector<4x512xf32>
    %42 = arith.maximumf %40, %41 : vector<4x512xf32>
    %43 = arith.truncf %42 : vector<4x512xf32> to vector<4x512xbf16>
    %c0_23 = arith.constant 0 : index
    %c2_24 = arith.constant 2 : index
    %c0_25 = arith.constant 0 : index
    %c0_26 = arith.constant 0 : index
    %44 = vector.load %arg6[%c0_23, %c2_24, %c0_25, %c0_26] : memref<1x4x4x512xbf16, #tpu.memory_space<vmem>>, vector<1x1x4x512xbf16>
    %45 = vector.shape_cast %44 : vector<1x1x4x512xbf16> to vector<4x512xbf16>
    %46 = vector.shape_cast %43 : vector<4x512xbf16> to vector<1x1x4x512xbf16>
    tpu.vector_store %arg6[%c0_23, %c2_24, %c0_25, %c0_26], %46 {strides = array<i32>} : memref<1x4x4x512xbf16, #tpu.memory_space<vmem>>, vector<1x1x4x512xbf16>,
    %c3 = arith.constant 3 : index
    %c0_27 = arith.constant 0 : index
    %c0_28 = arith.constant 0 : index
    %47 = vector.load %arg4[%c3, %c0_27, %c0_28] : memref<4x4x56xbf16, #tpu.memory_space<vmem>>, vector<1x4x56xbf16>
    %48 = vector.shape_cast %47 : vector<1x4x56xbf16> to vector<4x56xbf16>
    %cst_29 = arith.constant dense<0.000000e+00> : vector<4x512xf32>
    %49 = tpu.matmul %48, %12, %cst_29 {dimension_numbers = #tpu.dot_dimension_numbers<[1], [0], [0], [1], [0, 0, 1, 1], [], []>} : vector<4x56xbf16>, vector<56x512xbf16>, vector<4x512xf32> -> vector<4x512xf32>
    %50 = vector.broadcast %13 : vector<4x1xf32> to vector<4x512xf32>
    %51 = arith.addf %49, %50 : vector<4x512xf32>
    %cst_30 = arith.constant 0.000000e+00 : f32
    %52 = vector.broadcast %cst_30 : f32 to vector<4x512xf32>
    %53 = arith.maximumf %51, %52 : vector<4x512xf32>
    %54 = arith.truncf %53 : vector<4x512xf32> to vector<4x512xbf16>
    %c0_31 = arith.constant 0 : index
    %c3_32 = arith.constant 3 : index
    %c0_33 = arith.constant 0 : index
    %c0_34 = arith.constant 0 : index
    %55 = vector.load %arg6[%c0_31, %c3_32, %c0_33, %c0_34] : memref<1x4x4x512xbf16, #tpu.memory_space<vmem>>, vector<1x1x4x512xbf16>
    %56 = vector.shape_cast %55 : vector<1x1x4x512xbf16> to vector<4x512xbf16>
    %57 = vector.shape_cast %54 : vector<4x512xbf16> to vector<1x1x4x512xbf16>
    tpu.vector_store %arg6[%c0_31, %c3_32, %c0_33, %c0_34], %57 {strides = array<i32>} : memref<1x4x4x512xbf16, #tpu.memory_space<vmem>>, vector<1x1x4x512xbf16>,
    return
  }
  func.func @transform_0(%arg0: i32, %arg1: i32, %arg2: i32) -> (i32, i32, i32) {
    %c0_i32 = arith.constant 0 : i32
    %c0_i32_0 = arith.constant 0 : i32
    %c0_i32_1 = arith.constant 0 : i32
    return %arg1, %c0_i32, %c0_i32_0 : i32, i32, i32
  }
  func.func @transform_1(%arg0: i32, %arg1: i32, %arg2: i32) -> (i32, i32, i32) {
    %c0_i32 = arith.constant 0 : i32
    %c0_i32_0 = arith.constant 0 : i32
    %c0_i32_1 = arith.constant 0 : i32
    return %c0_i32, %arg0, %c0_i32_0 : i32, i32, i32
  }
  func.func @transform_2(%arg0: i32, %arg1: i32, %arg2: i32) -> (i32, i32) {
    %c0_i32 = arith.constant 0 : i32
    %c0_i32_0 = arith.constant 0 : i32
    return %arg0, %c0_i32 : i32, i32
  }
  func.func @transform_3(%arg0: i32, %arg1: i32, %arg2: i32) -> (i32, i32, i32, i32) {
    %c0_i32 = arith.constant 0 : i32
    %c0_i32_0 = arith.constant 0 : i32
    return %arg1, %c0_i32, %arg0, %arg2 : i32, i32, i32, i32
  }
}

module attributes {stable_mosaic.version = 11 : i64} {
  func.func @_upconv_kernel(%arg0: i32, %arg1: i32, %arg2: i32, %arg3: memref<1x4x4224xbf16, #tpu.memory_space<vmem>>, %arg4: memref<4x1x28xbf16, #tpu.memory_space<vmem>>, %arg5: memref<1x1xf32, #tpu.memory_space<vmem>>, %arg6: memref<1x4x1x512xbf16, #tpu.memory_space<vmem>>) attributes {dimension_semantics = [#tpu.dimension_semantics<parallel>, #tpu.dimension_semantics<parallel>, #tpu.dimension_semantics<parallel>], iteration_bounds = array<i64: 1, 2, 8>, scalar_prefetch = 0 : i64, scratch_operands = 0 : i64, tpu.core_type = #tpu.core_type<tc>, window_params = [{transform_indices = @transform_0, window_bounds = array<i64: 1, 4, 4224>}, {transform_indices = @transform_1, window_bounds = array<i64: 4, 1, 28>}, {transform_indices = @transform_2, window_bounds = array<i64: 1, 1>}, {transform_indices = @transform_3, window_bounds = array<i64: 1, 4, 1, 512>}]} {
    %c512_i32 = arith.constant 512 : i32
    %0 = arith.muli %arg2, %c512_i32 : i32
    %1 = tpu.assume_multiple %0, 128 : i32
    %c0 = arith.constant 0 : index
    %c0_0 = arith.constant 0 : index
    %2 = arith.index_cast %1 : i32 to index
    %3 = vector.load %arg3[%c0, %c0_0, %2] : memref<1x4x4224xbf16, #tpu.memory_space<vmem>>, vector<1x4x640xbf16>
    %4 = vector.shape_cast %3 : vector<1x4x640xbf16> to vector<4x640xbf16>
    %5 = vector.extract_strided_slice %4 {offsets = [0, 0], sizes = [4, 512], strides = [1, 1]} : vector<4x640xbf16> to vector<4x512xbf16>
    %6 = vector.extract_strided_slice %4 {offsets = [0, 1], sizes = [4, 512], strides = [1, 1]} : vector<4x640xbf16> to vector<4x512xbf16>
    %7 = vector.extract_strided_slice %4 {offsets = [0, 2], sizes = [4, 512], strides = [1, 1]} : vector<4x640xbf16> to vector<4x512xbf16>
    %8 = vector.extract_strided_slice %4 {offsets = [0, 3], sizes = [4, 512], strides = [1, 1]} : vector<4x640xbf16> to vector<4x512xbf16>
    %9 = vector.extract_strided_slice %4 {offsets = [0, 4], sizes = [4, 512], strides = [1, 1]} : vector<4x640xbf16> to vector<4x512xbf16>
    %10 = vector.extract_strided_slice %4 {offsets = [0, 5], sizes = [4, 512], strides = [1, 1]} : vector<4x640xbf16> to vector<4x512xbf16>
    %11 = vector.extract_strided_slice %4 {offsets = [0, 6], sizes = [4, 512], strides = [1, 1]} : vector<4x640xbf16> to vector<4x512xbf16>
    %12 = tpu.concatenate %5, %6, %7, %8, %9, %10, %11 in 0 : vector<4x512xbf16>, vector<4x512xbf16>, vector<4x512xbf16>, vector<4x512xbf16>, vector<4x512xbf16>, vector<4x512xbf16>, vector<4x512xbf16> -> vector<28x512xbf16>
    %c0_1 = arith.constant 0 : index
    %c0_2 = arith.constant 0 : index
    %13 = vector.load %arg5[%c0_1, %c0_2] : memref<1x1xf32, #tpu.memory_space<vmem>>, vector<1x1xf32>
    %c0_3 = arith.constant 0 : index
    %c0_4 = arith.constant 0 : index
    %c0_5 = arith.constant 0 : index
    %14 = vector.load %arg4[%c0_3, %c0_4, %c0_5] : memref<4x1x28xbf16, #tpu.memory_space<vmem>>, vector<1x1x28xbf16>
    %15 = vector.shape_cast %14 : vector<1x1x28xbf16> to vector<1x28xbf16>
    %cst = arith.constant dense<0.000000e+00> : vector<1x512xf32>
    %16 = tpu.matmul %15, %12, %cst {dimension_numbers = #tpu.dot_dimension_numbers<[1], [0], [0], [1], [0, 0, 1, 1], [], []>} : vector<1x28xbf16>, vector<28x512xbf16>, vector<1x512xf32> -> vector<1x512xf32>
    %17 = vector.broadcast %13 : vector<1x1xf32> to vector<1x512xf32>
    %18 = arith.addf %16, %17 : vector<1x512xf32>
    %19 = math.tanh %18 : vector<1x512xf32>
    %20 = arith.truncf %19 : vector<1x512xf32> to vector<1x512xbf16>
    %c0_6 = arith.constant 0 : index
    %c0_7 = arith.constant 0 : index
    %c0_8 = arith.constant 0 : index
    %c0_9 = arith.constant 0 : index
    %21 = vector.load %arg6[%c0_6, %c0_7, %c0_8, %c0_9] : memref<1x4x1x512xbf16, #tpu.memory_space<vmem>>, vector<1x1x1x512xbf16>
    %22 = vector.shape_cast %21 : vector<1x1x1x512xbf16> to vector<1x512xbf16>
    %23 = vector.shape_cast %20 : vector<1x512xbf16> to vector<1x1x1x512xbf16>
    tpu.vector_store %arg6[%c0_6, %c0_7, %c0_8, %c0_9], %23 {strides = array<i32>} : memref<1x4x1x512xbf16, #tpu.memory_space<vmem>>, vector<1x1x1x512xbf16>,
    %c1 = arith.constant 1 : index
    %c0_10 = arith.constant 0 : index
    %c0_11 = arith.constant 0 : index
    %24 = vector.load %arg4[%c1, %c0_10, %c0_11] : memref<4x1x28xbf16, #tpu.memory_space<vmem>>, vector<1x1x28xbf16>
    %25 = vector.shape_cast %24 : vector<1x1x28xbf16> to vector<1x28xbf16>
    %cst_12 = arith.constant dense<0.000000e+00> : vector<1x512xf32>
    %26 = tpu.matmul %25, %12, %cst_12 {dimension_numbers = #tpu.dot_dimension_numbers<[1], [0], [0], [1], [0, 0, 1, 1], [], []>} : vector<1x28xbf16>, vector<28x512xbf16>, vector<1x512xf32> -> vector<1x512xf32>
    %27 = vector.broadcast %13 : vector<1x1xf32> to vector<1x512xf32>
    %28 = arith.addf %26, %27 : vector<1x512xf32>
    %29 = math.tanh %28 : vector<1x512xf32>
    %30 = arith.truncf %29 : vector<1x512xf32> to vector<1x512xbf16>
    %c0_13 = arith.constant 0 : index
    %c1_14 = arith.constant 1 : index
    %c0_15 = arith.constant 0 : index
    %c0_16 = arith.constant 0 : index
    %31 = vector.load %arg6[%c0_13, %c1_14, %c0_15, %c0_16] : memref<1x4x1x512xbf16, #tpu.memory_space<vmem>>, vector<1x1x1x512xbf16>
    %32 = vector.shape_cast %31 : vector<1x1x1x512xbf16> to vector<1x512xbf16>
    %33 = vector.shape_cast %30 : vector<1x512xbf16> to vector<1x1x1x512xbf16>
    tpu.vector_store %arg6[%c0_13, %c1_14, %c0_15, %c0_16], %33 {strides = array<i32>} : memref<1x4x1x512xbf16, #tpu.memory_space<vmem>>, vector<1x1x1x512xbf16>,
    %c2 = arith.constant 2 : index
    %c0_17 = arith.constant 0 : index
    %c0_18 = arith.constant 0 : index
    %34 = vector.load %arg4[%c2, %c0_17, %c0_18] : memref<4x1x28xbf16, #tpu.memory_space<vmem>>, vector<1x1x28xbf16>
    %35 = vector.shape_cast %34 : vector<1x1x28xbf16> to vector<1x28xbf16>
    %cst_19 = arith.constant dense<0.000000e+00> : vector<1x512xf32>
    %36 = tpu.matmul %35, %12, %cst_19 {dimension_numbers = #tpu.dot_dimension_numbers<[1], [0], [0], [1], [0, 0, 1, 1], [], []>} : vector<1x28xbf16>, vector<28x512xbf16>, vector<1x512xf32> -> vector<1x512xf32>
    %37 = vector.broadcast %13 : vector<1x1xf32> to vector<1x512xf32>
    %38 = arith.addf %36, %37 : vector<1x512xf32>
    %39 = math.tanh %38 : vector<1x512xf32>
    %40 = arith.truncf %39 : vector<1x512xf32> to vector<1x512xbf16>
    %c0_20 = arith.constant 0 : index
    %c2_21 = arith.constant 2 : index
    %c0_22 = arith.constant 0 : index
    %c0_23 = arith.constant 0 : index
    %41 = vector.load %arg6[%c0_20, %c2_21, %c0_22, %c0_23] : memref<1x4x1x512xbf16, #tpu.memory_space<vmem>>, vector<1x1x1x512xbf16>
    %42 = vector.shape_cast %41 : vector<1x1x1x512xbf16> to vector<1x512xbf16>
    %43 = vector.shape_cast %40 : vector<1x512xbf16> to vector<1x1x1x512xbf16>
    tpu.vector_store %arg6[%c0_20, %c2_21, %c0_22, %c0_23], %43 {strides = array<i32>} : memref<1x4x1x512xbf16, #tpu.memory_space<vmem>>, vector<1x1x1x512xbf16>,
    %c3 = arith.constant 3 : index
    %c0_24 = arith.constant 0 : index
    %c0_25 = arith.constant 0 : index
    %44 = vector.load %arg4[%c3, %c0_24, %c0_25] : memref<4x1x28xbf16, #tpu.memory_space<vmem>>, vector<1x1x28xbf16>
    %45 = vector.shape_cast %44 : vector<1x1x28xbf16> to vector<1x28xbf16>
    %cst_26 = arith.constant dense<0.000000e+00> : vector<1x512xf32>
    %46 = tpu.matmul %45, %12, %cst_26 {dimension_numbers = #tpu.dot_dimension_numbers<[1], [0], [0], [1], [0, 0, 1, 1], [], []>} : vector<1x28xbf16>, vector<28x512xbf16>, vector<1x512xf32> -> vector<1x512xf32>
    %47 = vector.broadcast %13 : vector<1x1xf32> to vector<1x512xf32>
    %48 = arith.addf %46, %47 : vector<1x512xf32>
    %49 = math.tanh %48 : vector<1x512xf32>
    %50 = arith.truncf %49 : vector<1x512xf32> to vector<1x512xbf16>
    %c0_27 = arith.constant 0 : index
    %c3_28 = arith.constant 3 : index
    %c0_29 = arith.constant 0 : index
    %c0_30 = arith.constant 0 : index
    %51 = vector.load %arg6[%c0_27, %c3_28, %c0_29, %c0_30] : memref<1x4x1x512xbf16, #tpu.memory_space<vmem>>, vector<1x1x1x512xbf16>
    %52 = vector.shape_cast %51 : vector<1x1x1x512xbf16> to vector<1x512xbf16>
    %53 = vector.shape_cast %50 : vector<1x512xbf16> to vector<1x1x1x512xbf16>
    tpu.vector_store %arg6[%c0_27, %c3_28, %c0_29, %c0_30], %53 {strides = array<i32>} : memref<1x4x1x512xbf16, #tpu.memory_space<vmem>>, vector<1x1x1x512xbf16>,
    return
  }
  func.func @transform_0(%arg0: i32, %arg1: i32, %arg2: i32) -> (i32, i32, i32) {
    %c0_i32 = arith.constant 0 : i32
    %c0_i32_0 = arith.constant 0 : i32
    %c0_i32_1 = arith.constant 0 : i32
    return %arg1, %c0_i32, %c0_i32_0 : i32, i32, i32
  }
  func.func @transform_1(%arg0: i32, %arg1: i32, %arg2: i32) -> (i32, i32, i32) {
    %c0_i32 = arith.constant 0 : i32
    %c0_i32_0 = arith.constant 0 : i32
    %c0_i32_1 = arith.constant 0 : i32
    return %c0_i32, %arg0, %c0_i32_0 : i32, i32, i32
  }
  func.func @transform_2(%arg0: i32, %arg1: i32, %arg2: i32) -> (i32, i32) {
    %c0_i32 = arith.constant 0 : i32
    %c0_i32_0 = arith.constant 0 : i32
    return %arg0, %c0_i32 : i32, i32
  }
  func.func @transform_3(%arg0: i32, %arg1: i32, %arg2: i32) -> (i32, i32, i32, i32) {
    %c0_i32 = arith.constant 0 : i32
    %c0_i32_0 = arith.constant 0 : i32
    return %arg1, %c0_i32, %arg0, %arg2 : i32, i32, i32, i32
  }
}

module attributes {stable_mosaic.version = 11 : i64} {
  func.func @_ppfilter_kernel(%arg0: i32, %arg1: memref<1x1x129x128xbf16, #tpu.memory_space<vmem>>, %arg2: memref<256x128xbf16, #tpu.memory_space<vmem>>, %arg3: memref<1x128xf32, #tpu.memory_space<vmem>>, %arg4: memref<1x1x128x128xf32, #tpu.memory_space<vmem>>) attributes {dimension_semantics = [#tpu.dimension_semantics<parallel>], iteration_bounds = array<i64: 2>, scalar_prefetch = 0 : i64, scratch_operands = 0 : i64, tpu.core_type = #tpu.core_type<tc>, window_params = [{transform_indices = @transform_0, window_bounds = array<i64: 1, 1, 129, 128>}, {pipeline_mode = #tpu.pipeline_mode<synchronous>, transform_indices = @transform_1, window_bounds = array<i64: 256, 128>}, {pipeline_mode = #tpu.pipeline_mode<synchronous>, transform_indices = @transform_2, window_bounds = array<i64: 1, 128>}, {transform_indices = @transform_3, window_bounds = array<i64: 1, 1, 128, 128>}]} {
    %c0 = arith.constant 0 : index
    %c0_0 = arith.constant 0 : index
    %c0_1 = arith.constant 0 : index
    %c0_2 = arith.constant 0 : index
    %0 = vector.load %arg1[%c0, %c0_0, %c0_1, %c0_2] : memref<1x1x129x128xbf16, #tpu.memory_space<vmem>>, vector<1x1x128x128xbf16>
    %1 = vector.shape_cast %0 : vector<1x1x128x128xbf16> to vector<128x128xbf16>
    %c0_3 = arith.constant 0 : index
    %c0_4 = arith.constant 0 : index
    %c1 = arith.constant 1 : index
    %c0_5 = arith.constant 0 : index
    %2 = vector.load %arg1[%c0_3, %c0_4, %c1, %c0_5] : memref<1x1x129x128xbf16, #tpu.memory_space<vmem>>, vector<1x1x128x128xbf16>
    %3 = vector.shape_cast %2 : vector<1x1x128x128xbf16> to vector<128x128xbf16>
    %4 = tpu.concatenate %1, %3 in 1 : vector<128x128xbf16>, vector<128x128xbf16> -> vector<128x256xbf16>
    %c0_6 = arith.constant 0 : index
    %c0_7 = arith.constant 0 : index
    %5 = vector.load %arg2[%c0_6, %c0_7] : memref<256x128xbf16, #tpu.memory_space<vmem>>, vector<256x128xbf16>
    %cst = arith.constant dense<0.000000e+00> : vector<128x128xf32>
    %6 = tpu.matmul %4, %5, %cst {dimension_numbers = #tpu.dot_dimension_numbers<[1], [0], [0], [1], [0, 0, 1, 1], [], []>} : vector<128x256xbf16>, vector<256x128xbf16>, vector<128x128xf32> -> vector<128x128xf32>
    %c0_8 = arith.constant 0 : index
    %c0_9 = arith.constant 0 : index
    %7 = vector.load %arg3[%c0_8, %c0_9] : memref<1x128xf32, #tpu.memory_space<vmem>>, vector<1x128xf32>
    %8 = vector.broadcast %7 : vector<1x128xf32> to vector<128x128xf32>
    %9 = arith.addf %6, %8 : vector<128x128xf32>
    %c0_10 = arith.constant 0 : index
    %c0_11 = arith.constant 0 : index
    %c0_12 = arith.constant 0 : index
    %c0_13 = arith.constant 0 : index
    %10 = vector.load %arg4[%c0_10, %c0_11, %c0_12, %c0_13] : memref<1x1x128x128xf32, #tpu.memory_space<vmem>>, vector<1x1x128x128xf32>
    %11 = vector.shape_cast %10 : vector<1x1x128x128xf32> to vector<128x128xf32>
    %12 = vector.shape_cast %9 : vector<128x128xf32> to vector<1x1x128x128xf32>
    tpu.vector_store %arg4[%c0_10, %c0_11, %c0_12, %c0_13], %12 {strides = array<i32>} : memref<1x1x128x128xf32, #tpu.memory_space<vmem>>, vector<1x1x128x128xf32>,
    return
  }
  func.func @transform_0(%arg0: i32) -> (i32, i32, i32, i32) {
    %c0_i32 = arith.constant 0 : i32
    %c0_i32_0 = arith.constant 0 : i32
    %c0_i32_1 = arith.constant 0 : i32
    %c0_i32_2 = arith.constant 0 : i32
    return %arg0, %c0_i32, %c0_i32_0, %c0_i32_1 : i32, i32, i32, i32
  }
  func.func @transform_1(%arg0: i32) -> (i32, i32) {
    %c0_i32 = arith.constant 0 : i32
    %c0_i32_0 = arith.constant 0 : i32
    %c0_i32_1 = arith.constant 0 : i32
    return %c0_i32, %c0_i32_0 : i32, i32
  }
  func.func @transform_2(%arg0: i32) -> (i32, i32) {
    %c0_i32 = arith.constant 0 : i32
    %c0_i32_0 = arith.constant 0 : i32
    %c0_i32_1 = arith.constant 0 : i32
    return %c0_i32, %c0_i32_0 : i32, i32
  }
  func.func @transform_3(%arg0: i32) -> (i32, i32, i32, i32) {
    %c0_i32 = arith.constant 0 : i32
    %c0_i32_0 = arith.constant 0 : i32
    %c0_i32_1 = arith.constant 0 : i32
    %c0_i32_2 = arith.constant 0 : i32
    return %arg0, %c0_i32, %c0_i32_0, %c0_i32_1 : i32, i32, i32, i32
  }
}

</mosaic_0001>

<bundles_post_ra>
// kernel: wavegan_forward.7
= control target key start
LH: loop header
LB: loop body
LE: loop exit
PB: predicated region body
PF: predicated region fallthrough
CT: control target
= control target key end

     0   :  { %8 = vsyncpa [#allocation3], 0  ;;  %s791_s12 = smov [#allocation2]   ;;  %s1025_s0 = inlined_call_operand.vmem [shape: bf16[2,128], index: 0, kind: input, shape index: {}]   ;;  %s1026_s1 = inlined_call_operand.vmem [shape: bf16[128,1024], index: 1, kind: input, shape index: {}]   ;;  %s1027_s2 = inlined_call_operand.hbm [shape: f32[1,1024], index: 2, kind: input, shape index: {}]   ;;  %s1028_s3 = inlined_call_operand.vmem [shape: bf16[2,1024], index: 3, kind: output, shape index: {}]  }
   0x1   :  { %s19_s13 = sshll.u32 %s791_s12, 4  ;;  %s20_s13 = int_to_ptr.vmem [resolvable:$true] %s19_s13 }
   0x2   :  { %s777_s14 = scalar_lea.vmem %s20_s13, 128  ;;  %p782_p1 = scmp.lt.s32.totalorder %s20_s13, %s20_s13 }
   0x3   :  { %p778_p0 = scmp.ne.s32.totalorder %s20_s13, %s777_s14  ;;  %p783_p2 = scmp.lt.s32.totalorder %s777_s14, %s777_s14 }
   0x5   :  { %p784_p3 = por %p783_p2, %p782_p1 }
   0x7   :  { %p785_p4 = pnand %p784_p3, %p778_p0 }
   0x9   :  { %788 = shalt.err (!%p785_p4)
}
   0xa   :  { %22 = dma.hbm_to_vmem [thread:$0]  %s1027_s2, 128, %s20_s13, [#allocation3]  }
   0xb   :  { %789 = dma.done.wait [#allocation3], 128  }
   0xc   :  { %790 = vsyncadd [#allocation3], 4294967168  ;;  %v792_v0 = vmov 0   ;;  %v84_v1 = vld [vmem:[%s1026_s1 + $0x1c0] sm:$0xff]  ;;  %v85_v3 = vld [vmem:[%s1026_s1 + $0x1c8] sm:$0xff] }
   0xd   :  { %486 = vmatprep.mubr.bf16.mxu0 %v792_v0  ;;  %527 = vmatprep.mubr.bf16.mxu1 %v792_v0  ;;  %v88_v2 = vld [vmem:[%s1026_s1 + $0x1e0] sm:$0xff]  ;;  %v89_v5 = vld [vmem:[%s1026_s1 + $0x1e8] sm:$0xff]  ;;  %v86_v63 = vld [vmem:[%s1026_s1 + $0x1d0] sm:$0xff] }
   0xe   :  { %v755_v4 = vcombine.high %v84_v1, %v88_v2  ;;  %v754_v6 = vcombine.low %v84_v1, %v88_v2  ;;  %v76_v7 = vld [vmem:[%s1026_s1 + $0x180] sm:$0xff]  ;;  %v757_v9 = vcombine.high %v85_v3, %v89_v5  ;;  %v756_v10 = vcombine.low %v85_v3, %v89_v5  ;;  %v77_v12 = vld [vmem:[%s1026_s1 + $0x188] sm:$0xff]  ;;  %v90_v1 = vld [vmem:[%s1026_s1 + $0x1f0] sm:$0xff] }
   0xf   :  { %v80_v8 = vld [vmem:[%s1026_s1 + $0x1a0] sm:$0xff]  ;;  %v81_v13 = vld [vmem:[%s1026_s1 + $0x1a8] sm:$0xff]  ;;  %v87_v2 = vld [vmem:[%s1026_s1 + $0x1d8] sm:$0xff] }
  0x10   :  { %v747_v11 = vcombine.high %v76_v7, %v80_v8  ;;  %v68_v14 = vld [vmem:[%s1026_s1 + $0x140] sm:$0xff]  ;;  %454 = vmatprep.subr.bf16.mxu0 %v755_v4  ;;  %v749_v15 = vcombine.high %v77_v12, %v81_v13  ;;  %v69_v17 = vld [vmem:[%s1026_s1 + $0x148] sm:$0xff]  ;;  %495 = vmatprep.subr.bf16.mxu1 %v757_v9  ;;  %v746_v19 = vcombine.low %v76_v7, %v80_v8  ;;  %v91_v3 = vld [vmem:[%s1026_s1 + $0x1f8] sm:$0xff] }
  0x11   :  { %v72_v16 = vld [vmem:[%s1026_s1 + $0x160] sm:$0xff]  ;;  %v73_v18 = vld [vmem:[%s1026_s1 + $0x168] sm:$0xff]  ;;  %455 = vmatpush1.bf16.msra.mxu0 %v754_v6  ;;  %496 = vmatpush1.bf16.msra.mxu1 %v756_v10  ;;  %v748_v20 = vcombine.low %v77_v12, %v81_v13  ;;  %v759_v6 = vcombine.high %v86_v63, %v90_v1  ;;  %v761_v7 = vcombine.high %v87_v2, %v91_v3  ;;  %v78_v8 = vld [vmem:[%s1026_s1 + $0x190] sm:$0xff] }
  0x12   :  { %456 = vmatprep.subr.bf16.mxu0 %v747_v11  ;;  %v739_v21 = vcombine.high %v68_v14, %v72_v16  ;;  %497 = vmatprep.subr.bf16.mxu1 %v749_v15  ;;  %v741_v22 = vcombine.high %v69_v17, %v73_v18  ;;  %v60_v23 = vld [vmem:[%s1026_s1 + $0x100] sm:$0xff]  ;;  %v61_v25 = vld [vmem:[%s1026_s1 + $0x108] sm:$0xff]  ;;  %v738_v27 = vcombine.low %v68_v14, %v72_v16  ;;  %v82_v9 = vld [vmem:[%s1026_s1 + $0x1b0] sm:$0xff] }
  0x13   :  { %v64_v24 = vld [vmem:[%s1026_s1 + $0x120] sm:$0xff]  ;;  %v65_v26 = vld [vmem:[%s1026_s1 + $0x128] sm:$0xff]  ;;  %v740_v28 = vcombine.low %v69_v17, %v73_v18  ;;  %v79_v10 = vld [vmem:[%s1026_s1 + $0x198] sm:$0xff]  ;;  %v758_v13 = vcombine.low %v86_v63, %v90_v1  ;;  %v760_v14 = vcombine.low %v87_v2, %v91_v3  ;;  %v751_v15 = vcombine.high %v78_v8, %v82_v9 }
  0x14   :  { %v731_v29 = vcombine.high %v60_v23, %v64_v24  ;;  %v733_v30 = vcombine.high %v61_v25, %v65_v26  ;;  %v52_v31 = vld [vmem:[%s1026_s1 + $0xc0] sm:$0xff]  ;;  %v53_v33 = vld [vmem:[%s1026_s1 + $0xc8] sm:$0xff]  ;;  %v730_v35 = vcombine.low %v60_v23, %v64_v24  ;;  %v732_v36 = vcombine.low %v61_v25, %v65_v26  ;;  %v83_v11 = vld [vmem:[%s1026_s1 + $0x1b8] sm:$0xff] }
  0x15   :  { %457 = vmatpush1.bf16.msra.mxu0 %v746_v19  ;;  %498 = vmatpush1.bf16.msra.mxu1 %v748_v20  ;;  %v56_v32 = vld [vmem:[%s1026_s1 + $0xe0] sm:$0xff]  ;;  %v57_v34 = vld [vmem:[%s1026_s1 + $0xe8] sm:$0xff]  ;;  %v753_v16 = vcombine.high %v79_v10, %v83_v11  ;;  %v70_v17 = vld [vmem:[%s1026_s1 + $0x150] sm:$0xff] }
  0x16   :  { %458 = vmatprep.subr.bf16.mxu0 %v739_v21  ;;  %499 = vmatprep.subr.bf16.mxu1 %v741_v22  ;;  %v723_v37 = vcombine.high %v52_v31, %v56_v32  ;;  %v725_v38 = vcombine.high %v53_v33, %v57_v34  ;;  %v44_v39 = vld [vmem:[%s1026_s1 + $0x80] sm:$0xff]  ;;  %v45_v41 = vld [vmem:[%s1026_s1 + $0x88] sm:$0xff]  ;;  %v722_v43 = vcombine.low %v52_v31, %v56_v32  ;;  %v74_v18 = vld [vmem:[%s1026_s1 + $0x170] sm:$0xff] }
  0x17   :  { %v48_v40 = vld [vmem:[%s1026_s1 + $0xa0] sm:$0xff]  ;;  %v49_v42 = vld [vmem:[%s1026_s1 + $0xa8] sm:$0xff]  ;;  %v724_v44 = vcombine.low %v53_v33, %v57_v34  ;;  %v71_v19 = vld [vmem:[%s1026_s1 + $0x158] sm:$0xff]  ;;  %v750_v21 = vcombine.low %v78_v8, %v82_v9  ;;  %v752_v22 = vcombine.low %v79_v10, %v83_v11  ;;  %v743_v23 = vcombine.high %v70_v17, %v74_v18 }
  0x18   :  { %v715_v45 = vcombine.high %v44_v39, %v48_v40  ;;  %v717_v46 = vcombine.high %v45_v41, %v49_v42  ;;  %v36_v47 = vld [vmem:[%s1026_s1 + $0x40] sm:$0xff]  ;;  %v37_v49 = vld [vmem:[%s1026_s1 + $0x48] sm:$0xff]  ;;  %v714_v51 = vcombine.low %v44_v39, %v48_v40  ;;  %v716_v52 = vcombine.low %v45_v41, %v49_v42  ;;  %v75_v20 = vld [vmem:[%s1026_s1 + $0x178] sm:$0xff] }
  0x19   :  { %459 = vmatpush1.bf16.msra.mxu0 %v738_v27  ;;  %500 = vmatpush1.bf16.msra.mxu1 %v740_v28  ;;  %v40_v48 = vld [vmem:[%s1026_s1 + $0x60] sm:$0xff]  ;;  %v41_v50 = vld [vmem:[%s1026_s1 + $0x68] sm:$0xff]  ;;  %v745_v24 = vcombine.high %v71_v19, %v75_v20  ;;  %v62_v25 = vld [vmem:[%s1026_s1 + $0x110] sm:$0xff]  ;;  %v94_v11 = vlaneseq }
  0x1a   :  { %460 = vmatprep.subr.bf16.mxu0 %v731_v29  ;;  %501 = vmatprep.subr.bf16.mxu1 %v733_v30  ;;  %v707_v53 = vcombine.high %v36_v47, %v40_v48  ;;  %v709_v54 = vcombine.high %v37_v49, %v41_v50  ;;  %v28_v55 = vld [vmem:[%s1026_s1] sm:$0xff]  ;;  %v29_v57 = vld [vmem:[%s1026_s1 + $0x8] sm:$0xff]  ;;  %v706_v59 = vcombine.low %v36_v47, %v40_v48  ;;  %v66_v26 = vld [vmem:[%s1026_s1 + $0x130] sm:$0xff] }
  0x1b   :  { %v32_v56 = vld [vmem:[%s1026_s1 + $0x20] sm:$0xff]  ;;  %v33_v58 = vld [vmem:[%s1026_s1 + $0x28] sm:$0xff]  ;;  %v708_v60 = vcombine.low %v37_v49, %v41_v50  ;;  %v63_v27 = vld [vmem:[%s1026_s1 + $0x118] sm:$0xff]  ;;  %v742_v29 = vcombine.low %v70_v17, %v74_v18  ;;  %v744_v30 = vcombine.low %v71_v19, %v75_v20  ;;  %v735_v31 = vcombine.high %v62_v25, %v66_v26 }
  0x1c   :  { %v699_v61 = vcombine.high %v28_v55, %v32_v56  ;;  %v701_v62 = vcombine.high %v29_v57, %v33_v58  ;;  %v698_v4 = vcombine.low %v28_v55, %v32_v56  ;;  %v700_v5 = vcombine.low %v29_v57, %v33_v58  ;;  %v942_v12 = vld [vmem:[%s1025_s0] sm:$0x1]  ;;  %v67_v28 = vld [vmem:[%s1026_s1 + $0x138] sm:$0xff]  ;;  %v54_v33 = vld [vmem:[%s1026_s1 + $0xd0] sm:$0xff] }
  0x1d   :  { %461 = vmatpush1.bf16.msra.mxu0 %v730_v35  ;;  %502 = vmatpush1.bf16.msra.mxu1 %v732_v36  ;;  %v737_v32 = vcombine.high %v63_v27, %v67_v28  ;;  %v58_v34 = vld [vmem:[%s1026_s1 + $0xf0] sm:$0xff]  ;;  %v59_v35 = vld [vmem:[%s1026_s1 + $0xf8] sm:$0xff]  ;;  %v734_v36 = vcombine.low %v62_v25, %v66_v26 }
  0x1e   :  { %462 = vmatprep.subr.bf16.mxu0 %v723_v37  ;;  %503 = vmatprep.subr.bf16.mxu1 %v725_v38  ;;  %v736_v37 = vcombine.low %v63_v27, %v67_v28  ;;  %v727_v38 = vcombine.high %v54_v33, %v58_v34  ;;  %v46_v40 = vld [vmem:[%s1026_s1 + $0x90] sm:$0xff]  ;;  %v47_v42 = vld [vmem:[%s1026_s1 + $0x98] sm:$0xff] }
  0x1f   :  { %v50_v41 = vld [vmem:[%s1026_s1 + $0xb0] sm:$0xff]  ;;  %v39_v50 = vld [vmem:[%s1026_s1 + $0x58] sm:$0xff] }
  0x20   :  { %v38_v48 = vld [vmem:[%s1026_s1 + $0x50] sm:$0xff]  ;;  %v31_v58 = vld [vmem:[%s1026_s1 + $0x18] sm:$0xff] }
  0x21   :  { %463 = vmatpush1.bf16.msra.mxu0 %v722_v43  ;;  %504 = vmatpush1.bf16.msra.mxu1 %v724_v44  ;;  %v51_v43 = vld [vmem:[%s1026_s1 + $0xb8] sm:$0xff]  ;;  %v726_v44 = vcombine.low %v54_v33, %v58_v34  ;;  %v42_v49 = vld [vmem:[%s1026_s1 + $0x70] sm:$0xff] }
  0x22   :  { %464 = vmatprep.subr.bf16.mxu0 %v715_v45  ;;  %505 = vmatprep.subr.bf16.mxu1 %v717_v46  ;;  %v719_v46 = vcombine.high %v46_v40, %v50_v41  ;;  %v721_v47 = vcombine.high %v47_v42, %v51_v43  ;;  %v30_v56 = vld [vmem:[%s1026_s1 + $0x10] sm:$0xff] }
  0x23   :  { %v34_v57 = vld [vmem:[%s1026_s1 + $0x30] sm:$0xff] }
  0x24   :  { %v702_v1 = vcombine.low %v30_v56, %v34_v57 }
  0x25   :  { %465 = vmatpush1.bf16.msra.mxu0 %v714_v51  ;;  %506 = vmatpush1.bf16.msra.mxu1 %v716_v52  ;;  %v43_v51 = vld [vmem:[%s1026_s1 + $0x78] sm:$0xff]  ;;  %v718_v52 = vcombine.low %v46_v40, %v50_v41 }
  0x26   :  { %466 = vmatprep.subr.bf16.mxu0 %v707_v53  ;;  %507 = vmatprep.subr.bf16.mxu1 %v709_v54  ;;  %v720_v53 = vcombine.low %v47_v42, %v51_v43  ;;  %v711_v54 = vcombine.high %v38_v48, %v42_v49  ;;  %v713_v55 = vcombine.high %v39_v50, %v43_v51 }
  0x29   :  { %467 = vmatpush1.bf16.msra.mxu0 %v706_v59  ;;  %508 = vmatpush1.bf16.msra.mxu1 %v708_v60  ;;  %v35_v59 = vld [vmem:[%s1026_s1 + $0x38] sm:$0xff]  ;;  %v710_v60 = vcombine.low %v38_v48, %v42_v49 }
  0x2a   :  { %468 = vmatprep.subr.bf16.mxu0 %v699_v61  ;;  %509 = vmatprep.subr.bf16.mxu1 %v701_v62  ;;  %v712_v61 = vcombine.low %v39_v50, %v43_v51  ;;  %v703_v62 = vcombine.high %v30_v56, %v34_v57  ;;  %v705_v63 = vcombine.high %v31_v58, %v35_v59 }
  0x2b   :  { %v704_v2 = vcombine.low %v31_v58, %v35_v59 }
  0x2d   :  { %469 = vmatpush1.bf16.msra.mxu0 %v698_v4  ;;  %510 = vmatpush1.bf16.msra.mxu1 %v700_v5 }
  0x2e   :  { %536 = vmatprep.subr.bf16.mxu0 %v759_v6  ;;  %577 = vmatprep.subr.bf16.mxu1 %v761_v7 }
  0x30   :  { %487 = vmatmul.mubr.bf16.vlgmr.msra.gmra.mxu0 %v942_v12  ;;  %528 = vmatmul.mubr.bf16.vlgmr.msra.gmra.mxu1 %v942_v12 }
  0x31   :  { %537 = vmatpush1.bf16.msra.mxu0 %v758_v13  ;;  %578 = vmatpush1.bf16.msra.mxu1 %v760_v14  ;;  %v95_v13 = vshrl.u32 %v94_v11, 7 }
  0x32   :  { %538 = vmatprep.subr.bf16.mxu0 %v751_v15  ;;  %579 = vmatprep.subr.bf16.mxu1 %v753_v16  ;;  %v92_v15 = vld [vmem:[#allocation2] sm:$0xff] }
  0x33   :  { %568 = vmatprep.mubr.bf16.mxu0 %v792_v0  ;;  %609 = vmatprep.mubr.bf16.mxu1 %v792_v0  ;;  %v55_v0 = vld [vmem:[%s1026_s1 + $0xd8] sm:$0xff]  ;;  %v96_v14 = vsub.s32 0, %v95_v13  ;;  %v104_v16 = vsub.s32 2, %v95_v13  ;;  %v100_v17 = vsub.s32 1, %v95_v13  ;;  %v108_v18 = vsub.s32 3, %v95_v13 }
  0x34   :  { %v729_v39 = vcombine.high %v55_v0, %v59_v35  ;;  %v728_v45 = vcombine.low %v55_v0, %v59_v35  ;;  %v120_v25 = vsub.s32 6, %v95_v13 }
  0x35   :  { %539 = vmatpush1.bf16.msra.mxu0 %v750_v21  ;;  %580 = vmatpush1.bf16.msra.mxu1 %v752_v22  ;;  %v97_v19 = vrot.slane %v92_v15, %v96_v14  ;;  %v105_v20 = vrot.slane %v92_v15, %v104_v16  ;;  %v101_v21 = vrot.slane %v92_v15, %v100_v17 }
  0x36   :  { %540 = vmatprep.subr.bf16.mxu0 %v743_v23  ;;  %581 = vmatprep.subr.bf16.mxu1 %v745_v24  ;;  %v109_v22 = vrot.slane %v92_v15, %v108_v18  ;;  %v112_v24 = vsub.s32 4, %v95_v13  ;;  %v121_v34 = vrot.slane %v92_v15, %v120_v25 }
  0x38   :  { %v113_v33 = vrot.slane %v92_v15, %v112_v24 }
  0x39   :  { %541 = vmatpush1.bf16.msra.mxu0 %v742_v29  ;;  %582 = vmatpush1.bf16.msra.mxu1 %v744_v30  ;;  %v116_v30 = vsub.s32 5, %v95_v13 }
  0x3a   :  { %542 = vmatprep.subr.bf16.mxu0 %v735_v31  ;;  %583 = vmatprep.subr.bf16.mxu1 %v737_v32  ;;  %v124_v31 = vsub.s32 7, %v95_v13 }
  0x3c   :  { %v125_v40 = vrot.slane %v92_v15, %v124_v31 }
  0x3d   :  { %543 = vmatpush1.bf16.msra.mxu0 %v734_v36  ;;  %584 = vmatpush1.bf16.msra.mxu1 %v736_v37 }
  0x3e   :  { %544 = vmatprep.subr.bf16.mxu0 %v727_v38  ;;  %585 = vmatprep.subr.bf16.mxu1 %v729_v39  ;;  %v117_v38 = vrot.slane %v92_v15, %v116_v30 }
  0x41   :  { %545 = vmatpush1.bf16.msra.mxu0 %v726_v44  ;;  %586 = vmatpush1.bf16.msra.mxu1 %v728_v45 }
  0x42   :  { %546 = vmatprep.subr.bf16.mxu0 %v719_v46  ;;  %587 = vmatprep.subr.bf16.mxu1 %v721_v47 }
  0x45   :  { %547 = vmatpush1.bf16.msra.mxu0 %v718_v52  ;;  %588 = vmatpush1.bf16.msra.mxu1 %v720_v53 }
  0x46   :  { %548 = vmatprep.subr.bf16.mxu0 %v711_v54  ;;  %589 = vmatprep.subr.bf16.mxu1 %v713_v55 }
  0x49   :  { %549 = vmatpush1.bf16.msra.mxu0 %v710_v60  ;;  %590 = vmatpush1.bf16.msra.mxu1 %v712_v61 }
  0x4a   :  { %550 = vmatprep.subr.bf16.mxu0 %v703_v62  ;;  %591 = vmatprep.subr.bf16.mxu1 %v705_v63 }
  0x4d   :  { %551 = vmatpush1.bf16.msra.mxu0 %v702_v1  ;;  %592 = vmatpush1.bf16.msra.mxu1 %v704_v2 }
  0x50   :  { %569 = vmatmul.mubr.bf16.vlgmr.msra.gmra.mxu0 %v942_v12  ;;  %610 = vmatmul.mubr.bf16.vlgmr.msra.gmra.mxu1 %v942_v12  ;;  %v793_v12 = vmov 1966171168  }
  0x51   :  { %v647_v23 = vunpack.c.l.s4 %v793_v12 }
  0x53   :  { %v648_v32 = vunpack.c.0.s8 %v647_v23 }
  0x55   :  { %v651_v44 = vsub.s32 %v648_v32, %v95_v13 }
  0xf0   :  { %v488_v3 = vpop.f32.mrf.mxu0  ;;  %v529_v4 = vpop.f32.mrf.mxu1 }
  0xf1   :  { %v489_v26 = vadd.f32 %v488_v3, %v97_v19  ;;  %v530_v27 = vadd.f32 %v529_v4, %v105_v20 }
  0xf2   :  { %v490_v5 = vpop.f32.mrf.mxu0  ;;  %v531_v6 = vpop.f32.mrf.mxu1 }
  0xf3   :  { %v491_v28 = vadd.f32 %v490_v5, %v101_v21  ;;  %v532_v29 = vadd.f32 %v531_v6, %v109_v22  ;;  %v618_v0 = vmax.f32 %v489_v26, 0.0  ;;  %v620_v35 = vmax.f32 %v530_v27, 0.0 }
  0xf4   :  { %v492_v7 = vpop.f32.mrf.mxu0  ;;  %v533_v8 = vpop.f32.mrf.mxu1 }
  0xf5   :  { %v619_v36 = vmax.f32 %v491_v28, 0.0  ;;  %v621_v37 = vmax.f32 %v532_v29, 0.0 }
  0xf6   :  { %v493_v9 = vpop.f32.mrf.mxu0  ;;  %v534_v10 = vpop.f32.mrf.mxu1 }
  0xf7   :  { %v762_v43 = vpack.c.bf16 %v619_v36, %v618_v0  ;;  %v763_v45 = vpack.c.bf16 %v621_v37, %v620_v35 }
  0xf9   :  { %v652_v55 = vrot.slane %v762_v43, %v651_v44  ;;  %v659_v56 = vrot.slane %v763_v45, %v651_v44 }
  0xfb   :  { %v674_v1 = vcombine.low %v652_v55, %v659_v56 }
  0xfd   :  { %v682_v4 = vrot.slane %v674_v1, %v651_v44 }
 0x110   :  { %v570_v39 = vpop.f32.mrf.mxu0  ;;  %v611_v42 = vpop.f32.mrf.mxu1 }
 0x111   :  { %v571_v41 = vadd.f32 %v570_v39, %v113_v33  ;;  %v612_v46 = vadd.f32 %v611_v42, %v121_v34 }
 0x112   :  { %v572_v47 = vpop.f32.mrf.mxu0  ;;  %v613_v49 = vpop.f32.mrf.mxu1 }
 0x113   :  { %v573_v48 = vadd.f32 %v572_v47, %v117_v38  ;;  %v614_v50 = vadd.f32 %v613_v49, %v125_v40  ;;  %v622_v52 = vmax.f32 %v571_v41, 0.0  ;;  %v624_v57 = vmax.f32 %v612_v46, 0.0 }
 0x114   :  { %v574_v51 = vpop.f32.mrf.mxu0  ;;  %v615_v54 = vpop.f32.mrf.mxu1 }
 0x115   :  { %v623_v53 = vmax.f32 %v573_v48, 0.0  ;;  %v625_v58 = vmax.f32 %v614_v50, 0.0 }
 0x116   :  { %v575_v59 = vpop.f32.mrf.mxu0  ;;  %v616_v61 = vpop.f32.mrf.mxu1 }
 0x117   :  { %v764_v60 = vpack.c.bf16 %v623_v53, %v622_v52  ;;  %v765_v62 = vpack.c.bf16 %v625_v58, %v624_v57 }
 0x119   :  { %v666_v63 = vrot.slane %v764_v60, %v651_v44  ;;  %v673_v2 = vrot.slane %v765_v62, %v651_v44 }
 0x11b   :  { %v675_v3 = vcombine.low %v666_v63, %v673_v2 }
 0x11d   :  { %v689_v5 = vrot.slane %v675_v3, %v651_v44 }
 0x11f   :  { %v690_v6 = vcombine.low %v682_v4, %v689_v5 }
 0x121   :  { %692 = vst [vmem:[%s1028_s3] sm:$0xff] %v690_v6 }
 0x122   :  { %697 = vsyncpa [#allocation3], 1 }

// kernel: wavegan_forward.8
= control target key start
LH: loop header
LB: loop body
LE: loop exit
PB: predicated region body
PF: predicated region fallthrough
CT: control target
= control target key end

     0   :  { %s1456_s16 = smov 123   ;;  %s1457_s21 = smov 124   ;;  %v1462_v8 = vmov 0   ;;  %vm407_vm0 = vcmask 523264   ;;  %vm224_vm1 = vcmask 130048   ;;  %vm532_vm2 = vcmask 125952   ;;  %s2193_s0 = inlined_call_operand.vmem [shape: bf16[2,64,22], index: 0, kind: input, shape index: {}]   ;;  %s2194_s1 = inlined_call_operand.vmem [shape: bf16[4,32,448], index: 1, kind: input, shape index: {}]   ;;  %s2195_s2 = inlined_call_operand.vmem [shape: f32[32,1], index: 2, kind: input, shape index: {}]   ;;  %s2196_s3 = inlined_call_operand.vmem [shape: bf16[2,4,32,16], index: 3, kind: output, shape index: {}]  }
   0x1   :  { %v1488_v0 = vld [vmem:[%s2193_s0 + $0x38] sm:$0xff]   ;;  %v1493_v1 = vld [vmem:[%s2193_s0 + $0x30] sm:$0xff]   ;;  %v1500_v2 = vld [vmem:[%s2193_s0 + $0x28] sm:$0xff]   ;;  %s1458_s22 = smov 125   ;;  %s1459_s23 = smov 127   ;;  %463 = vmatprep.subr.bf16.mxu1 %v1462_v8  ;;  %1398 = vset.pattern.permute.xlu0 %v1462_v8 }
   0x2   :  { %158 = vrot.lane.b32.xlu0 %v1488_v0, %s1456_s16  ;;  %154 = vrot.lane.b32.xlu1 %v1500_v2, %s1456_s16  ;;  %v1507_v3 = vld [vmem:[%s2193_s0 + $0x20] sm:$0xff]   ;;  %s1460_s24 = smov 122   ;;  %s1461_s25 = smov 126   ;;  %v1552_v4 = vld [vmem:[%s2193_s0 + $0x18] sm:$0xff]  }
   0x3   :  { %v1559_v5 = vld [vmem:[%s2193_s0 + $0x10] sm:$0xff]   ;;  %v1568_v6 = vld [vmem:[%s2193_s0 + $0x8] sm:$0xff]   ;;  %v1577_v7 = vld [vmem:[%s2193_s0] sm:$0xff]   ;;  %1399 = vset.pattern.permute.xlu1 %v1462_v8  ;;  %s1463_s0 = smov 16  }
   0x4   :  { %v1410_v33 = vld [vmem:[%s2194_s1 + $0xc] ss:$16 sps:$4 sm:$0xff]   ;;  %v1413_v39 = vld [vmem:[%s2194_s1 + $0x4] ss:$16 sps:$4 sm:$0xff]  }
   0x5   :  { %1161 = vmatprep.mubr.msk.bf16.mxu1 %vm407_vm0, %v1410_v33  ;;  %446 = vmatprep.mubr.bf16.mxu0 %v1413_v39 }
   0x6   :  { %156 = vrot.lane.b32.xlu0 %v1493_v1, %s1456_s16  ;;  %152 = vrot.lane.b32.xlu1 %v1507_v3, %s1456_s16 }
   0xa   :  { %150 = vrot.lane.b32.xlu0 %v1488_v0, %s1457_s21  ;;  %148 = vrot.lane.b32.xlu1 %v1493_v1, %s1457_s21 }
   0xe   :  { %146 = vrot.lane.b32.xlu0 %v1500_v2, %s1457_s21  ;;  %144 = vrot.lane.b32.xlu1 %v1507_v3, %s1457_s21 }
  0x12   :  { %142 = vrot.lane.b32.xlu0 %v1488_v0, %s1458_s22  ;;  %126 = vrot.lane.b32.xlu1 %v1488_v0, %s1459_s23 }
  0x16   :  { %166 = vrot.lane.b32.xlu0 %v1488_v0, %s1460_s24  ;;  %140 = vrot.lane.b32.xlu1 %v1493_v1, %s1458_s22 }
  0x1a   :  { %124 = vrot.lane.b32.xlu0 %v1493_v1, %s1459_s23  ;;  %164 = vrot.lane.b32.xlu1 %v1493_v1, %s1460_s24 }
  0x1e   :  { %138 = vrot.lane.b32.xlu0 %v1500_v2, %s1458_s22  ;;  %122 = vrot.lane.b32.xlu1 %v1500_v2, %s1459_s23 }
  0x22   :  { %162 = vrot.lane.b32.xlu0 %v1500_v2, %s1460_s24  ;;  %136 = vrot.lane.b32.xlu1 %v1507_v3, %s1458_s22 }
  0x26   :  { %120 = vrot.lane.b32.xlu0 %v1507_v3, %s1459_s23  ;;  %160 = vrot.lane.b32.xlu1 %v1507_v3, %s1460_s24 }
  0x2a   :  { %134 = vrot.lane.b32.xlu0 %v1488_v0, %s1461_s25  ;;  %132 = vrot.lane.b32.xlu1 %v1493_v1, %s1461_s25 }
  0x2e   :  { %130 = vrot.lane.b32.xlu0 %v1500_v2, %s1461_s25  ;;  %81 = vrot.lane.b32.xlu1 %v1552_v4, %s1456_s16 }
  0x32   :  { %79 = vrot.lane.b32.xlu0 %v1559_v5, %s1456_s16  ;;  %128 = vrot.lane.b32.xlu1 %v1507_v3, %s1461_s25 }
  0x36   :  { %77 = vrot.lane.b32.xlu0 %v1568_v6, %s1456_s16  ;;  %89 = vrot.lane.b32.xlu1 %v1552_v4, %s1460_s24 }
  0x3a   :  { %75 = vrot.lane.b32.xlu0 %v1577_v7, %s1456_s16  ;;  %87 = vrot.lane.b32.xlu1 %v1559_v5, %s1460_s24 }
  0x3e   :  { %73 = vrot.lane.b32.xlu0 %v1552_v4, %s1457_s21  ;;  %85 = vrot.lane.b32.xlu1 %v1568_v6, %s1460_s24 }
  0x42   :  { %71 = vrot.lane.b32.xlu0 %v1559_v5, %s1457_s21 }
  0x46   :  { %69 = vrot.lane.b32.xlu0 %v1568_v6, %s1457_s21 }
  0x4a   :  { %67 = vrot.lane.b32.xlu0 %v1577_v7, %s1457_s21 }
  0x4e   :  { %65 = vrot.lane.b32.xlu0 %v1552_v4, %s1458_s22 }
  0x52   :  { %49 = vrot.lane.b32.xlu0 %v1552_v4, %s1459_s23 }
  0x56   :  { %63 = vrot.lane.b32.xlu0 %v1559_v5, %s1458_s22 }
  0x74   :  { %v159_v9 = vpop.permute.xlu0 %158  ;;  %v155_v10 = vpop.permute.xlu1 %154 }
  0x75   :  { %214 = vrot.lane.b32.xlu0 %v159_v9, %s1463_s0 }
  0x78   :  { %v157_v11 = vpop.permute.xlu0 %156  ;;  %v153_v12 = vpop.permute.xlu1 %152 }
  0x79   :  { %212 = vrot.lane.b32.xlu1 %v157_v11, %s1463_s0  ;;  %47 = vrot.lane.b32.xlu0 %v1559_v5, %s1459_s23 }
  0x7c   :  { %v151_v13 = vpop.permute.xlu0 %150  ;;  %v149_v14 = vpop.permute.xlu1 %148 }
  0x7d   :  { %210 = vrot.lane.b32.xlu1 %v155_v10, %s1463_s0  ;;  %61 = vrot.lane.b32.xlu0 %v1568_v6, %s1458_s22 }
  0x80   :  { %v147_v15 = vpop.permute.xlu0 %146  ;;  %v145_v16 = vpop.permute.xlu1 %144 }
  0x81   :  { %208 = vrot.lane.b32.xlu1 %v153_v12, %s1463_s0  ;;  %45 = vrot.lane.b32.xlu0 %v1568_v6, %s1459_s23 }
  0x84   :  { %v143_v17 = vpop.permute.xlu0 %142  ;;  %v127_v18 = vpop.permute.xlu1 %126 }
  0x85   :  { %206 = vrot.lane.b32.xlu1 %v151_v13, %s1463_s0  ;;  %59 = vrot.lane.b32.xlu0 %v1577_v7, %s1458_s22 }
  0x88   :  { %v167_v19 = vpop.permute.xlu0 %166  ;;  %v141_v20 = vpop.permute.xlu1 %140 }
  0x89   :  { %204 = vrot.lane.b32.xlu1 %v149_v14, %s1463_s0  ;;  %182 = vrot.lane.b32.xlu0 %v127_v18, %s1463_s0 }
  0x8c   :  { %v125_v21 = vpop.permute.xlu0 %124  ;;  %v165_v22 = vpop.permute.xlu1 %164 }
  0x8d   :  { %202 = vrot.lane.b32.xlu1 %v147_v15, %s1463_s0  ;;  %180 = vrot.lane.b32.xlu0 %v125_v21, %s1463_s0 }
  0x90   :  { %v139_v23 = vpop.permute.xlu0 %138  ;;  %v123_v24 = vpop.permute.xlu1 %122 }
  0x91   :  { %200 = vrot.lane.b32.xlu1 %v145_v16, %s1463_s0  ;;  %178 = vrot.lane.b32.xlu0 %v123_v24, %s1463_s0 }
  0x94   :  { %v163_v25 = vpop.permute.xlu0 %162  ;;  %v137_v27 = vpop.permute.xlu1 %136 }
  0x95   :  { %198 = vrot.lane.b32.xlu1 %v143_v17, %s1463_s0  ;;  %43 = vrot.lane.b32.xlu0 %v1577_v7, %s1459_s23  ;;  %v337_v17 = vld [vmem:[%s2195_s2] sm:$0xff] }
  0x98   :  { %v121_v26 = vpop.permute.xlu0 %120  ;;  %v161_v29 = vpop.permute.xlu1 %160 }
  0x99   :  { %222 = vrot.lane.b32.xlu1 %v167_v19, %s1463_s0  ;;  %176 = vrot.lane.b32.xlu0 %v121_v26, %s1463_s0  ;;  %v338_v19 = vld [vmem:[%s2195_s2 + $0x8] sm:$0xff] }
  0x9c   :  { %v135_v28 = vpop.permute.xlu0 %134  ;;  %v133_v30 = vpop.permute.xlu1 %132 }
  0x9d   :  { %196 = vrot.lane.b32.xlu1 %v141_v20, %s1463_s0  ;;  %57 = vrot.lane.b32.xlu0 %v1552_v4, %s1461_s25 }
  0xa0   :  { %v131_v31 = vpop.permute.xlu0 %130  ;;  %v82_v32 = vpop.permute.xlu1 %81 }
  0xa1   :  { %220 = vrot.lane.b32.xlu1 %v165_v22, %s1463_s0  ;;  %174 = vrot.lane.b32.xlu0 %v1488_v0, %s1463_s0 }
  0xa4   :  { %v80_v34 = vpop.permute.xlu0 %79  ;;  %v129_v35 = vpop.permute.xlu1 %128 }
  0xa5   :  { %194 = vrot.lane.b32.xlu1 %v139_v23, %s1463_s0  ;;  %188 = vrot.lane.b32.xlu0 %v133_v30, %s1463_s0 }
  0xa8   :  { %v78_v36 = vpop.permute.xlu0 %77  ;;  %v90_v44 = vpop.permute.xlu1 %89 }
  0xa9   :  { %218 = vrot.lane.b32.xlu1 %v163_v25, %s1463_s0  ;;  %53 = vrot.lane.b32.xlu0 %v1568_v6, %s1461_s25 }
  0xac   :  { %v76_v37 = vpop.permute.xlu0 %75  ;;  %v1663_v46 = vpop.permute.xlu1 %87 }
  0xad   :  { %192 = vrot.lane.b32.xlu1 %v137_v27, %s1463_s0  ;;  %170 = vrot.lane.b32.xlu0 %v1500_v2, %s1463_s0 }
  0xb0   :  { %v74_v38 = vpop.permute.xlu0 %73  ;;  %v1665_v48 = vpop.permute.xlu1 %85 }
  0xb1   :  { %83 = vrot.lane.b32.xlu1 %v1577_v7, %s1460_s24  ;;  %184 = vrot.lane.b32.xlu0 %v129_v35, %s1463_s0 }
  0xb4   :  { %v72_v40 = vpop.permute.xlu0 %71 }
  0xb5   :  { %216 = vrot.lane.b32.xlu1 %v161_v29, %s1463_s0  ;;  %351 = vperm.xlu0 %1398, %v337_v17   ;;  %v1423_v17 = vld [vmem:[%s2194_s1 + $0x40] ss:$16 sps:$4 sm:$0xff]  }
  0xb8   :  { %v70_v41 = vpop.permute.xlu0 %69 }
  0xb9   :  { %190 = vrot.lane.b32.xlu1 %v135_v28, %s1463_s0 }
  0xbc   :  { %v68_v42 = vpop.permute.xlu0 %67 }
  0xbd   :  { %55 = vrot.lane.b32.xlu1 %v1559_v5, %s1461_s25 }
  0xc0   :  { %v66_v43 = vpop.permute.xlu0 %65 }
  0xc1   :  { %172 = vrot.lane.b32.xlu1 %v1493_v1, %s1463_s0 }
  0xc4   :  { %v50_v45 = vpop.permute.xlu0 %49 }
  0xc5   :  { %186 = vrot.lane.b32.xlu1 %v131_v31, %s1463_s0 }
  0xc8   :  { %v64_v47 = vpop.permute.xlu0 %63 }
  0xc9   :  { %51 = vrot.lane.b32.xlu1 %v1577_v7, %s1461_s25 }
  0xcd   :  { %168 = vrot.lane.b32.xlu1 %v1507_v3, %s1463_s0 }
  0xd1   :  { %356 = vperm.xlu1 %1399, %v338_v19   ;;  %v1428_v19 = vld [vmem:[%s2194_s1 + $0x68] ss:$16 sps:$4 sm:$0xff]  }
  0xe7   :  { %v215_v49 = vpop.permute.xlu0 %214 }
  0xe8   :  { %v1668_v50 = vsel %vm224_vm1, %v82_v32, %v215_v49 }
  0xe9   :  { %464 = vmatpush1.bf16.msra.mxu1 %v1668_v50 }
  0xea   :  { %465 = vmatprep.subr.bf16.mxu1 %v1462_v8 }
  0xeb   :  { %v213_v51 = vpop.permute.xlu1 %212  ;;  %v48_v52 = vpop.permute.xlu0 %47 }
  0xec   :  { %v1673_v53 = vsel %vm224_vm1, %v80_v34, %v213_v51  ;;  %v1416_v51 = vld [vmem:[%s2194_s1 + $0x28] ss:$16 sps:$4 sm:$0xff]  }
  0xed   :  { %466 = vmatpush1.bf16.msra.mxu1 %v1673_v53 }
  0xee   :  { %467 = vmatprep.subr.bf16.mxu1 %v1462_v8 }
  0xef   :  { %v211_v54 = vpop.permute.xlu1 %210  ;;  %v62_v56 = vpop.permute.xlu0 %61 }
  0xf0   :  { %v1678_v55 = vsel %vm224_vm1, %v78_v36, %v211_v54 }
  0xf1   :  { %468 = vmatpush1.bf16.msra.mxu1 %v1678_v55 }
  0xf2   :  { %469 = vmatprep.subr.bf16.mxu1 %v1462_v8 }
  0xf3   :  { %v209_v57 = vpop.permute.xlu1 %208  ;;  %v46_v59 = vpop.permute.xlu0 %45 }
  0xf4   :  { %v1683_v58 = vsel %vm224_vm1, %v76_v37, %v209_v57  ;;  %v339_v37 = vld [vmem:[%s2195_s2 + $0x10] sm:$0xff] }
  0xf5   :  { %470 = vmatpush1.bf16.msra.mxu1 %v1683_v58  ;;  %361 = vperm.xlu1 %1399, %v339_v37  }
  0xf6   :  { %471 = vmatprep.subr.bf16.mxu1 %v1462_v8 }
  0xf7   :  { %v207_v60 = vpop.permute.xlu1 %206  ;;  %v60_v0 = vpop.permute.xlu0 %59 }
  0xf8   :  { %v1688_v61 = vsel %vm224_vm1, %v74_v38, %v207_v60  ;;  %v340_v38 = vld [vmem:[%s2195_s2 + $0x18] sm:$0xff] }
  0xf9   :  { %472 = vmatpush1.bf16.msra.mxu1 %v1688_v61  ;;  %366 = vperm.xlu0 %1398, %v340_v38  }
  0xfa   :  { %473 = vmatprep.subr.bf16.mxu1 %v1462_v8 }
  0xfb   :  { %v205_v62 = vpop.permute.xlu1 %204  ;;  %v183_v3 = vpop.permute.xlu0 %182 }
  0xfc   :  { %v1693_v63 = vsel %vm224_vm1, %v72_v40, %v205_v62  ;;  %v1711_v14 = vsel %vm224_vm1, %v50_v45, %v183_v3 }
  0xfd   :  { %474 = vmatpush1.bf16.msra.mxu1 %v1693_v63 }
  0xfe   :  { %475 = vmatprep.subr.bf16.mxu1 %v1462_v8 }
  0xff   :  { %v203_v1 = vpop.permute.xlu1 %202  ;;  %v181_v11 = vpop.permute.xlu0 %180 }
 0x100   :  { %v1698_v2 = vsel %vm224_vm1, %v70_v41, %v203_v1  ;;  %v1730_v23 = vsel %vm224_vm1, %v48_v52, %v181_v11  ;;  %v1422_v52 = vld [vmem:[%s2194_s1 + $0x4c] ss:$16 sps:$4 sm:$0xff]   ;;  %v1417_v11 = vld [vmem:[%s2194_s1 + $0x24] ss:$16 sps:$4 sm:$0xff]  }
 0x101   :  { %476 = vmatpush1.bf16.msra.mxu1 %v1698_v2 }
 0x102   :  { %477 = vmatprep.subr.bf16.mxu1 %v1462_v8 }
 0x103   :  { %v201_v9 = vpop.permute.xlu1 %200  ;;  %v179_v16 = vpop.permute.xlu0 %178 }
 0x104   :  { %v1703_v10 = vsel %vm224_vm1, %v68_v42, %v201_v9  ;;  %v1744_v29 = vsel %vm224_vm1, %v46_v59, %v179_v16  ;;  %v1411_v9 = vld [vmem:[%s2194_s1] ss:$16 sps:$4 sm:$0xff]   ;;  %v1426_v16 = vld [vmem:[%s2194_s1 + $0x6c] ss:$16 sps:$4 sm:$0xff]  }
 0x105   :  { %478 = vmatpush1.bf16.msra.mxu1 %v1703_v10 }
 0x106   :  { %487 = vmatprep.subr.bf16.mxu1 %v1462_v8 }
 0x107   :  { %v199_v12 = vpop.permute.xlu1 %198  ;;  %v44_v21 = vpop.permute.xlu0 %43 }
 0x108   :  { %v1708_v13 = vsel %vm224_vm1, %v66_v43, %v199_v12  ;;  %v1408_v43 = vld [vmem:[%s2194_s1 + $0x8] ss:$16 sps:$4 sm:$0xff]   ;;  %v1425_v12 = vld [vmem:[%s2194_s1 + $0x44] ss:$16 sps:$4 sm:$0xff]  }
 0x109   :  { %1277 = vmatprep.subr.bf16.mxu0 %v1708_v13 }
 0x10a   :  { %1278 = vmatpush3.bf16.msra.mxu0 %v1711_v14 }
 0x10b   :  { %v223_v15 = vpop.permute.xlu1 %222  ;;  %v177_v26 = vpop.permute.xlu0 %176 }
 0x10c   :  { %v1719_v18 = vsel %vm224_vm1, %v90_v44, %v223_v15  ;;  %v1755_v34 = vsel %vm224_vm1, %v44_v21, %v177_v26  ;;  %v1420_v15 = vld [vmem:[%s2194_s1 + $0x48] ss:$16 sps:$4 sm:$0xff]   ;;  %v1434_v21 = vld [vmem:[%s2194_s1 + $0xc4] ss:$16 sps:$4 sm:$0xff]   ;;  %v1443_v26 = vld [vmem:[%s2194_s1 + $0xe0] ss:$16 sps:$4 sm:$0xff]  }
 0x10d   :  { %488 = vmatpush2.bf16.msra.mxu1 %v1719_v18 }
 0x10e   :  { %489 = vmatprep.subr.bf16.mxu1 %v1462_v8 }
 0x10f   :  { %v197_v20 = vpop.permute.xlu1 %196  ;;  %v58_v31 = vpop.permute.xlu0 %57 }
 0x110   :  { %v1727_v22 = vsel %vm224_vm1, %v64_v47, %v197_v20  ;;  %v1429_v20 = vld [vmem:[%s2194_s1 + $0x64] ss:$16 sps:$4 sm:$0xff]  }
 0x111   :  { %1279 = vmatprep.subr.bf16.mxu0 %v1727_v22 }
 0x112   :  { %1280 = vmatpush3.bf16.msra.mxu0 %v1730_v23 }
 0x113   :  { %v221_v24 = vpop.permute.xlu1 %220  ;;  %v175_v36 = vpop.permute.xlu0 %174 }
 0x114   :  { %v1736_v25 = vsel %vm224_vm1, %v1663_v46, %v221_v24  ;;  %v1778_v45 = vsel %vm224_vm1, %v1552_v4, %v175_v36  ;;  %v1414_v46 = vld [vmem:[%s2194_s1 + $0x2c] ss:$16 sps:$4 sm:$0xff]   ;;  %v1435_v24 = vld [vmem:[%s2194_s1 + $0x80] ss:$16 sps:$4 sm:$0xff]  }
 0x115   :  { %490 = vmatpush2.bf16.msra.mxu1 %v1736_v25 }
 0x116   :  { %491 = vmatprep.subr.bf16.mxu1 %v1462_v8 }
 0x117   :  { %v195_v27 = vpop.permute.xlu1 %194  ;;  %v189_v41 = vpop.permute.xlu0 %188 }
 0x118   :  { %v1741_v28 = vsel %vm224_vm1, %v62_v56, %v195_v27  ;;  %v1438_v27 = vld [vmem:[%s2194_s1 + $0xa4] ss:$16 sps:$4 sm:$0xff]  }
 0x119   :  { %1281 = vmatprep.subr.bf16.mxu0 %v1741_v28 }
 0x11a   :  { %1282 = vmatpush3.bf16.msra.mxu0 %v1744_v29 }
 0x11b   :  { %v219_v30 = vpop.permute.xlu1 %218 }
 0x11c   :  { %v1750_v32 = vsel %vm224_vm1, %v1665_v48, %v219_v30  ;;  %v54_v48 = vpop.permute.xlu0 %53 }
 0x11d   :  { %492 = vmatpush2.bf16.msra.mxu1 %v1750_v32 }
 0x11e   :  { %493 = vmatprep.subr.bf16.mxu1 %v1462_v8 }
 0x11f   :  { %v193_v33 = vpop.permute.xlu1 %192 }
 0x120   :  { %v1758_v35 = vsel %vm224_vm1, %v60_v0, %v193_v33  ;;  %v171_v56 = vpop.permute.xlu0 %170 }
 0x121   :  { %1283 = vmatprep.subr.bf16.mxu0 %v1758_v35  ;;  %v1813_v60 = vsel %vm224_vm1, %v1568_v6, %v171_v56 }
 0x122   :  { %1284 = vmatpush3.bf16.msra.mxu0 %v1755_v34 }
 0x123   :  { %v84_v39 = vpop.permute.xlu1 %83 }
 0x127   :  { %v217_v40 = vpop.permute.xlu1 %216 }
 0x128   :  { %v1769_v42 = vsel %vm224_vm1, %v84_v39, %v217_v40 }
 0x129   :  { %494 = vmatpush2.bf16.msra.mxu1 %v1769_v42 }
 0x12a   :  { %656 = vmatprep.subr.bf16.mxu1 %v1462_v8 }
 0x12b   :  { %v191_v44 = vpop.permute.xlu1 %190 }
 0x12c   :  { %v1784_v47 = vsel %vm224_vm1, %v58_v31, %v191_v44  ;;  %496 = vmatmul.mubr.bf16.vlgmr.msra.gmra.mxu1 %v1408_v43 }
 0x12d   :  { %1285 = vmatprep.subr.bf16.mxu0 %v1784_v47  ;;  %657 = vmatpush1.bf16.msra.mxu1 %v1668_v50 }
 0x12e   :  { %1286 = vmatpush3.bf16.msra.mxu0 %v1778_v45  ;;  %658 = vmatprep.subr.bf16.mxu1 %v1462_v8 }
 0x12f   :  { %v56_v49 = vpop.permute.xlu1 %55  ;;  %1162 = vmatprep.mubr.msk.bf16.mxu1 %vm407_vm0, %v1414_v46 }
 0x130   :  { %v1792_v4 = vsel %vm224_vm1, %v56_v49, %v189_v41 }
 0x131   :  { %1287 = vmatprep.subr.bf16.mxu0 %v1792_v4  ;;  %659 = vmatpush1.bf16.msra.mxu1 %v1673_v53 }
 0x132   :  { %660 = vmatprep.subr.bf16.mxu1 %v1462_v8 }
 0x133   :  { %v173_v54 = vpop.permute.xlu1 %172 }
 0x134   :  { %v1805_v57 = vsel %vm224_vm1, %v1559_v5, %v173_v54  ;;  %504 = vmatmul.mubr.bf16.gmra.mxu1 %v1416_v51  ;;  %v185_v5 = vpop.permute.xlu0 %184 }
 0x135   :  { %1288 = vmatpush3.bf16.msra.mxu0 %v1805_v57  ;;  %661 = vmatpush1.bf16.msra.mxu1 %v1678_v55 }
 0x136   :  { %662 = vmatprep.subr.bf16.mxu1 %v1462_v8  ;;  %1187 = vmatprep.mubr.msk.bf16.mxu1 %vm407_vm0, %v1422_v52 }
 0x137   :  { %v187_v59 = vpop.permute.xlu1 %186 }
 0x138   :  { %v1816_v62 = vsel %vm224_vm1, %v54_v48, %v187_v59  ;;  %v2025_v36 = vpop.permute.xlu0 %351 }
 0x139   :  { %1289 = vmatprep.subr.bf16.mxu0 %v1816_v62  ;;  %663 = vmatpush1.bf16.msra.mxu1 %v1683_v58 }
 0x13a   :  { %1290 = vmatpush3.bf16.msra.mxu0 %v1813_v60  ;;  %664 = vmatprep.subr.bf16.mxu1 %v1462_v8 }
 0x13b   :  { %v52_v0 = vpop.permute.xlu1 %51 }
 0x13c   :  { %v1823_v1 = vsel %vm224_vm1, %v52_v0, %v185_v5 }
 0x13d   :  { %1291 = vmatprep.subr.bf16.mxu0 %v1823_v1  ;;  %665 = vmatpush1.bf16.msra.mxu1 %v1688_v61 }
 0x13e   :  { %666 = vmatprep.subr.bf16.mxu1 %v1462_v8 }
 0x13f   :  { %v169_v6 = vpop.permute.xlu1 %168 }
 0x140   :  { %v1830_v3 = vsel %vm224_vm1, %v1577_v7, %v169_v6  ;;  %v1419_v7 = vld [vmem:[%s2194_s1 + $0x20] ss:$16 sps:$4 sm:$0xff]  }
 0x141   :  { %1292 = vmatpush3.bf16.msra.mxu0 %v1830_v3  ;;  %667 = vmatpush1.bf16.msra.mxu1 %v1693_v63 }
 0x142   :  { %1305 = vmatprep.subr.bf16.mxu0 %v1708_v13  ;;  %668 = vmatprep.subr.bf16.mxu1 %v1462_v8 }
 0x144   :  { %447 = vmatmul.mubr.bf16.vlgmr.msra.gmra.mxu0 %v1411_v9 }
 0x145   :  { %1306 = vmatpush3.bf16.msra.mxu0 %v1711_v14  ;;  %669 = vmatpush1.bf16.msra.mxu1 %v1698_v2 }
 0x146   :  { %1307 = vmatprep.subr.bf16.mxu0 %v1727_v22  ;;  %670 = vmatprep.subr.bf16.mxu1 %v1462_v8 }
 0x147   :  { %454 = vmatprep.mubr.bf16.mxu0 %v1417_v11 }
 0x149   :  { %1308 = vmatpush3.bf16.msra.mxu0 %v1730_v23  ;;  %671 = vmatpush1.bf16.msra.mxu1 %v1703_v10 }
 0x14a   :  { %1309 = vmatprep.subr.bf16.mxu0 %v1741_v28  ;;  %680 = vmatprep.subr.bf16.mxu1 %v1462_v8 }
 0x14c   :  { %455 = vmatmul.mubr.bf16.gmra.mxu0 %v1419_v7  ;;  %v2028_v41 = vpop.permute.xlu1 %356 }
 0x14d   :  { %1310 = vmatpush3.bf16.msra.mxu0 %v1744_v29  ;;  %681 = vmatpush2.bf16.msra.mxu1 %v1719_v18 }
 0x14e   :  { %1311 = vmatprep.subr.bf16.mxu0 %v1758_v35  ;;  %682 = vmatprep.subr.bf16.mxu1 %v1462_v8 }
 0x14f   :  { %639 = vmatprep.mubr.bf16.mxu0 %v1425_v12 }
 0x151   :  { %1312 = vmatpush3.bf16.msra.mxu0 %v1755_v34  ;;  %683 = vmatpush2.bf16.msra.mxu1 %v1736_v25 }
 0x152   :  { %1313 = vmatprep.subr.bf16.mxu0 %v1784_v47  ;;  %684 = vmatprep.subr.bf16.mxu1 %v1462_v8 }
 0x155   :  { %1314 = vmatpush3.bf16.msra.mxu0 %v1778_v45  ;;  %685 = vmatpush2.bf16.msra.mxu1 %v1750_v32 }
 0x156   :  { %1315 = vmatprep.subr.bf16.mxu0 %v1792_v4  ;;  %686 = vmatprep.subr.bf16.mxu1 %v1462_v8 }
 0x159   :  { %1316 = vmatpush3.bf16.msra.mxu0 %v1805_v57  ;;  %687 = vmatpush2.bf16.msra.mxu1 %v1769_v42 }
 0x15a   :  { %1317 = vmatprep.subr.bf16.mxu0 %v1816_v62  ;;  %1361 = vmatprep.subr.bf16.mxu1 %v1708_v13 }
 0x15c   :  { %689 = vmatmul.mubr.bf16.vlgmr.msra.gmra.mxu1 %v1420_v15 }
 0x15d   :  { %1318 = vmatpush3.bf16.msra.mxu0 %v1813_v60  ;;  %1362 = vmatpush3.bf16.msra.mxu1 %v1711_v14 }
 0x15e   :  { %1319 = vmatprep.subr.bf16.mxu0 %v1823_v1  ;;  %1363 = vmatprep.subr.bf16.mxu1 %v1727_v22 }
 0x15f   :  { %1188 = vmatprep.mubr.msk.bf16.mxu1 %vm407_vm0, %v1426_v16 }
 0x161   :  { %1320 = vmatpush3.bf16.msra.mxu0 %v1830_v3  ;;  %1364 = vmatpush3.bf16.msra.mxu1 %v1730_v23 }
 0x162   :  { %1333 = vmatprep.subr.bf16.mxu0 %v1708_v13  ;;  %1365 = vmatprep.subr.bf16.mxu1 %v1741_v28  ;;  %v1431_v13 = vld [vmem:[%s2194_s1 + $0x60] ss:$16 sps:$4 sm:$0xff]  }
 0x164   :  { %640 = vmatmul.mubr.bf16.vlgmr.msra.gmra.mxu0 %v1423_v17  ;;  %697 = vmatmul.mubr.bf16.gmra.mxu1 %v1428_v19 }
 0x165   :  { %1334 = vmatpush3.bf16.msra.mxu0 %v1711_v14  ;;  %1366 = vmatpush3.bf16.msra.mxu1 %v1744_v29  ;;  %v1437_v14 = vld [vmem:[%s2194_s1 + $0x84] ss:$16 sps:$4 sm:$0xff]  }
 0x166   :  { %1335 = vmatprep.subr.bf16.mxu0 %v1727_v22  ;;  %1367 = vmatprep.subr.bf16.mxu1 %v1758_v35  ;;  %v1432_v22 = vld [vmem:[%s2194_s1 + $0xc0] ss:$16 sps:$4 sm:$0xff]  }
 0x167   :  { %647 = vmatprep.mubr.bf16.mxu0 %v1429_v20  ;;  %1025 = vmatprep.mubr.bf16.mxu1 %v1434_v21 }
 0x169   :  { %1336 = vmatpush3.bf16.msra.mxu0 %v1730_v23  ;;  %1368 = vmatpush3.bf16.msra.mxu1 %v1755_v34  ;;  %v1440_v23 = vld [vmem:[%s2194_s1 + $0xe4] ss:$16 sps:$4 sm:$0xff]  }
 0x16a   :  { %1337 = vmatprep.subr.bf16.mxu0 %v1741_v28  ;;  %1369 = vmatprep.subr.bf16.mxu1 %v1784_v47  ;;  %v1446_v28 = vld [vmem:[%s2194_s1 + $0xcc] ss:$16 sps:$4 sm:$0xff]  }
 0x16c   :  { %648 = vmatmul.mubr.bf16.gmra.mxu0 %v1431_v13 }
 0x16d   :  { %1338 = vmatpush3.bf16.msra.mxu0 %v1744_v29  ;;  %1370 = vmatpush3.bf16.msra.mxu1 %v1778_v45  ;;  %v1442_v29 = vld [vmem:[%s2194_s1 + $0xa0] ss:$16 sps:$4 sm:$0xff]  }
 0x16e   :  { %1339 = vmatprep.subr.bf16.mxu0 %v1758_v35  ;;  %1371 = vmatprep.subr.bf16.mxu1 %v1792_v4 }
 0x16f   :  { %832 = vmatprep.mubr.bf16.mxu0 %v1437_v14 }
 0x170   :  { %v2031_v48 = vpop.permute.xlu1 %361 }
 0x171   :  { %1340 = vmatpush3.bf16.msra.mxu0 %v1755_v34  ;;  %1372 = vmatpush3.bf16.msra.mxu1 %v1805_v57 }
 0x172   :  { %1341 = vmatprep.subr.bf16.mxu0 %v1784_v47  ;;  %1373 = vmatprep.subr.bf16.mxu1 %v1816_v62 }
 0x174   :  { %v2039_v59 = vpop.permute.xlu0 %366 }
 0x175   :  { %1342 = vmatpush3.bf16.msra.mxu0 %v1778_v45  ;;  %1374 = vmatpush3.bf16.msra.mxu1 %v1813_v60 }
 0x176   :  { %1343 = vmatprep.subr.bf16.mxu0 %v1792_v4  ;;  %1375 = vmatprep.subr.bf16.mxu1 %v1823_v1 }
 0x179   :  { %1344 = vmatpush3.bf16.msra.mxu0 %v1805_v57  ;;  %1376 = vmatpush3.bf16.msra.mxu1 %v1830_v3 }
 0x17a   :  { %1345 = vmatprep.subr.bf16.mxu0 %v1816_v62  ;;  %1042 = vmatprep.subr.bf16.mxu1 %v1462_v8 }
 0x17c   :  { %1026 = vmatmul.mubr.bf16.vlgmr.msra.gmra.mxu1 %v1432_v22 }
 0x17d   :  { %1346 = vmatpush3.bf16.msra.mxu0 %v1813_v60  ;;  %1043 = vmatpush1.bf16.msra.mxu1 %v1668_v50 }
 0x17e   :  { %1347 = vmatprep.subr.bf16.mxu0 %v1823_v1  ;;  %1044 = vmatprep.subr.bf16.mxu1 %v1462_v8 }
 0x17f   :  { %1033 = vmatprep.mubr.bf16.mxu1 %v1440_v23 }
 0x181   :  { %1348 = vmatpush3.bf16.msra.mxu0 %v1830_v3  ;;  %1045 = vmatpush1.bf16.msra.mxu1 %v1673_v53 }
 0x182   :  { %849 = vmatprep.subr.bf16.mxu0 %v1462_v8  ;;  %1046 = vmatprep.subr.bf16.mxu1 %v1462_v8 }
 0x184   :  { %833 = vmatmul.mubr.bf16.vlgmr.msra.gmra.mxu0 %v1435_v24  ;;  %1034 = vmatmul.mubr.bf16.gmra.mxu1 %v1443_v26 }
 0x185   :  { %850 = vmatpush1.bf16.msra.mxu0 %v1668_v50  ;;  %1047 = vmatpush1.bf16.msra.mxu1 %v1678_v55  ;;  %v1449_v50 = vld [vmem:[%s2194_s1 + $0x8c] ss:$16 sps:$4 sm:$0xff]  }
 0x186   :  { %851 = vmatprep.subr.bf16.mxu0 %v1462_v8  ;;  %1048 = vmatprep.subr.bf16.mxu1 %v1462_v8 }
 0x187   :  { %840 = vmatprep.mubr.bf16.mxu0 %v1438_v27  ;;  %1247 = vmatprep.mubr.msk.bf16.mxu1 %vm407_vm0, %v1446_v28 }
 0x189   :  { %852 = vmatpush1.bf16.msra.mxu0 %v1673_v53  ;;  %1049 = vmatpush1.bf16.msra.mxu1 %v1683_v58  ;;  %v1444_v53 = vld [vmem:[%s2194_s1 + $0xc8] ss:$16 sps:$4 sm:$0xff]  }
 0x18a   :  { %853 = vmatprep.subr.bf16.mxu0 %v1462_v8  ;;  %1050 = vmatprep.subr.bf16.mxu1 %v1462_v8 }
 0x18c   :  { %841 = vmatmul.mubr.bf16.gmra.mxu0 %v1442_v29 }
 0x18d   :  { %854 = vmatpush1.bf16.msra.mxu0 %v1678_v55  ;;  %1051 = vmatpush1.bf16.msra.mxu1 %v1688_v61  ;;  %v1450_v55 = vld [vmem:[%s2194_s1 + $0xec] ss:$16 sps:$4 sm:$0xff]  }
 0x18e   :  { %855 = vmatprep.subr.bf16.mxu0 %v1462_v8  ;;  %1052 = vmatprep.subr.bf16.mxu1 %v1462_v8 }
 0x18f   :  { %1217 = vmatprep.mubr.msk.bf16.mxu0 %vm407_vm0, %v1449_v50 }
 0x191   :  { %856 = vmatpush1.bf16.msra.mxu0 %v1683_v58  ;;  %1053 = vmatpush1.bf16.msra.mxu1 %v1693_v63  ;;  %v1447_v58 = vld [vmem:[%s2194_s1 + $0x88] ss:$16 sps:$4 sm:$0xff]  }
 0x192   :  { %857 = vmatprep.subr.bf16.mxu0 %v1462_v8  ;;  %1054 = vmatprep.subr.bf16.mxu1 %v1462_v8 }
 0x195   :  { %858 = vmatpush1.bf16.msra.mxu0 %v1688_v61  ;;  %1055 = vmatpush1.bf16.msra.mxu1 %v1698_v2  ;;  %v1452_v61 = vld [vmem:[%s2194_s1 + $0xe8] ss:$16 sps:$4 sm:$0xff]  }
 0x196   :  { %859 = vmatprep.subr.bf16.mxu0 %v1462_v8  ;;  %1056 = vmatprep.subr.bf16.mxu1 %v1462_v8 }
 0x199   :  { %860 = vmatpush1.bf16.msra.mxu0 %v1693_v63  ;;  %1057 = vmatpush1.bf16.msra.mxu1 %v1703_v10  ;;  %v1453_v63 = vld [vmem:[%s2194_s1 + $0xac] ss:$16 sps:$4 sm:$0xff]  }
 0x19a   :  { %861 = vmatprep.subr.bf16.mxu0 %v1462_v8  ;;  %1066 = vmatprep.subr.bf16.mxu1 %v1462_v8 }
 0x19d   :  { %862 = vmatpush1.bf16.msra.mxu0 %v1698_v2  ;;  %1067 = vmatpush2.bf16.msra.mxu1 %v1719_v18 }
 0x19e   :  { %863 = vmatprep.subr.bf16.mxu0 %v1462_v8  ;;  %1068 = vmatprep.subr.bf16.mxu1 %v1462_v8 }
 0x1a1   :  { %864 = vmatpush1.bf16.msra.mxu0 %v1703_v10  ;;  %1069 = vmatpush2.bf16.msra.mxu1 %v1736_v25 }
 0x1a2   :  { %873 = vmatprep.subr.bf16.mxu0 %v1462_v8  ;;  %1070 = vmatprep.subr.bf16.mxu1 %v1462_v8 }
 0x1a5   :  { %874 = vmatpush2.bf16.msra.mxu0 %v1719_v18  ;;  %1071 = vmatpush2.bf16.msra.mxu1 %v1750_v32 }
 0x1a6   :  { %875 = vmatprep.subr.bf16.mxu0 %v1462_v8  ;;  %1072 = vmatprep.subr.bf16.mxu1 %v1462_v8 }
 0x1a9   :  { %876 = vmatpush2.bf16.msra.mxu0 %v1736_v25  ;;  %1073 = vmatpush2.bf16.msra.mxu1 %v1769_v42 }
 0x1aa   :  { %877 = vmatprep.subr.bf16.mxu0 %v1462_v8 }
 0x1ac   :  { %1075 = vmatmul.mubr.bf16.vlgmr.msra.gmra.mxu1 %v1444_v53 }
 0x1ad   :  { %878 = vmatpush2.bf16.msra.mxu0 %v1750_v32  ;;  %1248 = vmatprep.mubr.msk.bf16.mxu1 %vm407_vm0, %v1450_v55 }
 0x1ae   :  { %879 = vmatprep.subr.bf16.mxu0 %v1462_v8  ;;  %v1455_v8 = vld [vmem:[%s2194_s1 + $0xa8] ss:$16 sps:$4 sm:$0xff]   ;;  %s1464_s1 = smov 112  }
 0x1b1   :  { %880 = vmatpush2.bf16.msra.mxu0 %v1769_v42 }
 0x1b4   :  { %882 = vmatmul.mubr.bf16.vlgmr.msra.gmra.mxu0 %v1447_v58  ;;  %1083 = vmatmul.mubr.bf16.gmra.mxu1 %v1452_v61 }
 0x1b5   :  { %1218 = vmatprep.mubr.msk.bf16.mxu0 %vm407_vm0, %v1453_v63 }
 0x1bc   :  { %890 = vmatmul.mubr.bf16.gmra.mxu0 %v1455_v8 }
 0x1ec   :  { %v497_v2 = vpop.f32.mrf.mxu1 }
 0x1ee   :  { %v499_v10 = vpop.f32.mrf.mxu1 }
 0x1f0   :  { %v500_v18 = vpop.f32.mrf.mxu1 }
 0x1f2   :  { %v502_v25 = vpop.f32.mrf.mxu1 }
 0x1f4   :  { %v505_v30 = vpop.f32.mrf.mxu1 }
 0x1f6   :  { %v507_v31 = vpop.f32.mrf.mxu1 }
 0x1f8   :  { %v508_v32 = vpop.f32.mrf.mxu1 }
 0x1fa   :  { %v510_v33 = vpop.f32.mrf.mxu1 }
 0x204   :  { %v1293_v34 = vpop.f32.mrf.mxu0 }
 0x206   :  { %v1294_v35 = vpop.f32.mrf.mxu0 }
 0x207   :  { %v1295_v37 = vadd.f32 %v1294_v35, %v1293_v34 }
 0x208   :  { %v1296_v38 = vpop.f32.mrf.mxu0 }
 0x209   :  { %v449_v39 = vadd.f32 %v1295_v37, %v2025_v36 }
 0x20a   :  { %v1297_v40 = vpop.f32.mrf.mxu0 }
 0x20b   :  { %v1298_v42 = vadd.f32 %v1297_v40, %v1296_v38  ;;  %v498_v43 = vadd.f32 %v497_v2, %v449_v39 }
 0x20c   :  { %v1299_v44 = vpop.f32.mrf.mxu0 }
 0x20d   :  { %v452_v45 = vadd.f32 %v1298_v42, %v2028_v41  ;;  %v512_v46 = vmax.f32 %v498_v43, 0.0 }
 0x20e   :  { %v1300_v47 = vpop.f32.mrf.mxu0 }
 0x20f   :  { %v1261_v49 = vpack.c.bf16 %v512_v46, %v512_v46  ;;  %v501_v4 = vadd.f32 %v500_v18, %v452_v45  ;;  %v1301_v51 = vadd.f32 %v1300_v47, %v1299_v44 }
 0x210   :  { %v1302_v52 = vpop.f32.mrf.mxu0 }
 0x211   :  { %537 = vrot.lane.b32.xlu1 %v1261_v49, %s1464_s1  ;;  %533 = vst.msk [vmem:[%s2196_s3] sm:$0xf] %vm532_vm2, %v1261_v49  ;;  %v513_v54 = vmax.f32 %v501_v4, 0.0  ;;  %v457_v56 = vadd.f32 %v1301_v51, %v2031_v48 }
 0x212   :  { %v1303_v57 = vpop.f32.mrf.mxu0 }
 0x213   :  { %v1262_v60 = vpack.c.bf16 %v513_v54, %v513_v54  ;;  %v1304_v62 = vadd.f32 %v1303_v57, %v1302_v52  ;;  %v506_v5 = vadd.f32 %v505_v30, %v457_v56 }
 0x215   :  { %539 = vrot.lane.b32.xlu0 %v1262_v60, %s1464_s1  ;;  %534 = vst.msk [vmem:[%s2196_s3 + $0x4] sm:$0xf] %vm532_vm2, %v1262_v60  ;;  %v460_v0 = vadd.f32 %v1304_v62, %v2039_v59  ;;  %v514_v1 = vmax.f32 %v506_v5, 0.0 }
 0x217   :  { %v509_v6 = vadd.f32 %v508_v32, %v460_v0  ;;  %v1263_v3 = vpack.c.bf16 %v514_v1, %v514_v1 }
 0x219   :  { %v515_v9 = vmax.f32 %v509_v6, 0.0  ;;  %535 = vst.msk [vmem:[%s2196_s3 + $0x8] sm:$0xf] %vm532_vm2, %v1263_v3  ;;  %541 = vrot.lane.b32.xlu1 %v1263_v3, %s1464_s1 }
 0x21b   :  { %v1264_v11 = vpack.c.bf16 %v515_v9, %v515_v9 }
 0x21c   :  { %v690_v7 = vpop.f32.mrf.mxu1 }
 0x21d   :  { %536 = vst.msk [vmem:[%s2196_s3 + $0xc] sm:$0xf] %vm532_vm2, %v1264_v11  ;;  %543 = vrot.lane.b32.xlu0 %v1264_v11, %s1464_s1 }
 0x21e   :  { %v692_v12 = vpop.f32.mrf.mxu1 }
 0x220   :  { %v693_v15 = vpop.f32.mrf.mxu1 }
 0x222   :  { %v695_v16 = vpop.f32.mrf.mxu1 }
 0x224   :  { %v1321_v17 = vpop.f32.mrf.mxu0  ;;  %v698_v19 = vpop.f32.mrf.mxu1 }
 0x226   :  { %v1322_v20 = vpop.f32.mrf.mxu0  ;;  %v700_v21 = vpop.f32.mrf.mxu1 }
 0x227   :  { %v1323_v13 = vadd.f32 %v1322_v20, %v1321_v17 }
 0x228   :  { %v1324_v14 = vpop.f32.mrf.mxu0  ;;  %v701_v22 = vpop.f32.mrf.mxu1 }
 0x229   :  { %v642_v23 = vadd.f32 %v1323_v13, %v2025_v36 }
 0x22a   :  { %v1325_v24 = vpop.f32.mrf.mxu0  ;;  %v703_v26 = vpop.f32.mrf.mxu1 }
 0x22b   :  { %v691_v27 = vadd.f32 %v690_v7, %v642_v23  ;;  %v1326_v28 = vadd.f32 %v1325_v24, %v1324_v14 }
 0x22c   :  { %v1327_v29 = vpop.f32.mrf.mxu0 }
 0x22d   :  { %v705_v50 = vmax.f32 %v691_v27, 0.0  ;;  %v645_v53 = vadd.f32 %v1326_v28, %v2028_v41 }
 0x22e   :  { %v1328_v55 = vpop.f32.mrf.mxu0 }
 0x22f   :  { %v1265_v58 = vpack.c.bf16 %v705_v50, %v705_v50  ;;  %v694_v61 = vadd.f32 %v693_v15, %v645_v53  ;;  %v1329_v63 = vadd.f32 %v1328_v55, %v1327_v29 }
 0x230   :  { %v1330_v8 = vpop.f32.mrf.mxu0 }
 0x231   :  { %1193 = vst.msk [vmem:[%s2196_s3 + $0x10] sm:$0xf] %vm532_vm2, %v1265_v58  ;;  %v706_v2 = vmax.f32 %v694_v61, 0.0  ;;  %730 = vrot.lane.b32.xlu1 %v1265_v58, %s1464_s1  ;;  %v650_v10 = vadd.f32 %v1329_v63, %v2031_v48 }
 0x232   :  { %v1331_v18 = vpop.f32.mrf.mxu0 }
 0x233   :  { %v1266_v25 = vpack.c.bf16 %v706_v2, %v706_v2  ;;  %v1332_v30 = vadd.f32 %v1331_v18, %v1330_v8  ;;  %v699_v31 = vadd.f32 %v698_v19, %v650_v10 }
 0x235   :  { %1194 = vst.msk [vmem:[%s2196_s3 + $0x14] sm:$0xf] %vm532_vm2, %v1266_v25  ;;  %732 = vrot.lane.b32.xlu0 %v1266_v25, %s1464_s1  ;;  %v707_v32 = vmax.f32 %v699_v31, 0.0  ;;  %v653_v33 = vadd.f32 %v1332_v30, %v2039_v59 }
 0x237   :  { %v1267_v34 = vpack.c.bf16 %v707_v32, %v707_v32  ;;  %v702_v35 = vadd.f32 %v701_v22, %v653_v33 }
 0x239   :  { %1195 = vst.msk [vmem:[%s2196_s3 + $0x18] sm:$0xf] %vm532_vm2, %v1267_v34  ;;  %v708_v37 = vmax.f32 %v702_v35, 0.0  ;;  %734 = vrot.lane.b32.xlu1 %v1267_v34, %s1464_s1 }
 0x23b   :  { %v1268_v38 = vpack.c.bf16 %v708_v37, %v708_v37 }
 0x23c   :  { %v1377_v39 = vpop.f32.mrf.mxu1 }
 0x23d   :  { %1196 = vst.msk [vmem:[%s2196_s3 + $0x1c] sm:$0xf] %vm532_vm2, %v1268_v38  ;;  %736 = vrot.lane.b32.xlu0 %v1268_v38, %s1464_s1 }
 0x23e   :  { %v1378_v40 = vpop.f32.mrf.mxu1 }
 0x23f   :  { %v1379_v54 = vadd.f32 %v1378_v40, %v1377_v39 }
 0x240   :  { %v1380_v43 = vpop.f32.mrf.mxu1 }
 0x241   :  { %v1028_v62 = vadd.f32 %v1379_v54, %v2025_v36 }
 0x242   :  { %v1381_v45 = vpop.f32.mrf.mxu1 }
 0x243   :  { %v1382_v60 = vadd.f32 %v1381_v45, %v1380_v43 }
 0x244   :  { %v1349_v42 = vpop.f32.mrf.mxu0  ;;  %v1383_v46 = vpop.f32.mrf.mxu1 }
 0x245   :  { %v1031_v7 = vadd.f32 %v1382_v60, %v2028_v41 }
 0x246   :  { %v1350_v44 = vpop.f32.mrf.mxu0  ;;  %v1384_v49 = vpop.f32.mrf.mxu1 }
 0x247   :  { %v1351_v3 = vadd.f32 %v1350_v44, %v1349_v42  ;;  %v1385_v9 = vadd.f32 %v1384_v49, %v1383_v46 }
 0x248   :  { %v1352_v47 = vpop.f32.mrf.mxu0  ;;  %v1386_v52 = vpop.f32.mrf.mxu1 }
 0x249   :  { %v835_v14 = vadd.f32 %v1351_v3, %v2025_v36  ;;  %v1036_v22 = vadd.f32 %v1385_v9, %v2031_v48 }
 0x24a   :  { %v1353_v4 = vpop.f32.mrf.mxu0  ;;  %v1387_v57 = vpop.f32.mrf.mxu1 }
 0x24b   :  { %v1354_v17 = vadd.f32 %v1353_v4, %v1352_v47  ;;  %v1388_v21 = vadd.f32 %v1387_v57, %v1386_v52 }
 0x24c   :  { %v1355_v51 = vpop.f32.mrf.mxu0 }
 0x24d   :  { %v838_v53 = vadd.f32 %v1354_v17, %v2028_v41  ;;  %v1039_v36 = vadd.f32 %v1388_v21, %v2039_v59 }
 0x24e   :  { %v1356_v56 = vpop.f32.mrf.mxu0 }
 0x24f   :  { %v1357_v55 = vadd.f32 %v1356_v56, %v1355_v51 }
 0x250   :  { %v1358_v1 = vpop.f32.mrf.mxu0 }
 0x251   :  { %v843_v34 = vadd.f32 %v1357_v55, %v2031_v48 }
 0x252   :  { %v1359_v19 = vpop.f32.mrf.mxu0 }
 0x253   :  { %v1360_v32 = vadd.f32 %v1359_v19, %v1358_v1 }
 0x255   :  { %v846_v48 = vadd.f32 %v1360_v32, %v2039_v59 }
 0x26c   :  { %v1076_v5 = vpop.f32.mrf.mxu1 }
 0x26d   :  { %v1077_v0 = vadd.f32 %v1076_v5, %v1028_v62 }
 0x26e   :  { %v1078_v6 = vpop.f32.mrf.mxu1 }
 0x26f   :  { %v1091_v11 = vmax.f32 %v1077_v0, 0.0 }
 0x270   :  { %v1079_v12 = vpop.f32.mrf.mxu1 }
 0x271   :  { %v1273_v15 = vpack.c.bf16 %v1091_v11, %v1091_v11  ;;  %v1080_v16 = vadd.f32 %v1079_v12, %v1031_v7 }
 0x272   :  { %v1081_v20 = vpop.f32.mrf.mxu1 }
 0x273   :  { %1253 = vst.msk [vmem:[%s2196_s3 + $0x30] sm:$0xf] %vm532_vm2, %v1273_v15  ;;  %v1092_v13 = vmax.f32 %v1080_v16, 0.0 }
 0x274   :  { %v883_v23 = vpop.f32.mrf.mxu0  ;;  %v1084_v24 = vpop.f32.mrf.mxu1 }
 0x275   :  { %v1274_v26 = vpack.c.bf16 %v1092_v13, %v1092_v13  ;;  %v884_v27 = vadd.f32 %v883_v23, %v835_v14  ;;  %v1085_v28 = vadd.f32 %v1084_v24, %v1036_v22 }
 0x276   :  { %v885_v29 = vpop.f32.mrf.mxu0  ;;  %v1086_v50 = vpop.f32.mrf.mxu1 }
 0x277   :  { %1254 = vst.msk [vmem:[%s2196_s3 + $0x34] sm:$0xf] %vm532_vm2, %v1274_v26  ;;  %v898_v58 = vmax.f32 %v884_v27, 0.0  ;;  %v1093_v61 = vmax.f32 %v1085_v28, 0.0 }
 0x278   :  { %v886_v63 = vpop.f32.mrf.mxu0  ;;  %v1087_v8 = vpop.f32.mrf.mxu1 }
 0x279   :  { %v1269_v2 = vpack.c.bf16 %v898_v58, %v898_v58  ;;  %v1275_v10 = vpack.c.bf16 %v1093_v61, %v1093_v61  ;;  %v887_v18 = vadd.f32 %v886_v63, %v838_v53  ;;  %v1088_v25 = vadd.f32 %v1087_v8, %v1039_v36 }
 0x27a   :  { %v888_v30 = vpop.f32.mrf.mxu0  ;;  %v1089_v31 = vpop.f32.mrf.mxu1 }
 0x27b   :  { %1223 = vst.msk [vmem:[%s2196_s3 + $0x20] sm:$0xf] %vm532_vm2, %v1269_v2  ;;  %1255 = vst.msk [vmem:[%s2196_s3 + $0x38] sm:$0xf] %vm532_vm2, %v1275_v10  ;;  %v899_v41 = vmax.f32 %v887_v18, 0.0  ;;  %v1094_v33 = vmax.f32 %v1088_v25, 0.0  ;;  %923 = vrot.lane.b32.xlu1 %v1269_v2, %s1464_s1 }
 0x27c   :  { %v891_v35 = vpop.f32.mrf.mxu0 }
 0x27d   :  { %v1270_v37 = vpack.c.bf16 %v899_v41, %v899_v41  ;;  %v1276_v38 = vpack.c.bf16 %v1094_v33, %v1094_v33  ;;  %v892_v39 = vadd.f32 %v891_v35, %v843_v34 }
 0x27e   :  { %v893_v40 = vpop.f32.mrf.mxu0 }
 0x27f   :  { %1224 = vst.msk [vmem:[%s2196_s3 + $0x24] sm:$0xf] %vm532_vm2, %v1270_v37  ;;  %1256 = vst.msk [vmem:[%s2196_s3 + $0x3c] sm:$0xf] %vm532_vm2, %v1276_v38  ;;  %v900_v42 = vmax.f32 %v892_v39, 0.0  ;;  %925 = vrot.lane.b32.xlu0 %v1270_v37, %s1464_s1 }
 0x280   :  { %v894_v43 = vpop.f32.mrf.mxu0 }
 0x281   :  { %v1271_v44 = vpack.c.bf16 %v900_v42, %v900_v42  ;;  %v895_v45 = vadd.f32 %v894_v43, %v846_v48 }
 0x282   :  { %v896_v46 = vpop.f32.mrf.mxu0 }
 0x283   :  { %1225 = vst.msk [vmem:[%s2196_s3 + $0x28] sm:$0xf] %vm532_vm2, %v1271_v44  ;;  %v901_v47 = vmax.f32 %v895_v45, 0.0  ;;  %927 = vrot.lane.b32.xlu1 %v1271_v44, %s1464_s1  ;;  %v538_v49 = vpop.permute.xlu1 %537 }
 0x284   :  { %1167 = vst.msk [vmem:[%s2196_s3 + $0x40] sm:$0xf] %vm532_vm2, %v538_v49 }
 0x285   :  { %v1272_v4 = vpack.c.bf16 %v901_v47, %v901_v47 }
 0x287   :  { %1226 = vst.msk [vmem:[%s2196_s3 + $0x2c] sm:$0xf] %vm532_vm2, %v1272_v4  ;;  %1116 = vrot.lane.b32.xlu1 %v1273_v15, %s1464_s1  ;;  %929 = vrot.lane.b32.xlu0 %v1272_v4, %s1464_s1  ;;  %v540_v59 = vpop.permute.xlu0 %539 }
 0x288   :  { %1168 = vst.msk [vmem:[%s2196_s3 + $0x44] sm:$0xf] %vm532_vm2, %v540_v59 }
 0x28b   :  { %1120 = vrot.lane.b32.xlu1 %v1275_v10, %s1464_s1  ;;  %1118 = vrot.lane.b32.xlu0 %v1274_v26, %s1464_s1  ;;  %v542_v51 = vpop.permute.xlu1 %541 }
 0x28c   :  { %1169 = vst.msk [vmem:[%s2196_s3 + $0x48] sm:$0xf] %vm532_vm2, %v542_v51 }
 0x28f   :  { %1122 = vrot.lane.b32.xlu0 %v1276_v38, %s1464_s1  ;;  %v544_v52 = vpop.permute.xlu0 %543 }
 0x290   :  { %1170 = vst.msk [vmem:[%s2196_s3 + $0x4c] sm:$0xf] %vm532_vm2, %v544_v52 }
 0x2a3   :  { %v731_v54 = vpop.permute.xlu1 %730 }
 0x2a4   :  { %1197 = vst.msk [vmem:[%s2196_s3 + $0x50] sm:$0xf] %vm532_vm2, %v731_v54 }
 0x2a7   :  { %v733_v56 = vpop.permute.xlu0 %732 }
 0x2a8   :  { %1198 = vst.msk [vmem:[%s2196_s3 + $0x54] sm:$0xf] %vm532_vm2, %v733_v56 }
 0x2ab   :  { %v735_v57 = vpop.permute.xlu1 %734 }
 0x2ac   :  { %1199 = vst.msk [vmem:[%s2196_s3 + $0x58] sm:$0xf] %vm532_vm2, %v735_v57 }
 0x2af   :  { %v737_v60 = vpop.permute.xlu0 %736 }
 0x2b0   :  { %1200 = vst.msk [vmem:[%s2196_s3 + $0x5c] sm:$0xf] %vm532_vm2, %v737_v60 }
 0x2ed   :  { %v924_v62 = vpop.permute.xlu1 %923 }
 0x2ee   :  { %1227 = vst.msk [vmem:[%s2196_s3 + $0x60] sm:$0xf] %vm532_vm2, %v924_v62 }
 0x2f1   :  { %v926_v5 = vpop.permute.xlu0 %925 }
 0x2f2   :  { %1228 = vst.msk [vmem:[%s2196_s3 + $0x64] sm:$0xf] %vm532_vm2, %v926_v5 }
 0x2f5   :  { %v928_v0 = vpop.permute.xlu1 %927 }
 0x2f6   :  { %1229 = vst.msk [vmem:[%s2196_s3 + $0x68] sm:$0xf] %vm532_vm2, %v928_v0 }
 0x2f9   :  { %v1117_v1 = vpop.permute.xlu1 %1116  ;;  %v930_v6 = vpop.permute.xlu0 %929 }
 0x2fa   :  { %1257 = vst.msk [vmem:[%s2196_s3 + $0x70] sm:$0xf] %vm532_vm2, %v1117_v1  ;;  %1230 = vst.msk [vmem:[%s2196_s3 + $0x6c] sm:$0xf] %vm532_vm2, %v930_v6 }
 0x2fd   :  { %v1121_v3 = vpop.permute.xlu1 %1120  ;;  %v1119_v9 = vpop.permute.xlu0 %1118 }
 0x2fe   :  { %1259 = vst.msk [vmem:[%s2196_s3 + $0x78] sm:$0xf] %vm532_vm2, %v1121_v3  ;;  %1258 = vst.msk [vmem:[%s2196_s3 + $0x74] sm:$0xf] %vm532_vm2, %v1119_v9 }
 0x301   :  { %v1123_v11 = vpop.permute.xlu0 %1122 }
 0x302   :  { %1260 = vst.msk [vmem:[%s2196_s3 + $0x7c] sm:$0xf] %vm532_vm2, %v1123_v11 }

// kernel: wavegan_forward.9
= control target key start
LH: loop header
LB: loop body
LE: loop exit
PB: predicated region body
PF: predicated region fallthrough
CT: control target
= control target key end

     0   :  { %s587_s16 = smov 125   ;;  %s588_s17 = smov 126   ;;  %v594_v4 = vmov 0   ;;  %vm200_vm0 = vcmask 785408   ;;  %vm120_vm1 = vcmask 523264   ;;  %vm255_vm2 = vcmask 519168   ;;  %s921_s0 = inlined_call_operand.vmem [shape: bf16[2,32,70], index: 0, kind: input, shape index: {}]   ;;  %s922_s1 = inlined_call_operand.vmem [shape: bf16[4,16,224], index: 1, kind: input, shape index: {}]   ;;  %s923_s2 = inlined_call_operand.vmem [shape: f32[16,1], index: 2, kind: input, shape index: {}]   ;;  %s924_s3 = inlined_call_operand.vmem [shape: bf16[2,4,16,64], index: 3, kind: output, shape index: {}]  }
   0x1   :  { %v571_v0 = vld [vmem:[%s921_s0 + $0x18] sm:$0xff]   ;;  %v572_v1 = vld [vmem:[%s921_s0 + $0x10] sm:$0xff]   ;;  %s589_s18 = smov 127   ;;  %s590_s19 = smov 122   ;;  %v624_v2 = vld [vmem:[%s921_s0 + $0x8] sm:$0xff]   ;;  %204 = vmatprep.subr.bf16.mxu0 %v594_v4  ;;  %282 = vmatprep.subr.bf16.mxu1 %v594_v4 }
   0x2   :  { %78 = vrot.lane.b32.xlu0 %v571_v0, %s587_s16  ;;  %74 = vrot.lane.b32.xlu1 %v571_v0, %s588_s17  ;;  %s591_s20 = smov 123   ;;  %s592_s21 = smov 124   ;;  %v630_v3 = vld [vmem:[%s921_s0] sm:$0xff]   ;;  %v580_v17 = vld [vmem:[%s922_s1 + $0x14] ss:$8 sps:$4 sm:$0xff]  }
   0x3   :  { %s593_s26 = smov 64   ;;  %569 = vset.pattern.permute.xlu0 %v594_v4  ;;  %570 = vset.pattern.permute.xlu1 %v594_v4  ;;  %v577_v16 = vld [vmem:[%s922_s1 + $0x4] ss:$8 sps:$4 sm:$0xff]   ;;  %v575_v61 = vld [vmem:[%s922_s1] ss:$8 sps:$4 sm:$0xff]  }
   0x4   :  { %515 = vmatprep.mubr.msk.bf16.mxu0 %vm200_vm0, %v577_v16  ;;  %524 = vmatprep.mubr.msk.bf16.mxu1 %vm200_vm0, %v580_v17  ;;  %v177_v21 = vld [vmem:[%s923_s2] sm:$0xff]  ;;  %v178_v22 = vld [vmem:[%s923_s2 + $0x8] sm:$0xff]  ;;  %v578_v62 = vld [vmem:[%s922_s1 + $0x10] ss:$8 sps:$4 sm:$0xff]  }
   0x5   :  { %v581_v63 = vld [vmem:[%s922_s1 + $0x24] ss:$8 sps:$4 sm:$0xff]  }
   0x6   :  { %76 = vrot.lane.b32.xlu0 %v572_v1, %s587_s16  ;;  %72 = vrot.lane.b32.xlu1 %v572_v1, %s588_s17 }
   0xa   :  { %70 = vrot.lane.b32.xlu0 %v571_v0, %s589_s18  ;;  %68 = vrot.lane.b32.xlu1 %v572_v1, %s589_s18 }
   0xe   :  { %90 = vrot.lane.b32.xlu0 %v571_v0, %s590_s19  ;;  %88 = vrot.lane.b32.xlu1 %v572_v1, %s590_s19 }
  0x12   :  { %86 = vrot.lane.b32.xlu0 %v571_v0, %s591_s20  ;;  %84 = vrot.lane.b32.xlu1 %v572_v1, %s591_s20 }
  0x16   :  { %82 = vrot.lane.b32.xlu0 %v571_v0, %s592_s21  ;;  %80 = vrot.lane.b32.xlu1 %v572_v1, %s592_s21 }
  0x1a   :  { %39 = vrot.lane.b32.xlu0 %v624_v2, %s587_s16 }
  0x1e   :  { %37 = vrot.lane.b32.xlu0 %v630_v3, %s587_s16 }
  0x22   :  { %35 = vrot.lane.b32.xlu0 %v624_v2, %s588_s17 }
  0x26   :  { %33 = vrot.lane.b32.xlu0 %v630_v3, %s588_s17 }
  0x2a   :  { %31 = vrot.lane.b32.xlu0 %v624_v2, %s589_s18 }
  0x2e   :  { %29 = vrot.lane.b32.xlu0 %v630_v3, %s589_s18 }
  0x32   :  { %94 = vrot.lane.b32.xlu0 %v571_v0, %s593_s26  ;;  %v583_v0 = vld [vmem:[%s922_s1 + $0x34] ss:$8 sps:$4 sm:$0xff]  }
  0x36   :  { %51 = vrot.lane.b32.xlu0 %v624_v2, %s590_s19 }
  0x3a   :  { %49 = vrot.lane.b32.xlu0 %v630_v3, %s590_s19 }
  0x3e   :  { %47 = vrot.lane.b32.xlu0 %v624_v2, %s591_s20 }
  0x42   :  { %45 = vrot.lane.b32.xlu0 %v630_v3, %s591_s20 }
  0x46   :  { %43 = vrot.lane.b32.xlu0 %v624_v2, %s592_s21 }
  0x4a   :  { %41 = vrot.lane.b32.xlu0 %v630_v3, %s592_s21 }
  0x4e   :  { %183 = vperm.xlu0 %569, %v177_v21  }
  0x74   :  { %v79_v5 = vpop.permute.xlu0 %78  ;;  %v75_v7 = vpop.permute.xlu1 %74 }
  0x75   :  { %106 = vrot.lane.b32.xlu1 %v79_v5, %s593_s26 }
  0x78   :  { %v77_v6 = vpop.permute.xlu0 %76  ;;  %v73_v8 = vpop.permute.xlu1 %72 }
  0x79   :  { %104 = vrot.lane.b32.xlu1 %v77_v6, %s593_s26 }
  0x7c   :  { %v71_v9 = vpop.permute.xlu0 %70  ;;  %v69_v10 = vpop.permute.xlu1 %68 }
  0x7d   :  { %102 = vrot.lane.b32.xlu1 %v75_v7, %s593_s26 }
  0x80   :  { %v91_v11 = vpop.permute.xlu0 %90  ;;  %v89_v12 = vpop.permute.xlu1 %88 }
  0x81   :  { %100 = vrot.lane.b32.xlu1 %v73_v8, %s593_s26 }
  0x84   :  { %v87_v13 = vpop.permute.xlu0 %86  ;;  %v85_v14 = vpop.permute.xlu1 %84 }
  0x85   :  { %98 = vrot.lane.b32.xlu1 %v71_v9, %s593_s26 }
  0x88   :  { %v83_v15 = vpop.permute.xlu0 %82  ;;  %v81_v18 = vpop.permute.xlu1 %80 }
  0x89   :  { %96 = vrot.lane.b32.xlu1 %v69_v10, %s593_s26 }
  0x8c   :  { %v40_v19 = vpop.permute.xlu0 %39 }
  0x8d   :  { %92 = vrot.lane.b32.xlu1 %v572_v1, %s593_s26  ;;  %v585_v1 = vld [vmem:[%s922_s1 + $0x20] ss:$8 sps:$4 sm:$0xff]  }
  0x90   :  { %v38_v20 = vpop.permute.xlu0 %37 }
  0x91   :  { %118 = vrot.lane.b32.xlu1 %v91_v11, %s593_s26 }
  0x94   :  { %v36_v23 = vpop.permute.xlu0 %35 }
  0x95   :  { %116 = vrot.lane.b32.xlu1 %v89_v12, %s593_s26 }
  0x98   :  { %v34_v24 = vpop.permute.xlu0 %33 }
  0x99   :  { %114 = vrot.lane.b32.xlu1 %v87_v13, %s593_s26 }
  0x9c   :  { %v32_v27 = vpop.permute.xlu0 %31 }
  0x9d   :  { %112 = vrot.lane.b32.xlu1 %v85_v14, %s593_s26 }
  0xa0   :  { %v30_v31 = vpop.permute.xlu0 %29 }
  0xa1   :  { %110 = vrot.lane.b32.xlu1 %v83_v15, %s593_s26 }
  0xa4   :  { %v95_v35 = vpop.permute.xlu0 %94 }
  0xa5   :  { %108 = vrot.lane.b32.xlu1 %v81_v18, %s593_s26  ;;  %v717_v41 = vsel %vm120_vm1, %v624_v2, %v95_v35  ;;  %v586_v2 = vld [vmem:[%s922_s1 + $0x30] ss:$8 sps:$4 sm:$0xff]  }
  0xa8   :  { %v52_v38 = vpop.permute.xlu0 %51 }
  0xa9   :  { %188 = vperm.xlu1 %570, %v178_v22  }
  0xac   :  { %v50_v43 = vpop.permute.xlu0 %49 }
  0xb0   :  { %v48_v46 = vpop.permute.xlu0 %47 }
  0xb4   :  { %v46_v51 = vpop.permute.xlu0 %45 }
  0xb8   :  { %v44_v54 = vpop.permute.xlu0 %43 }
  0xbc   :  { %v42_v59 = vpop.permute.xlu0 %41 }
  0xe7   :  { %v107_v25 = vpop.permute.xlu1 %106 }
  0xe8   :  { %v676_v26 = vsel %vm120_vm1, %v40_v19, %v107_v25 }
  0xe9   :  { %205 = vmatpush1.bf16.msra.mxu0 %v676_v26  ;;  %283 = vmatpush1.bf16.msra.mxu1 %v676_v26 }
  0xea   :  { %206 = vmatprep.subr.bf16.mxu0 %v594_v4  ;;  %284 = vmatprep.subr.bf16.mxu1 %v594_v4 }
  0xeb   :  { %v105_v28 = vpop.permute.xlu1 %104 }
  0xec   :  { %v683_v29 = vsel %vm120_vm1, %v38_v20, %v105_v28 }
  0xed   :  { %207 = vmatpush1.bf16.msra.mxu0 %v683_v29  ;;  %285 = vmatpush1.bf16.msra.mxu1 %v683_v29 }
  0xee   :  { %208 = vmatprep.subr.bf16.mxu0 %v594_v4  ;;  %286 = vmatprep.subr.bf16.mxu1 %v594_v4 }
  0xef   :  { %v103_v30 = vpop.permute.xlu1 %102 }
  0xf0   :  { %v690_v32 = vsel %vm120_vm1, %v36_v23, %v103_v30 }
  0xf1   :  { %209 = vmatpush1.bf16.msra.mxu0 %v690_v32  ;;  %287 = vmatpush1.bf16.msra.mxu1 %v690_v32 }
  0xf2   :  { %210 = vmatprep.subr.bf16.mxu0 %v594_v4  ;;  %288 = vmatprep.subr.bf16.mxu1 %v594_v4 }
  0xf3   :  { %v101_v33 = vpop.permute.xlu1 %100 }
  0xf4   :  { %v697_v34 = vsel %vm120_vm1, %v34_v24, %v101_v33 }
  0xf5   :  { %211 = vmatpush1.bf16.msra.mxu0 %v697_v34  ;;  %289 = vmatpush1.bf16.msra.mxu1 %v697_v34 }
  0xf6   :  { %212 = vmatprep.subr.bf16.mxu0 %v594_v4  ;;  %290 = vmatprep.subr.bf16.mxu1 %v594_v4 }
  0xf7   :  { %v99_v36 = vpop.permute.xlu1 %98 }
  0xf8   :  { %v704_v37 = vsel %vm120_vm1, %v32_v27, %v99_v36 }
  0xf9   :  { %213 = vmatpush1.bf16.msra.mxu0 %v704_v37  ;;  %291 = vmatpush1.bf16.msra.mxu1 %v704_v37 }
  0xfa   :  { %214 = vmatprep.subr.bf16.mxu0 %v594_v4  ;;  %292 = vmatprep.subr.bf16.mxu1 %v594_v4 }
  0xfb   :  { %v97_v39 = vpop.permute.xlu1 %96 }
  0xfc   :  { %v711_v40 = vsel %vm120_vm1, %v30_v31, %v97_v39 }
  0xfd   :  { %215 = vmatpush1.bf16.msra.mxu0 %v711_v40  ;;  %293 = vmatpush1.bf16.msra.mxu1 %v711_v40 }
  0xfe   :  { %216 = vmatprep.subr.bf16.mxu0 %v594_v4  ;;  %294 = vmatprep.subr.bf16.mxu1 %v594_v4 }
  0xff   :  { %v93_v42 = vpop.permute.xlu1 %92 }
 0x100   :  { %v725_v44 = vsel %vm120_vm1, %v630_v3, %v93_v42  ;;  %v184_v3 = vpop.permute.xlu0 %183 }
 0x101   :  { %217 = vmatpush1.bf16.msra.mxu0 %v717_v41  ;;  %295 = vmatpush1.bf16.msra.mxu1 %v717_v41 }
 0x102   :  { %218 = vmatprep.subr.bf16.mxu0 %v594_v4  ;;  %296 = vmatprep.subr.bf16.mxu1 %v594_v4 }
 0x103   :  { %v119_v45 = vpop.permute.xlu1 %118 }
 0x104   :  { %v732_v47 = vsel %vm120_vm1, %v52_v38, %v119_v45 }
 0x105   :  { %219 = vmatpush1.bf16.msra.mxu0 %v725_v44  ;;  %297 = vmatpush1.bf16.msra.mxu1 %v725_v44 }
 0x106   :  { %224 = vmatprep.subr.bf16.mxu0 %v594_v4  ;;  %302 = vmatprep.subr.bf16.mxu1 %v594_v4 }
 0x107   :  { %v117_v48 = vpop.permute.xlu1 %116 }
 0x108   :  { %v739_v49 = vsel %vm120_vm1, %v50_v43, %v117_v48 }
 0x109   :  { %225 = vmatpush2.bf16.msra.mxu0 %v732_v47  ;;  %303 = vmatpush2.bf16.msra.mxu1 %v732_v47 }
 0x10a   :  { %226 = vmatprep.subr.bf16.mxu0 %v594_v4  ;;  %304 = vmatprep.subr.bf16.mxu1 %v594_v4 }
 0x10b   :  { %v115_v50 = vpop.permute.xlu1 %114 }
 0x10c   :  { %v746_v52 = vsel %vm120_vm1, %v48_v46, %v115_v50 }
 0x10d   :  { %227 = vmatpush2.bf16.msra.mxu0 %v739_v49  ;;  %305 = vmatpush2.bf16.msra.mxu1 %v739_v49 }
 0x10e   :  { %228 = vmatprep.subr.bf16.mxu0 %v594_v4  ;;  %306 = vmatprep.subr.bf16.mxu1 %v594_v4 }
 0x10f   :  { %v113_v53 = vpop.permute.xlu1 %112 }
 0x110   :  { %v753_v55 = vsel %vm120_vm1, %v46_v51, %v113_v53 }
 0x111   :  { %229 = vmatpush2.bf16.msra.mxu0 %v746_v52  ;;  %307 = vmatpush2.bf16.msra.mxu1 %v746_v52 }
 0x112   :  { %230 = vmatprep.subr.bf16.mxu0 %v594_v4  ;;  %308 = vmatprep.subr.bf16.mxu1 %v594_v4 }
 0x113   :  { %v111_v56 = vpop.permute.xlu1 %110 }
 0x114   :  { %v760_v57 = vsel %vm120_vm1, %v44_v54, %v111_v56 }
 0x115   :  { %231 = vmatpush2.bf16.msra.mxu0 %v753_v55  ;;  %309 = vmatpush2.bf16.msra.mxu1 %v753_v55 }
 0x116   :  { %232 = vmatprep.subr.bf16.mxu0 %v594_v4  ;;  %310 = vmatprep.subr.bf16.mxu1 %v594_v4 }
 0x117   :  { %v109_v58 = vpop.permute.xlu1 %108 }
 0x118   :  { %v767_v60 = vsel %vm120_vm1, %v42_v59, %v109_v58 }
 0x119   :  { %233 = vmatpush2.bf16.msra.mxu0 %v760_v57  ;;  %311 = vmatpush2.bf16.msra.mxu1 %v760_v57 }
 0x11a   :  { %234 = vmatprep.subr.bf16.mxu0 %v594_v4  ;;  %312 = vmatprep.subr.bf16.mxu1 %v594_v4 }
 0x11d   :  { %235 = vmatpush2.bf16.msra.mxu0 %v767_v60  ;;  %313 = vmatpush2.bf16.msra.mxu1 %v767_v60 }
 0x11e   :  { %360 = vmatprep.subr.bf16.mxu0 %v594_v4  ;;  %438 = vmatprep.subr.bf16.mxu1 %v594_v4 }
 0x120   :  { %237 = vmatmul.mubr.bf16.vlgmr.msra.gmra.mxu0 %v575_v61  ;;  %315 = vmatmul.mubr.bf16.vlgmr.msra.gmra.mxu1 %v578_v62 }
 0x121   :  { %361 = vmatpush1.bf16.msra.mxu0 %v676_v26  ;;  %439 = vmatpush1.bf16.msra.mxu1 %v676_v26 }
 0x122   :  { %362 = vmatprep.subr.bf16.mxu0 %v594_v4  ;;  %440 = vmatprep.subr.bf16.mxu1 %v594_v4 }
 0x123   :  { %535 = vmatprep.mubr.msk.bf16.mxu0 %vm200_vm0, %v581_v63  ;;  %546 = vmatprep.mubr.msk.bf16.mxu1 %vm200_vm0, %v583_v0 }
 0x124   :  { %v189_v7 = vpop.permute.xlu1 %188 }
 0x125   :  { %363 = vmatpush1.bf16.msra.mxu0 %v683_v29  ;;  %441 = vmatpush1.bf16.msra.mxu1 %v683_v29 }
 0x126   :  { %364 = vmatprep.subr.bf16.mxu0 %v594_v4  ;;  %442 = vmatprep.subr.bf16.mxu1 %v594_v4 }
 0x129   :  { %365 = vmatpush1.bf16.msra.mxu0 %v690_v32  ;;  %443 = vmatpush1.bf16.msra.mxu1 %v690_v32 }
 0x12a   :  { %366 = vmatprep.subr.bf16.mxu0 %v594_v4  ;;  %444 = vmatprep.subr.bf16.mxu1 %v594_v4 }
 0x12d   :  { %367 = vmatpush1.bf16.msra.mxu0 %v697_v34  ;;  %445 = vmatpush1.bf16.msra.mxu1 %v697_v34 }
 0x12e   :  { %368 = vmatprep.subr.bf16.mxu0 %v594_v4  ;;  %446 = vmatprep.subr.bf16.mxu1 %v594_v4 }
 0x131   :  { %369 = vmatpush1.bf16.msra.mxu0 %v704_v37  ;;  %447 = vmatpush1.bf16.msra.mxu1 %v704_v37 }
 0x132   :  { %370 = vmatprep.subr.bf16.mxu0 %v594_v4  ;;  %448 = vmatprep.subr.bf16.mxu1 %v594_v4 }
 0x135   :  { %371 = vmatpush1.bf16.msra.mxu0 %v711_v40  ;;  %449 = vmatpush1.bf16.msra.mxu1 %v711_v40 }
 0x136   :  { %372 = vmatprep.subr.bf16.mxu0 %v594_v4  ;;  %450 = vmatprep.subr.bf16.mxu1 %v594_v4 }
 0x139   :  { %373 = vmatpush1.bf16.msra.mxu0 %v717_v41  ;;  %451 = vmatpush1.bf16.msra.mxu1 %v717_v41 }
 0x13a   :  { %374 = vmatprep.subr.bf16.mxu0 %v594_v4  ;;  %452 = vmatprep.subr.bf16.mxu1 %v594_v4 }
 0x13d   :  { %375 = vmatpush1.bf16.msra.mxu0 %v725_v44  ;;  %453 = vmatpush1.bf16.msra.mxu1 %v725_v44 }
 0x13e   :  { %380 = vmatprep.subr.bf16.mxu0 %v594_v4  ;;  %458 = vmatprep.subr.bf16.mxu1 %v594_v4 }
 0x141   :  { %381 = vmatpush2.bf16.msra.mxu0 %v732_v47  ;;  %459 = vmatpush2.bf16.msra.mxu1 %v732_v47 }
 0x142   :  { %382 = vmatprep.subr.bf16.mxu0 %v594_v4  ;;  %460 = vmatprep.subr.bf16.mxu1 %v594_v4 }
 0x145   :  { %383 = vmatpush2.bf16.msra.mxu0 %v739_v49  ;;  %461 = vmatpush2.bf16.msra.mxu1 %v739_v49 }
 0x146   :  { %384 = vmatprep.subr.bf16.mxu0 %v594_v4  ;;  %462 = vmatprep.subr.bf16.mxu1 %v594_v4 }
 0x149   :  { %385 = vmatpush2.bf16.msra.mxu0 %v746_v52  ;;  %463 = vmatpush2.bf16.msra.mxu1 %v746_v52 }
 0x14a   :  { %386 = vmatprep.subr.bf16.mxu0 %v594_v4  ;;  %464 = vmatprep.subr.bf16.mxu1 %v594_v4 }
 0x14d   :  { %387 = vmatpush2.bf16.msra.mxu0 %v753_v55  ;;  %465 = vmatpush2.bf16.msra.mxu1 %v753_v55 }
 0x14e   :  { %388 = vmatprep.subr.bf16.mxu0 %v594_v4  ;;  %466 = vmatprep.subr.bf16.mxu1 %v594_v4 }
 0x151   :  { %389 = vmatpush2.bf16.msra.mxu0 %v760_v57  ;;  %467 = vmatpush2.bf16.msra.mxu1 %v760_v57 }
 0x152   :  { %390 = vmatprep.subr.bf16.mxu0 %v594_v4  ;;  %468 = vmatprep.subr.bf16.mxu1 %v594_v4 }
 0x155   :  { %391 = vmatpush2.bf16.msra.mxu0 %v767_v60  ;;  %469 = vmatpush2.bf16.msra.mxu1 %v767_v60 }
 0x158   :  { %393 = vmatmul.mubr.bf16.vlgmr.msra.gmra.mxu0 %v585_v1  ;;  %471 = vmatmul.mubr.bf16.vlgmr.msra.gmra.mxu1 %v586_v2 }
 0x1e0   :  { %v238_v5 = vpop.f32.mrf.mxu0  ;;  %v316_v6 = vpop.f32.mrf.mxu1 }
 0x1e1   :  { %v239_v8 = vadd.f32 %v238_v5, %v184_v3  ;;  %v317_v4 = vadd.f32 %v316_v6, %v184_v3 }
 0x1e2   :  { %v240_v9 = vpop.f32.mrf.mxu0  ;;  %v318_v10 = vpop.f32.mrf.mxu1 }
 0x1e3   :  { %v245_v11 = vmax.f32 %v239_v8, 0.0  ;;  %v323_v12 = vmax.f32 %v317_v4, 0.0 }
 0x1e4   :  { %v241_v13 = vpop.f32.mrf.mxu0  ;;  %v319_v14 = vpop.f32.mrf.mxu1 }
 0x1e5   :  { %v242_v15 = vadd.f32 %v241_v13, %v189_v7  ;;  %v320_v16 = vadd.f32 %v319_v14, %v189_v7  ;;  %v553_v17 = vpack.c.bf16 %v245_v11, %v245_v11  ;;  %v555_v18 = vpack.c.bf16 %v323_v12, %v323_v12 }
 0x1e6   :  { %v243_v19 = vpop.f32.mrf.mxu0  ;;  %v321_v20 = vpop.f32.mrf.mxu1 }
 0x1e7   :  { %v246_v21 = vmax.f32 %v242_v15, 0.0  ;;  %v324_v22 = vmax.f32 %v320_v16, 0.0  ;;  %258 = vrot.lane.b32.xlu1 %v553_v17, %s593_s26  ;;  %256 = vst.msk [vmem:[%s924_s3] sm:$0xf] %vm255_vm2, %v553_v17  ;;  %527 = vst.msk [vmem:[%s924_s3 + $0x8] sm:$0xf] %vm255_vm2, %v555_v18 }
 0x1e9   :  { %v554_v23 = vpack.c.bf16 %v246_v21, %v246_v21  ;;  %v556_v24 = vpack.c.bf16 %v324_v22, %v324_v22 }
 0x1eb   :  { %257 = vst.msk [vmem:[%s924_s3 + $0x4] sm:$0xf] %vm255_vm2, %v554_v23  ;;  %528 = vst.msk [vmem:[%s924_s3 + $0xc] sm:$0xf] %vm255_vm2, %v556_v24  ;;  %260 = vrot.lane.b32.xlu0 %v554_v23, %s593_s26  ;;  %336 = vrot.lane.b32.xlu1 %v555_v18, %s593_s26 }
 0x1ef   :  { %338 = vrot.lane.b32.xlu0 %v556_v24, %s593_s26 }
 0x218   :  { %v394_v25 = vpop.f32.mrf.mxu0  ;;  %v472_v26 = vpop.f32.mrf.mxu1 }
 0x219   :  { %v395_v27 = vadd.f32 %v394_v25, %v184_v3  ;;  %v473_v28 = vadd.f32 %v472_v26, %v184_v3 }
 0x21a   :  { %v396_v29 = vpop.f32.mrf.mxu0  ;;  %v474_v30 = vpop.f32.mrf.mxu1 }
 0x21b   :  { %v401_v31 = vmax.f32 %v395_v27, 0.0  ;;  %v479_v32 = vmax.f32 %v473_v28, 0.0 }
 0x21c   :  { %v397_v33 = vpop.f32.mrf.mxu0  ;;  %v475_v34 = vpop.f32.mrf.mxu1 }
 0x21d   :  { %v557_v35 = vpack.c.bf16 %v401_v31, %v401_v31  ;;  %v559_v36 = vpack.c.bf16 %v479_v32, %v479_v32  ;;  %v398_v37 = vadd.f32 %v397_v33, %v189_v7  ;;  %v476_v38 = vadd.f32 %v475_v34, %v189_v7 }
 0x21e   :  { %v399_v39 = vpop.f32.mrf.mxu0  ;;  %v477_v40 = vpop.f32.mrf.mxu1 }
 0x21f   :  { %538 = vst.msk [vmem:[%s924_s3 + $0x10] sm:$0xf] %vm255_vm2, %v557_v35  ;;  %549 = vst.msk [vmem:[%s924_s3 + $0x18] sm:$0xf] %vm255_vm2, %v559_v36  ;;  %v402_v41 = vmax.f32 %v398_v37, 0.0  ;;  %v480_v42 = vmax.f32 %v476_v38, 0.0  ;;  %414 = vrot.lane.b32.xlu1 %v557_v35, %s593_s26 }
 0x221   :  { %v558_v43 = vpack.c.bf16 %v402_v41, %v402_v41  ;;  %v560_v44 = vpack.c.bf16 %v480_v42, %v480_v42 }
 0x223   :  { %539 = vst.msk [vmem:[%s924_s3 + $0x14] sm:$0xf] %vm255_vm2, %v558_v43  ;;  %550 = vst.msk [vmem:[%s924_s3 + $0x1c] sm:$0xf] %vm255_vm2, %v560_v44  ;;  %416 = vrot.lane.b32.xlu0 %v558_v43, %s593_s26  ;;  %492 = vrot.lane.b32.xlu1 %v559_v36, %s593_s26 }
 0x227   :  { %494 = vrot.lane.b32.xlu0 %v560_v44, %s593_s26 }
 0x259   :  { %v259_v45 = vpop.permute.xlu1 %258 }
 0x25a   :  { %518 = vst.msk [vmem:[%s924_s3 + $0x20] sm:$0xf] %vm255_vm2, %v259_v45 }
 0x25d   :  { %v261_v46 = vpop.permute.xlu0 %260  ;;  %v337_v47 = vpop.permute.xlu1 %336 }
 0x25e   :  { %519 = vst.msk [vmem:[%s924_s3 + $0x24] sm:$0xf] %vm255_vm2, %v261_v46  ;;  %529 = vst.msk [vmem:[%s924_s3 + $0x28] sm:$0xf] %vm255_vm2, %v337_v47 }
 0x261   :  { %v339_v48 = vpop.permute.xlu0 %338 }
 0x262   :  { %530 = vst.msk [vmem:[%s924_s3 + $0x2c] sm:$0xf] %vm255_vm2, %v339_v48 }
 0x291   :  { %v415_v49 = vpop.permute.xlu1 %414 }
 0x292   :  { %540 = vst.msk [vmem:[%s924_s3 + $0x30] sm:$0xf] %vm255_vm2, %v415_v49 }
 0x295   :  { %v417_v50 = vpop.permute.xlu0 %416  ;;  %v493_v51 = vpop.permute.xlu1 %492 }
 0x296   :  { %541 = vst.msk [vmem:[%s924_s3 + $0x34] sm:$0xf] %vm255_vm2, %v417_v50  ;;  %551 = vst.msk [vmem:[%s924_s3 + $0x38] sm:$0xf] %vm255_vm2, %v493_v51 }
 0x299   :  { %v495_v52 = vpop.permute.xlu0 %494 }
 0x29a   :  { %552 = vst.msk [vmem:[%s924_s3 + $0x3c] sm:$0xf] %vm255_vm2, %v495_v52 }

// kernel: wavegan_forward.10
= control target key start
LH: loop header
LB: loop body
LE: loop exit
PB: predicated region body
PF: predicated region fallthrough
CT: control target
= control target key end

     0   :  { %s827_s12 = smov 0   ;;  %s829_s13 = smov 0   ;;  %s924_s0 = inlined_call_operand.vmem [shape: bf16[2,16,384], index: 0, kind: input, shape index: {}]   ;;  %s925_s1 = inlined_call_operand.vmem [shape: bf16[4,8,112], index: 1, kind: input, shape index: {}]   ;;  %s926_s2 = inlined_call_operand.vmem [shape: f32[8,1], index: 2, kind: input, shape index: {}]   ;;  %s927_s3 = inlined_call_operand.vmem [shape: bf16[2,4,8,256], index: 3, kind: output, shape index: {}]  }
   0x1   :  { %s831_s14 = smov 0  }
   0x2 LB: > { %s28_s15 = sadd.s32 1, %s794_s13  ;;  %p711_p0 = scmp.ge.s32.totalorder %s798_s14, 1  ;;  %s798_s14 = sphi %s831_s14, %s13_s14   ;;  %s794_s13 = sphi %s829_s13, %s929_s13   ;;  %s790_s12 = sphi %s827_s12, %s928_s12  }
   0x3   : > { %p30_p1 = scmp.ge.s32.totalorder %s28_s15, 2  ;;  %p178_p2 = scmp.lt.s32.totalorder %s798_s14, 3 }
   0x5   : > { %s931_s15 = smov (%p30_p1, %s28_s15), 0  ;;  %p179_p3 = pnand %p711_p0, %p178_p2 }
   0x6   : > { %p218_p4 = scmp.lt.s32.totalorder (!%p179_p3), %s790_s12, 1  ;;  %s800_s20 = smov (!%p179_p3), 122  }
   0x7   : > { %182 = sbr.rel (%p179_p3) target bundleno = 403 (0x193), region = 32  ;;  %s801_s21 = smov (!%p179_p3), 123  }
   0x8   : > { %s802_s22 = smov (!%p179_p3), 124   ;;  %s803_s23 = smov (!%p179_p3), 125  }
   0x9   : > { %s804_s24 = smov (!%p179_p3), 126   ;;  %s806_s25 = smov (!%p179_p3), 127  }
   0xc   : > { %s933_s12 = smov (!%p218_p4, %s790_s12), 1  ;;  %v805_v3 = vmov 0   ;;  %v336_v4 = vld [vmem:[%s926_s2] sm:$0xff]  ;;  %vm331_vm0 = vcmask 998400   ;;  %vm320_vm1 = vcmask 1006592   ;;  %vm309_vm2 = vcmask 1014784  }
   0xd   : > { %s739_s16 = smul.u32 24, %s933_s12  ;;  %379 = vmatprep.mubr.bf16.mxu0 %v805_v3  ;;  %436 = vmatprep.mubr.bf16.mxu1 %v805_v3  ;;  %vm298_vm3 = vcmask 1022976   ;;  %vm287_vm4 = vcmask 1031168   ;;  %vm276_vm5 = vcmask 1039360   ;;  %v337_v35 = vld [vmem:[%s925_s1] sm:$0xf] }
   0xe   : > { %771 = vset.pattern.permute.xlu0 %v805_v3  ;;  %vm343_vm6 = vcmask 916480   ;;  %v720_v36 = vld [vmem:[%s925_s1 + $0x4] sm:$0xf]  ;;  %v724_v37 = vld [vmem:[%s925_s1 + $0x8] sm:$0xf]  ;;  %s734_s9 = sshll.u32 %s933_s12, 5 }
   0xf   : > { %s222_s19 = scalar_lea.vmem %s924_s0, %s739_s16  ;;  %v728_v38 = vld [vmem:[%s925_s1 + $0xc] sm:$0xf]  ;;  %s243_s16 = scalar_lea.vmem %s927_s3, %s734_s9 }
  0x10   : > { %v851_v0 = vld [vmem:[%s222_s19 + $0x4] ss:$12 sps:$4 sm:$0xff]   ;;  %v853_v1 = vld [vmem:[%s222_s19] ss:$12 sps:$4 sm:$0xff]   ;;  %v775_v2 = vld [vmem:[%s222_s19 + $0x8] ss:$12 sps:$4 sm:$0xff]  }
  0x11   : > { %327 = vrot.lane.b32.xlu0 %v851_v0, %s800_s20  ;;  %325 = vrot.lane.b32.xlu1 %v853_v1, %s800_s20 }
  0x15   : > { %329 = vrot.lane.b32.xlu0 %v775_v2, %s800_s20  ;;  %316 = vrot.lane.b32.xlu1 %v851_v0, %s801_s21 }
  0x19   : > { %318 = vrot.lane.b32.xlu0 %v775_v2, %s801_s21  ;;  %314 = vrot.lane.b32.xlu1 %v853_v1, %s801_s21 }
  0x1d   : > { %305 = vrot.lane.b32.xlu0 %v851_v0, %s802_s22  ;;  %307 = vrot.lane.b32.xlu1 %v775_v2, %s802_s22 }
  0x21   : > { %303 = vrot.lane.b32.xlu0 %v853_v1, %s802_s22  ;;  %294 = vrot.lane.b32.xlu1 %v851_v0, %s803_s23 }
  0x25   : > { %296 = vrot.lane.b32.xlu0 %v775_v2, %s803_s23  ;;  %292 = vrot.lane.b32.xlu1 %v853_v1, %s803_s23 }
  0x29   : > { %283 = vrot.lane.b32.xlu0 %v851_v0, %s804_s24  ;;  %285 = vrot.lane.b32.xlu1 %v775_v2, %s804_s24 }
  0x2d   : > { %281 = vrot.lane.b32.xlu0 %v853_v1, %s804_s24  ;;  %272 = vrot.lane.b32.xlu1 %v851_v0, %s806_s25 }
  0x31   : > { %274 = vrot.lane.b32.xlu0 %v775_v2, %s806_s25  ;;  %270 = vrot.lane.b32.xlu1 %v853_v1, %s806_s25 }
  0x35   : > { %340 = vperm.xlu0 %771, %v336_v4  }
  0x83   : > { %v328_v5 = vpop.permute.xlu0 %327  ;;  %v326_v6 = vpop.permute.xlu1 %325 }
  0x84   : > { %v875_v10 = vsel %vm331_vm0, %v326_v6, %v328_v5 }
  0x87   : > { %v330_v7 = vpop.permute.xlu0 %329  ;;  %v317_v9 = vpop.permute.xlu1 %316 }
  0x88   : > { %v873_v8 = vsel %vm331_vm0, %v328_v5, %v330_v7 }
  0x89   : > { %349 = vmatprep.subr.bf16.mxu0 %v873_v8  ;;  %406 = vmatprep.subr.bf16.mxu1 %v873_v8 }
  0x8a   : > { %350 = vmatpush1.bf16.msra.mxu0 %v875_v10  ;;  %407 = vmatpush1.bf16.msra.mxu1 %v875_v10 }
  0x8b   : > { %v319_v11 = vpop.permute.xlu0 %318  ;;  %v315_v13 = vpop.permute.xlu1 %314 }
  0x8c   : > { %v322_v12 = vsel %vm320_vm1, %v317_v9, %v319_v11  ;;  %v321_v14 = vsel %vm320_vm1, %v315_v13, %v317_v9 }
  0x8d   : > { %351 = vmatprep.subr.bf16.mxu0 %v322_v12  ;;  %408 = vmatprep.subr.bf16.mxu1 %v322_v12 }
  0x8e   : > { %352 = vmatpush1.bf16.msra.mxu0 %v321_v14  ;;  %409 = vmatpush1.bf16.msra.mxu1 %v321_v14 }
  0x8f   : > { %v306_v15 = vpop.permute.xlu0 %305  ;;  %v308_v16 = vpop.permute.xlu1 %307 }
  0x90   : > { %v311_v17 = vsel %vm309_vm2, %v306_v15, %v308_v16 }
  0x91   : > { %353 = vmatprep.subr.bf16.mxu0 %v311_v17  ;;  %410 = vmatprep.subr.bf16.mxu1 %v311_v17 }
  0x93   : > { %v304_v18 = vpop.permute.xlu0 %303  ;;  %v295_v20 = vpop.permute.xlu1 %294 }
  0x94   : > { %v310_v19 = vsel %vm309_vm2, %v304_v18, %v306_v15 }
  0x95   : > { %354 = vmatpush1.bf16.msra.mxu0 %v310_v19  ;;  %411 = vmatpush1.bf16.msra.mxu1 %v310_v19 }
  0x97   : > { %v297_v21 = vpop.permute.xlu0 %296  ;;  %v293_v23 = vpop.permute.xlu1 %292 }
  0x98   : > { %v300_v22 = vsel %vm298_vm3, %v295_v20, %v297_v21  ;;  %v299_v24 = vsel %vm298_vm3, %v293_v23, %v295_v20 }
  0x99   : > { %355 = vmatprep.subr.bf16.mxu0 %v300_v22  ;;  %412 = vmatprep.subr.bf16.mxu1 %v300_v22 }
  0x9a   : > { %356 = vmatpush1.bf16.msra.mxu0 %v299_v24  ;;  %413 = vmatpush1.bf16.msra.mxu1 %v299_v24 }
  0x9b   : > { %v284_v25 = vpop.permute.xlu0 %283  ;;  %v286_v26 = vpop.permute.xlu1 %285 }
  0x9c   : > { %v289_v27 = vsel %vm287_vm4, %v284_v25, %v286_v26 }
  0x9d   : > { %357 = vmatprep.subr.bf16.mxu0 %v289_v27  ;;  %414 = vmatprep.subr.bf16.mxu1 %v289_v27 }
  0x9f   : > { %v282_v28 = vpop.permute.xlu0 %281  ;;  %v273_v30 = vpop.permute.xlu1 %272 }
  0xa0   : > { %v288_v29 = vsel %vm287_vm4, %v282_v28, %v284_v25 }
  0xa1   : > { %358 = vmatpush1.bf16.msra.mxu0 %v288_v29  ;;  %415 = vmatpush1.bf16.msra.mxu1 %v288_v29 }
  0xa3   : > { %v275_v31 = vpop.permute.xlu0 %274  ;;  %v271_v33 = vpop.permute.xlu1 %270 }
  0xa4   : > { %v278_v32 = vsel %vm276_vm5, %v273_v30, %v275_v31  ;;  %v277_v34 = vsel %vm276_vm5, %v271_v33, %v273_v30 }
  0xa5   : > { %359 = vmatprep.subr.bf16.mxu0 %v278_v32  ;;  %416 = vmatprep.subr.bf16.mxu1 %v278_v32 }
  0xa6   : > { %360 = vmatpush1.bf16.msra.mxu0 %v277_v34  ;;  %417 = vmatpush1.bf16.msra.mxu1 %v277_v34 }
  0xa7   : > { %361 = vmatprep.subr.bf16.mxu0 %v851_v0  ;;  %418 = vmatprep.subr.bf16.mxu1 %v851_v0 }
  0xaa   : > { %362 = vmatpush1.bf16.msra.mxu0 %v853_v1  ;;  %419 = vmatpush1.bf16.msra.mxu1 %v853_v1 }
  0xab   : > { %464 = vmatprep.subr.bf16.mxu0 %v873_v8  ;;  %522 = vmatprep.subr.bf16.mxu1 %v873_v8 }
  0xad   : > { %718 = vmatmul.mubr.msk.bf16.vlgmr.msra.gmra.mxu0 %vm343_vm6, %v337_v35  ;;  %721 = vmatmul.mubr.msk.bf16.vlgmr.msra.gmra.mxu1 %vm343_vm6, %v720_v36 }
  0xae   : > { %465 = vmatpush1.bf16.msra.mxu0 %v875_v10  ;;  %523 = vmatpush1.bf16.msra.mxu1 %v875_v10 }
  0xaf   : > { %466 = vmatprep.subr.bf16.mxu0 %v322_v12  ;;  %524 = vmatprep.subr.bf16.mxu1 %v322_v12 }
  0xb0   : > { %494 = vmatprep.mubr.bf16.mxu0 %v805_v3  ;;  %552 = vmatprep.mubr.bf16.mxu1 %v805_v3  ;;  %v341_v39 = vpop.permute.xlu0 %340 }
  0xb2   : > { %467 = vmatpush1.bf16.msra.mxu0 %v321_v14  ;;  %525 = vmatpush1.bf16.msra.mxu1 %v321_v14 }
  0xb3   : > { %468 = vmatprep.subr.bf16.mxu0 %v311_v17  ;;  %526 = vmatprep.subr.bf16.mxu1 %v311_v17 }
  0xb6   : > { %469 = vmatpush1.bf16.msra.mxu0 %v310_v19  ;;  %527 = vmatpush1.bf16.msra.mxu1 %v310_v19 }
  0xb7   : > { %470 = vmatprep.subr.bf16.mxu0 %v300_v22  ;;  %528 = vmatprep.subr.bf16.mxu1 %v300_v22 }
  0xba   : > { %471 = vmatpush1.bf16.msra.mxu0 %v299_v24  ;;  %529 = vmatpush1.bf16.msra.mxu1 %v299_v24 }
  0xbb   : > { %472 = vmatprep.subr.bf16.mxu0 %v289_v27  ;;  %530 = vmatprep.subr.bf16.mxu1 %v289_v27 }
  0xbe   : > { %473 = vmatpush1.bf16.msra.mxu0 %v288_v29  ;;  %531 = vmatpush1.bf16.msra.mxu1 %v288_v29 }
  0xbf   : > { %474 = vmatprep.subr.bf16.mxu0 %v278_v32  ;;  %532 = vmatprep.subr.bf16.mxu1 %v278_v32 }
  0xc2   : > { %475 = vmatpush1.bf16.msra.mxu0 %v277_v34  ;;  %533 = vmatpush1.bf16.msra.mxu1 %v277_v34 }
  0xc3   : > { %476 = vmatprep.subr.bf16.mxu0 %v851_v0  ;;  %534 = vmatprep.subr.bf16.mxu1 %v851_v0 }
  0xc6   : > { %477 = vmatpush1.bf16.msra.mxu0 %v853_v1  ;;  %535 = vmatpush1.bf16.msra.mxu1 %v853_v1 }
  0xc9   : > { %725 = vmatmul.mubr.msk.bf16.vlgmr.msra.gmra.mxu0 %vm343_vm6, %v724_v37  ;;  %729 = vmatmul.mubr.msk.bf16.vlgmr.msra.gmra.mxu1 %vm343_vm6, %v728_v38 }
 0x16d   : > { %v381_v40 = vpop.f32.mrf.mxu0  ;;  %v438_v41 = vpop.f32.mrf.mxu1 }
 0x16e   : > { %v382_v42 = vadd.f32 %v381_v40, %v341_v39  ;;  %v439_v43 = vadd.f32 %v438_v41, %v341_v39 }
 0x16f   : > { %v383_v44 = vpop.f32.mrf.mxu0  ;;  %v440_v45 = vpop.f32.mrf.mxu1 }
 0x170   : > { %v384_v46 = vadd.f32 %v383_v44, %v341_v39  ;;  %v388_v47 = vmax.f32 %v382_v42, 0.0  ;;  %v441_v48 = vadd.f32 %v440_v45, %v341_v39  ;;  %v445_v49 = vmax.f32 %v439_v43, 0.0 }
 0x171   : > { %v385_v50 = vpop.f32.mrf.mxu0  ;;  %v442_v51 = vpop.f32.mrf.mxu1 }
 0x172   : > { %v389_v52 = vmax.f32 %v384_v46, 0.0  ;;  %v446_v53 = vmax.f32 %v441_v48, 0.0 }
 0x173   : > { %v386_v54 = vpop.f32.mrf.mxu0  ;;  %v443_v55 = vpop.f32.mrf.mxu1 }
 0x174   : > { %v735_v56 = vpack.c.bf16 %v389_v52, %v388_v47  ;;  %v736_v57 = vpack.c.bf16 %v446_v53, %v445_v49 }
 0x176   : > { %398 = vst [vmem:[%s243_s16] sm:$0xff] %v735_v56  ;;  %723 = vst [vmem:[%s243_s16 + $0x8] sm:$0xff] %v736_v57 }
 0x189   : > { %v496_v58 = vpop.f32.mrf.mxu0  ;;  %v554_v59 = vpop.f32.mrf.mxu1 }
 0x18a   : > { %v497_v60 = vadd.f32 %v496_v58, %v341_v39  ;;  %v555_v61 = vadd.f32 %v554_v59, %v341_v39 }
 0x18b   : > { %v498_v62 = vpop.f32.mrf.mxu0  ;;  %v556_v63 = vpop.f32.mrf.mxu1 }
 0x18c   : > { %v499_v0 = vadd.f32 %v498_v62, %v341_v39  ;;  %v557_v1 = vadd.f32 %v556_v63, %v341_v39  ;;  %v503_v4 = vmax.f32 %v497_v60, 0.0  ;;  %v561_v5 = vmax.f32 %v555_v61, 0.0 }
 0x18d   : > { %v500_v2 = vpop.f32.mrf.mxu0  ;;  %v558_v3 = vpop.f32.mrf.mxu1 }
 0x18e   : > { %v504_v6 = vmax.f32 %v499_v0, 0.0  ;;  %v562_v7 = vmax.f32 %v557_v1, 0.0 }
 0x18f   : > { %v501_v8 = vpop.f32.mrf.mxu0  ;;  %v559_v9 = vpop.f32.mrf.mxu1 }
 0x190   : > { %v737_v10 = vpack.c.bf16 %v504_v6, %v503_v4  ;;  %v738_v11 = vpack.c.bf16 %v562_v7, %v561_v5 }
 0x192   : > { %727 = vst [vmem:[%s243_s16 + $0x10] sm:$0xff] %v737_v10  ;;  %731 = vst [vmem:[%s243_s16 + $0x18] sm:$0xff] %v738_v11 }
 0x193 PF: > { %s13_s14 = sadd.s32 1, %s798_s14   ;;  %s928_s12 = smov %s794_s13 }
 0x194   : > { %p10_p5 = scmp.ge.s32.totalorder %s13_s14, 4   ;;  %s929_s13 = smov %s931_s15 }
 0x196   :  { %12 = sbr.rel (!%p10_p5) target bundleno = 2 (0x2), region = 75 }

// kernel: wavegan_forward.11
= control target key start
LH: loop header
LB: loop body
LE: loop exit
PB: predicated region body
PF: predicated region fallthrough
CT: control target
= control target key end

     0   :  { %s1245_s12 = smov 0   ;;  %s1247_s13 = smov 0   ;;  %s1579_s0 = inlined_call_operand.vmem [shape: bf16[2,8,1152], index: 0, kind: input, shape index: {}]   ;;  %s1580_s1 = inlined_call_operand.vmem [shape: bf16[4,4,56], index: 1, kind: input, shape index: {}]   ;;  %s1581_s2 = inlined_call_operand.vmem [shape: f32[4,1], index: 2, kind: input, shape index: {}]   ;;  %s1582_s3 = inlined_call_operand.vmem [shape: bf16[2,4,4,1024], index: 3, kind: output, shape index: {}]  }
   0x1   :  { %s1249_s14 = smov 0   ;;  %s1251_s15 = smov 0  }
   0x2   :  { %s1253_s16 = smov 0   ;;  %s1255_s17 = smov 0  }
   0x3   :  { %s1257_s18 = smov 0  }
   0x4 LB: > { %s25_s19 = sadd.s32 1, %s1207_s16  ;;  %s28_s20 = sadd.s32 1, %s1211_s17  ;;  %s1215_s18 = sphi %s1257_s18, %s13_s18   ;;  %s1211_s17 = sphi %s1255_s17, %s1589_s17   ;;  %s1207_s16 = sphi %s1253_s16, %s1588_s16   ;;  %s1203_s15 = sphi %s1251_s15, %s1587_s15   ;;  %s1199_s14 = sphi %s1249_s14, %s1586_s14   ;;  %s1195_s13 = sphi %s1247_s13, %s1585_s13   ;;  %s1191_s12 = sphi %s1245_s12, %s1584_s12  }
   0x5   : > { %p26_p0 = scmp.ge.s32.totalorder %s25_s19, 2  ;;  %s1038_s21 = sadd.s32 4294967295, %s1215_s18  }
   0x6   : > { %p131_p1 = scmp.ne.s32.totalorder %s1195_s13, %s1191_s12  ;;  %p132_p2 = scmp.eq.s32.totalorder %s1038_s21, 3 }
   0x7   : > { %s1591_s19 = smov (%p26_p0, %s25_s19), 0  ;;  %s1593_s20 = smov (!%p26_p0, %s28_s20), %s1211_s17 }
   0x8   : > { %s117_s22 = ssub.s32 %s1207_s16, %s1591_s19  ;;  %p30_p3 = scmp.ge.s32.totalorder %s1593_s20, 2 }
   0x9   : > { %p1044_p4 = scmp.ge.s32.totalorder %s1215_s18, 1  ;;  %p1291_p5 = por %p132_p2, %p131_p1 }
   0xa   : > { %p178_p6 = scmp.lt.s32.totalorder %s1215_s18, 5  ;;  %s1595_s20 = smov (%p30_p3, %s1593_s20), 0 }
   0xb   : > { %s114_s24 = ssub.s32 %s1211_s17, %s1595_s20  ;;  %s121_s26 = sadd.s32 1, %s1195_s13 }
   0xc   : > { %p179_p7 = pnand %p1044_p4, %p178_p6  ;;  %s118_s25 = sor.u32 %s117_s22, %s114_s24 }
   0xd   : > { %p119_p8 = scmp.eq.s32.totalorder %s118_s25, 0  ;;  %p209_p9 = scmp.lt.s32.totalorder (!%p179_p7), %s1203_s15, 1 }
   0xe   : > { %182 = sbr.rel (%p179_p7) target bundleno = 467 (0x1d3), region = 32  ;;  %s1047_s28 = sshll.u32 (!%p179_p7), %s1199_s14, 9 }
   0xf   : > { %s1302_s27 = scalar_select %p119_p8, %s1195_s13, %s121_s26  }
  0x10   : > { %s225_s29 = sshra.s32 (!%p179_p7), %s1047_s28, 7  ;;  %s1217_s10 = smov (!%p179_p7), 122  }
  0x11   : > { %s1048_s5 = sshll.u32 (!%p179_p7), %s225_s29, 2  ;;  %s1218_s11 = smov (!%p179_p7), 124  }
  0x12   : > { %s1219_s21 = smov (!%p179_p7), 123   ;;  %s1220_s22 = smov (!%p179_p7), 126  }
  0x13   : > { %s210_s30 = scalar_select %p209_p9, %s1203_s15, 1  ;;  %v1222_v7 = vmov 0   ;;  %v384_v8 = vld [vmem:[%s1581_s2] sm:$0xf]  ;;  %vm330_vm0 = vcmask 998400   ;;  %vm335_vm1 = vcmask 1043456  }
  0x14   : > { %s1221_s24 = smov 125   ;;  %439 = vmatprep.mubr.bf16.mxu0 %v1222_v7  ;;  %480 = vmatprep.mubr.bf16.mxu1 %v1222_v7  ;;  %s1223_s25 = smov 127   ;;  %vm300_vm2 = vcmask 1014784   ;;  %vm315_vm3 = vcmask 1006592   ;;  %vm270_vm4 = vcmask 1031168   ;;  %vm285_vm5 = vcmask 1022976  }
  0x15   : > { %s1090_s4 = smul.u32 36, %s210_s30  ;;  %1155 = vset.pattern.permute.xlu0 %v1222_v7  ;;  %vm255_vm6 = vcmask 1039360   ;;  %vm391_vm7 = vcmask 457728  }
  0x17   : > { %s213_s8 = scalar_lea.vmem %s1579_s0, %s1090_s4 }
  0x18   : > { %s228_s9 = scalar_lea.vmem %s213_s8, %s1048_s5 }
  0x19   : > { %v230_v0 = vld [vmem:[%s228_s9 + $0x8] sm:$0xff]  ;;  %v229_v1 = vld [vmem:[%s228_s9] sm:$0xff]  ;;  %v1160_v6 = vld [vmem:[%s228_s9 + $0x10] ss:$0 sps:$4 sm:$0xff]  }
  0x1a   : > { %v1310_v2 = vcombine.low %v230_v0, %v230_v0  ;;  %v1312_v3 = vcombine.low %v229_v1, %v229_v1  ;;  %v1316_v4 = vcombine.high %v230_v0, %v230_v0  ;;  %v1318_v5 = vcombine.high %v229_v1, %v229_v1 }
  0x1c   : > { %324 = vrot.lane.b32.xlu1 %v1310_v2, %s1217_s10  ;;  %320 = vrot.lane.b32.xlu0 %v1312_v3, %s1217_s10 }
  0x20   : > { %326 = vrot.lane.b32.xlu1 %v1316_v4, %s1217_s10  ;;  %322 = vrot.lane.b32.xlu0 %v1318_v5, %s1217_s10 }
  0x24   : > { %292 = vrot.lane.b32.xlu1 %v1318_v5, %s1218_s11  ;;  %328 = vrot.lane.b32.xlu0 %v1160_v6, %s1217_s10  ;;  %s206_s10 = sand.u32 1, %s1191_s12   ;;  %s1085_s12 = sshll.u32 (%p1291_p5), %s1199_s14, 2 }
  0x28   : > { %296 = vrot.lane.b32.xlu1 %v1316_v4, %s1218_s11  ;;  %294 = vrot.lane.b32.xlu0 %v1310_v2, %s1218_s11 }
  0x2c   : > { %307 = vrot.lane.b32.xlu1 %v1318_v5, %s1219_s21  ;;  %298 = vrot.lane.b32.xlu0 %v1160_v6, %s1218_s11 }
  0x30   : > { %311 = vrot.lane.b32.xlu1 %v1316_v4, %s1219_s21  ;;  %309 = vrot.lane.b32.xlu0 %v1310_v2, %s1219_s21 }
  0x34   : > { %290 = vrot.lane.b32.xlu1 %v1312_v3, %s1218_s11  ;;  %313 = vrot.lane.b32.xlu0 %v1160_v6, %s1219_s21  ;;  %s1045_s11 = sshll.u32 %s206_s10, 5 }
  0x38   : > { %262 = vrot.lane.b32.xlu1 %v1318_v5, %s1220_s22  ;;  %305 = vrot.lane.b32.xlu0 %v1312_v3, %s1219_s21  ;;  %s1523_s21 = scalar_lea.vmem [#allocation2], %s1045_s11 }
  0x3c   : > { %266 = vrot.lane.b32.xlu1 %v1316_v4, %s1220_s22  ;;  %264 = vrot.lane.b32.xlu0 %v1310_v2, %s1220_s22 }
  0x40   : > { %277 = vrot.lane.b32.xlu1 %v1318_v5, %s1221_s24  ;;  %268 = vrot.lane.b32.xlu0 %v1160_v6, %s1220_s22 }
  0x44   : > { %281 = vrot.lane.b32.xlu1 %v1316_v4, %s1221_s24  ;;  %279 = vrot.lane.b32.xlu0 %v1310_v2, %s1221_s24 }
  0x48   : > { %260 = vrot.lane.b32.xlu1 %v1312_v3, %s1220_s22  ;;  %283 = vrot.lane.b32.xlu0 %v1160_v6, %s1221_s24  ;;  %s1086_s22 = sshll.u32 (%p1291_p5), %s1203_s15, 5 }
  0x4c   : > { %247 = vrot.lane.b32.xlu1 %v1318_v5, %s1223_s25  ;;  %275 = vrot.lane.b32.xlu0 %v1312_v3, %s1221_s24  ;;  %s888_s24 = sadd.s32 (%p1291_p5), %s1086_s22, %s1085_s12 }
  0x50   : > { %251 = vrot.lane.b32.xlu1 %v1316_v4, %s1223_s25  ;;  %249 = vrot.lane.b32.xlu0 %v1310_v2, %s1223_s25 }
  0x54   : > { %245 = vrot.lane.b32.xlu1 %v1312_v3, %s1223_s25  ;;  %253 = vrot.lane.b32.xlu0 %v1160_v6, %s1223_s25  ;;  %s1087_s25 = sshll.u32 (%p1291_p5), %s888_s24, 1 }
  0x55   : > { %s890_s29 = scalar_lea.vmem (%p1291_p5), %s1582_s3, %s1087_s25 }
  0x58   : > { %388 = vperm.xlu0 %1155, %v384_v8  }
  0x8e   : > { %v325_v9 = vpop.permute.xlu1 %324  ;;  %v321_v10 = vpop.permute.xlu0 %320 }
  0x92   : > { %v327_v11 = vpop.permute.xlu1 %326  ;;  %v323_v12 = vpop.permute.xlu0 %322 }
  0x93   : > { %v331_v13 = vsel %vm330_vm0, %v321_v10, %v323_v12  ;;  %v1348_v14 = vsel %vm330_vm0, %v323_v12, %v325_v9  ;;  %v333_v16 = vsel %vm330_vm0, %v325_v9, %v327_v11 }
  0x94   : > { %v1351_v15 = vsel %vm335_vm1, %v331_v13, 0  ;;  %1054 = vmatprep.subr.msk.bf16.mxu0 %vm335_vm1, %v1348_v14  ;;  %v1359_v20 = vsel %vm335_vm1, %v333_v16, 0 }
  0x95   : > { %416 = vmatpush1.bf16.msra.mxu0 %v1351_v15 }
  0x96   : > { %v293_v17 = vpop.permute.xlu1 %292  ;;  %v329_v18 = vpop.permute.xlu0 %328 }
  0x97   : > { %v1356_v19 = vsel %vm330_vm0, %v327_v11, %v329_v18 }
  0x98   : > { %1056 = vmatprep.subr.msk.bf16.mxu1 %vm335_vm1, %v1356_v19 }
  0x99   : > { %457 = vmatpush1.bf16.msra.mxu1 %v1359_v20 }
  0x9a   : > { %v297_v21 = vpop.permute.xlu1 %296  ;;  %v295_v22 = vpop.permute.xlu0 %294 }
  0x9b   : > { %v302_v27 = vsel %vm300_vm2, %v293_v17, %v295_v22  ;;  %v303_v35 = vsel %vm300_vm2, %v295_v22, %v297_v21 }
  0x9e   : > { %v308_v23 = vpop.permute.xlu1 %307  ;;  %v299_v24 = vpop.permute.xlu0 %298 }
  0x9f   : > { %v304_v33 = vsel %vm300_vm2, %v297_v21, %v299_v24  ;;  %v385_v21 = vld [vmem:[%s1580_s1] sm:$0x3] }
  0xa2   : > { %v312_v25 = vpop.permute.xlu1 %311  ;;  %v310_v26 = vpop.permute.xlu0 %309 }
  0xa3   : > { %v317_v28 = vsel %vm315_vm3, %v308_v23, %v310_v26  ;;  %v318_v30 = vsel %vm315_vm3, %v310_v26, %v312_v25 }
  0xa4   : > { %v1367_v29 = vsel %vm335_vm1, %v302_v27, %v317_v28  ;;  %v1379_v37 = vsel %vm335_vm1, %v303_v35, %v318_v30 }
  0xa5   : > { %417 = vmatprep.subr.bf16.mxu0 %v1367_v29 }
  0xa6   : > { %v291_v31 = vpop.permute.xlu1 %290  ;;  %v314_v32 = vpop.permute.xlu0 %313 }
  0xa7   : > { %v319_v34 = vsel %vm315_vm3, %v312_v25, %v314_v32  ;;  %v301_v40 = vsel %vm300_vm2, %v291_v31, %v293_v17 }
  0xa8   : > { %v1375_v36 = vsel %vm335_vm1, %v304_v33, %v319_v34 }
  0xa9   : > { %458 = vmatprep.subr.bf16.mxu1 %v1375_v36 }
  0xaa   : > { %v263_v38 = vpop.permute.xlu1 %262  ;;  %459 = vmatpush1.bf16.msra.mxu1 %v1379_v37  ;;  %v306_v39 = vpop.permute.xlu0 %305 }
  0xab   : > { %v316_v41 = vsel %vm315_vm3, %v306_v39, %v308_v23 }
  0xac   : > { %v1385_v42 = vsel %vm335_vm1, %v301_v40, %v316_v41 }
  0xad   : > { %418 = vmatpush1.bf16.msra.mxu0 %v1385_v42 }
  0xae   : > { %v267_v43 = vpop.permute.xlu1 %266  ;;  %v265_v44 = vpop.permute.xlu0 %264 }
  0xaf   : > { %v272_v49 = vsel %vm270_vm4, %v263_v38, %v265_v44  ;;  %v273_v57 = vsel %vm270_vm4, %v265_v44, %v267_v43 }
  0xb2   : > { %v278_v45 = vpop.permute.xlu1 %277  ;;  %v269_v46 = vpop.permute.xlu0 %268 }
  0xb3   : > { %v274_v55 = vsel %vm270_vm4, %v267_v43, %v269_v46 }
  0xb6   : > { %v282_v47 = vpop.permute.xlu1 %281  ;;  %v280_v48 = vpop.permute.xlu0 %279 }
  0xb7   : > { %v287_v50 = vsel %vm285_vm5, %v278_v45, %v280_v48  ;;  %v288_v52 = vsel %vm285_vm5, %v280_v48, %v282_v47 }
  0xb8   : > { %v1391_v51 = vsel %vm335_vm1, %v272_v49, %v287_v50  ;;  %v1403_v59 = vsel %vm335_vm1, %v273_v57, %v288_v52 }
  0xb9   : > { %419 = vmatprep.subr.bf16.mxu0 %v1391_v51 }
  0xba   : > { %v261_v53 = vpop.permute.xlu1 %260  ;;  %v284_v54 = vpop.permute.xlu0 %283 }
  0xbb   : > { %v289_v56 = vsel %vm285_vm5, %v282_v47, %v284_v54  ;;  %v271_v62 = vsel %vm270_vm4, %v261_v53, %v263_v38 }
  0xbc   : > { %v1399_v58 = vsel %vm335_vm1, %v274_v55, %v289_v56 }
  0xbd   : > { %460 = vmatprep.subr.bf16.mxu1 %v1399_v58 }
  0xbe   : > { %v248_v60 = vpop.permute.xlu1 %247  ;;  %461 = vmatpush1.bf16.msra.mxu1 %v1403_v59  ;;  %v276_v61 = vpop.permute.xlu0 %275 }
  0xbf   : > { %v286_v63 = vsel %vm285_vm5, %v276_v61, %v278_v45 }
  0xc0   : > { %v1409_v0 = vsel %vm335_vm1, %v271_v62, %v286_v63 }
  0xc1   : > { %420 = vmatpush1.bf16.msra.mxu0 %v1409_v0 }
  0xc2   : > { %v252_v1 = vpop.permute.xlu1 %251  ;;  %v250_v6 = vpop.permute.xlu0 %249 }
  0xc3   : > { %v257_v8 = vsel %vm255_vm6, %v248_v60, %v250_v6  ;;  %v258_v10 = vsel %vm255_vm6, %v250_v6, %v252_v1 }
  0xc4   : > { %v1414_v9 = vsel %vm335_vm1, %v1318_v5, %v257_v8  ;;  %v1429_v5 = vsel %vm335_vm1, %v1310_v2, %v258_v10  ;;  %v1060_v2 = vld [vmem:[%s1580_s1 + $0x2] sm:$0x3] }
  0xc5   : > { %421 = vmatprep.subr.bf16.mxu0 %v1414_v9 }
  0xc6   : > { %v246_v11 = vpop.permute.xlu1 %245  ;;  %v254_v12 = vpop.permute.xlu0 %253 }
  0xc7   : > { %v256_v13 = vsel %vm255_vm6, %v246_v11, %v248_v60  ;;  %v259_v16 = vsel %vm255_vm6, %v252_v1, %v254_v12 }
  0xc8   : > { %v1419_v17 = vsel %vm335_vm1, %v1312_v3, %v256_v13  ;;  %v1423_v18 = vsel %vm335_vm1, %v1316_v4, %v259_v16  ;;  %v1068_v3 = vld [vmem:[%s1580_s1 + $0x4] sm:$0x3]  ;;  %v1076_v4 = vld [vmem:[%s1580_s1 + $0x6] sm:$0x3] }
  0xc9   : > { %422 = vmatpush1.bf16.msra.mxu0 %v1419_v17  ;;  %462 = vmatprep.subr.bf16.mxu1 %v1423_v18 }
  0xca   : > { %463 = vmatpush1.bf16.msra.mxu1 %v1429_v5  ;;  %1061 = vmatprep.subr.msk.bf16.mxu0 %vm335_vm1, %v1348_v14 }
  0xcb   : > { %1063 = vmatprep.subr.msk.bf16.mxu1 %vm335_vm1, %v1356_v19 }
  0xcc   : > { %1055 = vmatmul.mubr.msk.bf16.vlgmr.msra.gmra.mxu0 %vm391_vm7, %v385_v21 }
  0xcd   : > { %1057 = vmatmul.mubr.msk.bf16.vlgmr.msra.gmra.mxu1 %vm391_vm7, %v385_v21  ;;  %534 = vmatpush1.bf16.msra.mxu0 %v1351_v15 }
  0xce   : > { %535 = vmatprep.subr.bf16.mxu0 %v1367_v29  ;;  %575 = vmatpush1.bf16.msra.mxu1 %v1359_v20 }
  0xcf   : > { %576 = vmatprep.subr.bf16.mxu1 %v1375_v36  ;;  %557 = vmatprep.mubr.bf16.mxu0 %v1222_v7 }
  0xd0   : > { %598 = vmatprep.mubr.bf16.mxu1 %v1222_v7 }
  0xd1   : > { %536 = vmatpush1.bf16.msra.mxu0 %v1385_v42 }
  0xd2   : > { %537 = vmatprep.subr.bf16.mxu0 %v1391_v51  ;;  %577 = vmatpush1.bf16.msra.mxu1 %v1379_v37 }
  0xd3   : > { %578 = vmatprep.subr.bf16.mxu1 %v1399_v58 }
  0xd5   : > { %538 = vmatpush1.bf16.msra.mxu0 %v1409_v0 }
  0xd6   : > { %539 = vmatprep.subr.bf16.mxu0 %v1414_v9  ;;  %579 = vmatpush1.bf16.msra.mxu1 %v1403_v59 }
  0xd7   : > { %580 = vmatprep.subr.bf16.mxu1 %v1423_v18 }
  0xd9   : > { %540 = vmatpush1.bf16.msra.mxu0 %v1419_v17 }
  0xda   : > { %581 = vmatpush1.bf16.msra.mxu1 %v1429_v5  ;;  %1069 = vmatprep.subr.msk.bf16.mxu0 %vm335_vm1, %v1348_v14 }
  0xdb   : > { %1071 = vmatprep.subr.msk.bf16.mxu1 %vm335_vm1, %v1356_v19 }
  0xdc   : > { %1062 = vmatmul.mubr.msk.bf16.vlgmr.msra.gmra.mxu0 %vm391_vm7, %v1060_v2 }
  0xdd   : > { %1064 = vmatmul.mubr.msk.bf16.vlgmr.msra.gmra.mxu1 %vm391_vm7, %v1060_v2  ;;  %653 = vmatpush1.bf16.msra.mxu0 %v1351_v15 }
  0xde   : > { %654 = vmatprep.subr.bf16.mxu0 %v1367_v29  ;;  %694 = vmatpush1.bf16.msra.mxu1 %v1359_v20 }
  0xdf   : > { %695 = vmatprep.subr.bf16.mxu1 %v1375_v36  ;;  %676 = vmatprep.mubr.bf16.mxu0 %v1222_v7 }
  0xe0   : > { %717 = vmatprep.mubr.bf16.mxu1 %v1222_v7 }
  0xe1   : > { %655 = vmatpush1.bf16.msra.mxu0 %v1385_v42 }
  0xe2   : > { %656 = vmatprep.subr.bf16.mxu0 %v1391_v51  ;;  %696 = vmatpush1.bf16.msra.mxu1 %v1379_v37 }
  0xe3   : > { %697 = vmatprep.subr.bf16.mxu1 %v1399_v58 }
  0xe5   : > { %657 = vmatpush1.bf16.msra.mxu0 %v1409_v0 }
  0xe6   : > { %658 = vmatprep.subr.bf16.mxu0 %v1414_v9  ;;  %698 = vmatpush1.bf16.msra.mxu1 %v1403_v59 }
  0xe7   : > { %699 = vmatprep.subr.bf16.mxu1 %v1423_v18 }
  0xe9   : > { %659 = vmatpush1.bf16.msra.mxu0 %v1419_v17 }
  0xea   : > { %700 = vmatpush1.bf16.msra.mxu1 %v1429_v5  ;;  %1077 = vmatprep.subr.msk.bf16.mxu0 %vm335_vm1, %v1348_v14 }
  0xeb   : > { %1079 = vmatprep.subr.msk.bf16.mxu1 %vm335_vm1, %v1356_v19  ;;  %v1512_v19 = vpop.permute.xlu0 %388 }
  0xec   : > { %1070 = vmatmul.mubr.msk.bf16.vlgmr.msra.gmra.mxu0 %vm391_vm7, %v1068_v3 }
  0xed   : > { %1072 = vmatmul.mubr.msk.bf16.vlgmr.msra.gmra.mxu1 %vm391_vm7, %v1068_v3  ;;  %772 = vmatpush1.bf16.msra.mxu0 %v1351_v15  ;;  %v506_v15 = vlaneseq }
  0xee   : > { %773 = vmatprep.subr.bf16.mxu0 %v1367_v29  ;;  %813 = vmatpush1.bf16.msra.mxu1 %v1359_v20 }
  0xef   : > { %814 = vmatprep.subr.bf16.mxu1 %v1375_v36  ;;  %795 = vmatprep.mubr.bf16.mxu0 %v1222_v7  ;;  %v507_v25 = vshrl.u32 %v506_v15, 7 }
  0xf0   : > { %836 = vmatprep.mubr.bf16.mxu1 %v1222_v7  ;;  %v1224_v7 = vmov 1983009808  }
  0xf1   : > { %774 = vmatpush1.bf16.msra.mxu0 %v1385_v42  ;;  %v504_v14 = vunpack.c.l.s4 %v1224_v7 }
  0xf2   : > { %775 = vmatprep.subr.bf16.mxu0 %v1391_v51  ;;  %815 = vmatpush1.bf16.msra.mxu1 %v1379_v37 }
  0xf3   : > { %816 = vmatprep.subr.bf16.mxu1 %v1399_v58  ;;  %v505_v24 = vunpack.c.0.s8 %v504_v14 }
  0xf5   : > { %776 = vmatpush1.bf16.msra.mxu0 %v1409_v0  ;;  %v1519_v35 = vsub.s32 %v505_v24, %v507_v25 }
  0xf6   : > { %777 = vmatprep.subr.bf16.mxu0 %v1414_v9  ;;  %817 = vmatpush1.bf16.msra.mxu1 %v1403_v59 }
  0xf7   : > { %818 = vmatprep.subr.bf16.mxu1 %v1423_v18 }
  0xf9   : > { %778 = vmatpush1.bf16.msra.mxu0 %v1419_v17 }
  0xfa   : > { %819 = vmatpush1.bf16.msra.mxu1 %v1429_v5 }
  0xfc   : > { %1078 = vmatmul.mubr.msk.bf16.vlgmr.msra.gmra.mxu0 %vm391_vm7, %v1076_v4 }
  0xfd   : > { %1080 = vmatmul.mubr.msk.bf16.vlgmr.msra.gmra.mxu1 %vm391_vm7, %v1076_v4 }
 0x18c   : > { %v441_v20 = vpop.f32.mrf.mxu0 }
 0x18d   : > { %v482_v22 = vpop.f32.mrf.mxu1  ;;  %v442_v23 = vadd.f32 %v441_v20, %v1512_v19 }
 0x18e   : > { %v443_v26 = vpop.f32.mrf.mxu0  ;;  %v483_v27 = vadd.f32 %v482_v22, %v1512_v19 }
 0x18f   : > { %v444_v28 = vadd.f32 %v443_v26, %v1512_v19  ;;  %v484_v29 = vpop.f32.mrf.mxu1  ;;  %v489_v30 = vmax.f32 %v442_v23, 0.0 }
 0x190   : > { %v485_v31 = vadd.f32 %v484_v29, %v1512_v19  ;;  %v491_v32 = vmax.f32 %v483_v27, 0.0  ;;  %v445_v33 = vpop.f32.mrf.mxu0 }
 0x191   : > { %v490_v34 = vmax.f32 %v444_v28, 0.0  ;;  %v486_v36 = vpop.f32.mrf.mxu1 }
 0x192   : > { %v492_v37 = vmax.f32 %v485_v31, 0.0  ;;  %v446_v38 = vpop.f32.mrf.mxu0 }
 0x193   : > { %v1058_v39 = vpack.c.bf16 %v490_v34, %v489_v30  ;;  %v487_v40 = vpop.f32.mrf.mxu1 }
 0x194   : > { %v1059_v41 = vpack.c.bf16 %v492_v37, %v491_v32 }
 0x195   : > { %v509_v42 = vrot.slane %v1058_v39, %v1519_v35 }
 0x196   : > { %v516_v43 = vrot.slane %v1059_v41, %v1519_v35 }
 0x198   : > { %v517_v44 = vcombine.low %v509_v42, %v516_v43 }
 0x19a   : > { %519 = vst [vmem:[%s1523_s21] sm:$0xff] %v517_v44 }
 0x19c   : > { %v559_v45 = vpop.f32.mrf.mxu0 }
 0x19d   : > { %v560_v46 = vadd.f32 %v559_v45, %v1512_v19  ;;  %v600_v47 = vpop.f32.mrf.mxu1 }
 0x19e   : > { %v601_v48 = vadd.f32 %v600_v47, %v1512_v19  ;;  %v561_v49 = vpop.f32.mrf.mxu0 }
 0x19f   : > { %v607_v50 = vmax.f32 %v560_v46, 0.0  ;;  %v562_v51 = vadd.f32 %v561_v49, %v1512_v19  ;;  %v602_v52 = vpop.f32.mrf.mxu1 }
 0x1a0   : > { %v609_v53 = vmax.f32 %v601_v48, 0.0  ;;  %v603_v54 = vadd.f32 %v602_v52, %v1512_v19  ;;  %v563_v55 = vpop.f32.mrf.mxu0 }
 0x1a1   : > { %v608_v56 = vmax.f32 %v562_v51, 0.0  ;;  %v604_v57 = vpop.f32.mrf.mxu1 }
 0x1a2   : > { %v610_v58 = vmax.f32 %v603_v54, 0.0  ;;  %v564_v59 = vpop.f32.mrf.mxu0 }
 0x1a3   : > { %v1065_v60 = vpack.c.bf16 %v608_v56, %v607_v50  ;;  %v605_v61 = vpop.f32.mrf.mxu1 }
 0x1a4   : > { %v1066_v62 = vpack.c.bf16 %v610_v58, %v609_v53 }
 0x1a5   : > { %v627_v63 = vrot.slane %v1065_v60, %v1519_v35 }
 0x1a6   : > { %v634_v0 = vrot.slane %v1066_v62, %v1519_v35 }
 0x1a8   : > { %v635_v1 = vcombine.low %v627_v63, %v634_v0 }
 0x1aa   : > { %1067 = vst [vmem:[%s1523_s21 + $0x8] sm:$0xff] %v635_v1 }
 0x1ac   : > { %v678_v6 = vpop.f32.mrf.mxu0 }
 0x1ad   : > { %v679_v8 = vadd.f32 %v678_v6, %v1512_v19  ;;  %v719_v9 = vpop.f32.mrf.mxu1 }
 0x1ae   : > { %v720_v10 = vadd.f32 %v719_v9, %v1512_v19  ;;  %v680_v11 = vpop.f32.mrf.mxu0 }
 0x1af   : > { %v726_v12 = vmax.f32 %v679_v8, 0.0  ;;  %v681_v13 = vadd.f32 %v680_v11, %v1512_v19  ;;  %v721_v16 = vpop.f32.mrf.mxu1 }
 0x1b0   : > { %v728_v17 = vmax.f32 %v720_v10, 0.0  ;;  %v722_v18 = vadd.f32 %v721_v16, %v1512_v19  ;;  %v682_v5 = vpop.f32.mrf.mxu0 }
 0x1b1   : > { %v727_v21 = vmax.f32 %v681_v13, 0.0  ;;  %v723_v2 = vpop.f32.mrf.mxu1  ;;  %v927_v46 = vld [vmem:[%s1523_s21 + $0x8] sm:$0xff] (%p1291_p5) }
 0x1b2   : > { %v729_v3 = vmax.f32 %v722_v18, 0.0  ;;  %v683_v4 = vpop.f32.mrf.mxu0  ;;  %928 = vst [vmem:[%s890_s29 + $0x10] sm:$0xff] (%p1291_p5), %v927_v46 }
 0x1b3   : > { %v1073_v7 = vpack.c.bf16 %v727_v21, %v726_v12  ;;  %v724_v14 = vpop.f32.mrf.mxu1 }
 0x1b4   : > { %v1074_v15 = vpack.c.bf16 %v729_v3, %v728_v17 }
 0x1b5   : > { %v746_v20 = vrot.slane %v1073_v7, %v1519_v35 }
 0x1b6   : > { %v753_v22 = vrot.slane %v1074_v15, %v1519_v35 }
 0x1b8   : > { %v754_v23 = vcombine.low %v746_v20, %v753_v22 }
 0x1ba   : > { %1075 = vst [vmem:[%s1523_s21 + $0x10] sm:$0xff] %v754_v23 }
 0x1bc   : > { %v797_v24 = vpop.f32.mrf.mxu0 }
 0x1bd   : > { %v798_v25 = vadd.f32 %v797_v24, %v1512_v19  ;;  %v838_v26 = vpop.f32.mrf.mxu1 }
 0x1be   : > { %v839_v27 = vadd.f32 %v838_v26, %v1512_v19  ;;  %v799_v28 = vpop.f32.mrf.mxu0 }
 0x1bf   : > { %v845_v29 = vmax.f32 %v798_v25, 0.0  ;;  %v800_v30 = vadd.f32 %v799_v28, %v1512_v19  ;;  %v840_v31 = vpop.f32.mrf.mxu1 }
 0x1c0   : > { %v841_v32 = vadd.f32 %v840_v31, %v1512_v19  ;;  %v801_v33 = vpop.f32.mrf.mxu0  ;;  %v847_v37 = vmax.f32 %v839_v27, 0.0  ;;  %v925_v19 = vld [vmem:[%s1523_s21] sm:$0xff] (%p1291_p5) }
 0x1c1   : > { %v846_v34 = vmax.f32 %v800_v30, 0.0  ;;  %v842_v36 = vpop.f32.mrf.mxu1  ;;  %v929_v47 = vld [vmem:[%s1523_s21 + $0x10] sm:$0xff] (%p1291_p5)  ;;  %926 = vst [vmem:[%s890_s29] sm:$0xff] (%p1291_p5), %v925_v19 }
 0x1c2   : > { %v848_v38 = vmax.f32 %v841_v32, 0.0  ;;  %v802_v39 = vpop.f32.mrf.mxu0  ;;  %930 = vst [vmem:[%s890_s29 + $0x20] sm:$0xff] (%p1291_p5), %v929_v47 }
 0x1c3   : > { %v1081_v40 = vpack.c.bf16 %v846_v34, %v845_v29  ;;  %v843_v41 = vpop.f32.mrf.mxu1 }
 0x1c4   : > { %v1082_v42 = vpack.c.bf16 %v848_v38, %v847_v37 }
 0x1c5   : > { %v865_v43 = vrot.slane %v1081_v40, %v1519_v35 }
 0x1c6   : > { %v872_v44 = vrot.slane %v1082_v42, %v1519_v35  ;;  %883 = sbr.rel (!%p1291_p5) target bundleno = 467 (0x1d3), region = 36 }
 0x1c8   : > { %v873_v45 = vcombine.low %v865_v43, %v872_v44 }
 0x1ca   : > { %1083 = vst [vmem:[%s1523_s21 + $0x18] sm:$0xff] %v873_v45 }
 0x1d1   : > { %v931_v48 = vld [vmem:[%s1523_s21 + $0x18] sm:$0xff] }
 0x1d2   : > { %932 = vst [vmem:[%s890_s29 + $0x30] sm:$0xff] %v931_v48 }
 0x1d3 PF: > { %s13_s18 = sadd.s32 1, %s1215_s18   ;;  %s1584_s12 = smov %s1195_s13 }
 0x1d4   : > { %p10_p10 = scmp.ge.s32.totalorder %s13_s18, 6   ;;  %s1585_s13 = smov %s1302_s27 }
 0x1d5   : > { %s1586_s14 = smov %s1207_s16  ;;  %s1587_s15 = smov %s1211_s17 }
 0x1d6   : > { %s1588_s16 = smov %s1591_s19  ;;  %s1589_s17 = smov %s1595_s20 }
 0x1d7   :  { %12 = sbr.rel (!%p10_p10) target bundleno = 4 (0x4), region = 113 }

// kernel: wavegan_forward.12
= control target key start
LH: loop header
LB: loop body
LE: loop exit
PB: predicated region body
PF: predicated region fallthrough
CT: control target
= control target key end

     0   :  { %s1681_s0 = inlined_call_operand.vmem [shape: bf16[2,4,4224], index: 0, kind: input, shape index: {}]   ;;  %s1682_s1 = inlined_call_operand.vmem [shape: bf16[4,1,28], index: 1, kind: input, shape index: {}]   ;;  %s1683_s2 = inlined_call_operand.<no memory space> [shape: f32[1,1], index: 2, kind: input, shape index: {}]   ;;  %s1684_s3 = inlined_call_operand.vmem [shape: bf16[2,4,1,4096], index: 3, kind: output, shape index: {}]  }
   0x1   :  { %v8_v0 = vstv %s1683_s2 }
   0x2   :  { %9 = vst [vmem:[#allocation2] sm:$0x1] %v8_v0 }
   0x3   :  { %s1364_s14 = smov 0   ;;  %s1366_s15 = smov 0  }
   0x4   :  { %s1368_s16 = smov 0   ;;  %s1370_s17 = smov 0  }
   0x5   :  { %s1372_s18 = smov 0   ;;  %s1374_s19 = smov 0  }
   0x6   :  { %s1376_s20 = smov 0  }
   0x7 LB: > { %s27_s2 = sadd.s32 1, %s1322_s18  ;;  %s30_s21 = sadd.s32 1, %s1326_s19  ;;  %s1330_s20 = sphi %s1376_s20, %s15_s20   ;;  %s1326_s19 = sphi %s1374_s19, %s1699_s19   ;;  %s1322_s18 = sphi %s1372_s18, %s1698_s18   ;;  %s1318_s17 = sphi %s1370_s17, %s1697_s17   ;;  %s1314_s16 = sphi %s1368_s16, %s1696_s16   ;;  %s1310_s15 = sphi %s1366_s15, %s1695_s15   ;;  %s1306_s14 = sphi %s1364_s14, %s1694_s14  }
   0x8   : > { %p28_p0 = scmp.ge.s32.totalorder %s27_s2, 8  ;;  %s1125_s22 = sadd.s32 4294967295, %s1330_s20  }
   0x9   : > { %p133_p1 = scmp.ne.s32.totalorder %s1310_s15, %s1306_s14  ;;  %p134_p2 = scmp.eq.s32.totalorder %s1125_s22, 15 }
   0xa   : > { %s1701_s2 = smov (%p28_p0, %s27_s2), 0  ;;  %s1703_s21 = smov (!%p28_p0, %s30_s21), %s1326_s19 }
   0xb   : > { %s119_s23 = ssub.s32 %s1322_s18, %s1701_s2  ;;  %p32_p3 = scmp.ge.s32.totalorder %s1703_s21, 2 }
   0xc   : > { %p1131_p4 = scmp.ge.s32.totalorder %s1330_s20, 1  ;;  %p1410_p5 = por %p134_p2, %p133_p1 }
   0xd   : > { %p178_p6 = scmp.lt.s32.totalorder %s1330_s20, 17  ;;  %s1705_s21 = smov (%p32_p3, %s1703_s21), 0 }
   0xe   : > { %s116_s25 = ssub.s32 %s1326_s19, %s1705_s21  ;;  %s123_s27 = sadd.s32 1, %s1310_s15 }
   0xf   : > { %p179_p7 = pnand %p1131_p4, %p178_p6  ;;  %s120_s26 = sor.u32 %s119_s23, %s116_s25 }
  0x10   : > { %p121_p8 = scmp.eq.s32.totalorder %s120_s26, 0  ;;  %p207_p9 = scmp.lt.s32.totalorder (!%p179_p7), %s1318_s17, 1 }
  0x11   : > { %182 = sbr.rel (%p179_p7) target bundleno = 461 (0x1cd), region = 32  ;;  %s1134_s29 = sshll.u32 (!%p179_p7), %s1314_s16, 9 }
  0x12   : > { %s1421_s28 = scalar_select %p121_p8, %s1310_s15, %s123_s27  }
  0x13   : > { %s221_s30 = sshra.s32 (!%p179_p7), %s1134_s29, 7  ;;  %s1333_s11 = smov (!%p179_p7), 123  }
  0x14   : > { %s1135_s6 = sshll.u32 (!%p179_p7), %s221_s30, 1  ;;  %s1334_s12 = smov (!%p179_p7), 124  }
  0x15   : > { %s1335_s13 = smov (!%p179_p7), 122   ;;  %s1336_s22 = smov (!%p179_p7), 127  }
  0x16   : > { %v232_v1 = vlaneseq  ;;  %v1332_v2 = vmov 1983009808   ;;  %s208_s4 = scalar_select %p207_p9, %s1318_s17, 1  ;;  %v1338_v23 = vmov 0   ;;  %v420_v26 = vld [vmem:[#allocation2] sm:$0x1] }
  0x17   : > { %v230_v3 = vunpack.c.l.s4 %v1332_v2  ;;  %s1337_s23 = smov 126   ;;  %475 = vmatprep.mubr.bf16.mxu0 %v1338_v23  ;;  %516 = vmatprep.mubr.bf16.mxu1 %v1338_v23  ;;  %s1339_s25 = smov 125   ;;  %vm345_vm0 = vcmask 1006592   ;;  %vm360_vm1 = vcmask 998400   ;;  %vm330_vm2 = vcmask 1014784  }
  0x18   : > { %v1426_v4 = vshrl.u32 %v232_v1, 7  ;;  %s1174_s5 = smul.u32 66, %s208_s4  ;;  %1240 = vset.pattern.permute.xlu0 %v1338_v23  ;;  %vm365_vm3 = vcmask 1041408   ;;  %vm378_vm4 = vcmask 1043456   ;;  %vm387_vm5 = vcmask 1045504   ;;  %s204_s8 = sand.u32 1, %s1306_s14  }
  0x19   : > { %v231_v5 = vunpack.c.0.s8 %v230_v3  ;;  %vm280_vm6 = vcmask 1039360   ;;  %vm298_vm7 = vcmask 1031168   ;;  %vm315_vm8 = vcmask 1022976   ;;  %s1132_s14 = sshll.u32 %s204_s8, 4 }
  0x1a   : > { %s211_s9 = scalar_lea.vmem %s1681_s0, %s1174_s5  ;;  %vm431_vm9 = vcmask 228352   ;;  %vm562_vm10 = vcmask 1040384   ;;  %vm563_vm11 = vsmask.f32 256  ;;  %vm565_vm12 = vcmask 1041409  }
  0x1b   : > { %v234_v6 = vsub.s32 %v231_v5, %v1426_v4  ;;  %s224_s10 = scalar_lea.vmem %s211_s9, %s1135_s6  ;;  %vm566_vm13 = vsmask.f32 1280  ;;  %vm1579_vm14 = vmand %vm562_vm10, %vm563_vm11  ;;  %s1617_s9 = scalar_lea.vmem [#allocation3], %s1132_s14 }
  0x1c   : > { %v225_v7 = vld [vmem:[%s224_s10] sm:$0xff]  ;;  %v226_v8 = vld [vmem:[%s224_s10 + $0x8] sm:$0x3]  ;;  %vm1583_vm15 = vmand %vm565_vm12, %vm566_vm13  ;;  %s1170_s10 = sshll.u32 (%p1410_p5), %s1314_s16, 2 }
  0x1d   : > { %v1432_v9 = vrot.slane %v225_v7, %v234_v6  ;;  %v228_v10 = vcombine.high %v225_v7, %v225_v7  ;;  %v269_v11 = vrot.slane %v226_v8, %v234_v6  ;;  %v246_v13 = vcombine.low %v225_v7, %v225_v7 }
  0x1e   : > { %v255_v18 = vcombine.low %v226_v8, %v226_v8 }
  0x1f   : > { %339 = vrot.lane.b32.xlu1 %v1432_v9, %s1333_s11  ;;  %320 = vrot.lane.b32.xlu0 %v1432_v9, %s1334_s12  ;;  %v1436_v12 = vrot.slane %v228_v10, %v234_v6  ;;  %v1441_v14 = vcombine.high %v1432_v9, %v1432_v9  ;;  %v253_v15 = vrot.slane %v246_v13, %v234_v6 }
  0x20   : > { %v262_v19 = vrot.slane %v255_v18, %v234_v6  ;;  %v285_v20 = vcombine.low %v1432_v9, %v1432_v9  ;;  %v287_v22 = vcombine.low %v269_v11, %v269_v11 }
  0x21   : > { %v254_v16 = vcombine.high %v253_v15, %v253_v15  ;;  %v1446_v17 = vcombine.high %v1436_v12, %v1436_v12  ;;  %v286_v21 = vcombine.low %v1436_v12, %v1436_v12  ;;  %v303_v25 = vcombine.low %v253_v15, %v253_v15 }
  0x22   : > { %v304_v24 = vcombine.low %v262_v19, %v262_v19 }
  0x23   : > { %328 = vrot.lane.b32.xlu0 %v269_v11, %s1334_s12  ;;  %324 = vrot.lane.b32.xlu1 %v1436_v12, %s1334_s12 }
  0x27   : > { %322 = vrot.lane.b32.xlu0 %v1441_v14, %s1334_s12  ;;  %335 = vrot.lane.b32.xlu1 %v253_v15, %s1333_s11 }
  0x2b   : > { %337 = vrot.lane.b32.xlu0 %v254_v16, %s1333_s11  ;;  %326 = vrot.lane.b32.xlu1 %v1446_v17, %s1334_s12 }
  0x2f   : > { %341 = vrot.lane.b32.xlu0 %v1441_v14, %s1333_s11  ;;  %343 = vrot.lane.b32.xlu1 %v262_v19, %s1333_s11  ;;  %s1171_s11 = sshll.u32 (%p1410_p5), %s1318_s17, 7 }
  0x30   : > { %s975_s12 = sadd.s32 (%p1410_p5), %s1171_s11, %s1170_s10 }
  0x33   : > { %350 = vrot.lane.b32.xlu0 %v285_v20, %s1335_s13  ;;  %352 = vrot.lane.b32.xlu1 %v1432_v9, %s1335_s13 }
  0x37   : > { %354 = vrot.lane.b32.xlu0 %v286_v21, %s1335_s13  ;;  %356 = vrot.lane.b32.xlu1 %v1436_v12, %s1335_s13 }
  0x3b   : > { %358 = vrot.lane.b32.xlu0 %v287_v22, %s1335_s13  ;;  %272 = vrot.lane.b32.xlu1 %v254_v16, %s1336_s22 }
  0x3f   : > { %274 = vrot.lane.b32.xlu0 %v1432_v9, %s1336_s22  ;;  %276 = vrot.lane.b32.xlu1 %v1441_v14, %s1336_s22 }
  0x43   : > { %278 = vrot.lane.b32.xlu0 %v262_v19, %s1336_s22  ;;  %270 = vrot.lane.b32.xlu1 %v253_v15, %s1336_s22 }
  0x47   : > { %290 = vrot.lane.b32.xlu0 %v1432_v9, %s1337_s23  ;;  %292 = vrot.lane.b32.xlu1 %v286_v21, %s1337_s23 }
  0x4b   : > { %294 = vrot.lane.b32.xlu0 %v1436_v12, %s1337_s23  ;;  %296 = vrot.lane.b32.xlu1 %v287_v22, %s1337_s23 }
  0x4f   : > { %288 = vrot.lane.b32.xlu0 %v285_v20, %s1337_s23  ;;  %307 = vrot.lane.b32.xlu1 %v253_v15, %s1339_s25  ;;  %s976_s23 = scalar_lea.vmem (%p1410_p5), %s1684_s3, %s975_s12 }
  0x53   : > { %309 = vrot.lane.b32.xlu0 %v285_v20, %s1339_s25  ;;  %311 = vrot.lane.b32.xlu1 %v1432_v9, %s1339_s25 }
  0x57   : > { %313 = vrot.lane.b32.xlu0 %v304_v24, %s1339_s25  ;;  %305 = vrot.lane.b32.xlu1 %v303_v25, %s1339_s25 }
  0x5b   : > { %424 = vperm.xlu0 %1240, %v420_v26  }
  0x91   : > { %v340_v27 = vpop.permute.xlu1 %339  ;;  %v321_v28 = vpop.permute.xlu0 %320 }
  0x95   : > { %v329_v29 = vpop.permute.xlu0 %328  ;;  %v325_v30 = vpop.permute.xlu1 %324 }
  0x99   : > { %v323_v31 = vpop.permute.xlu0 %322  ;;  %v336_v32 = vpop.permute.xlu1 %335 }
  0x9a   : > { %v331_v41 = vsel %vm330_vm2, %v321_v28, %v323_v31  ;;  %v332_v44 = vsel %vm330_vm2, %v323_v31, %v325_v30 }
  0x9d   : > { %v338_v33 = vpop.permute.xlu0 %337  ;;  %v327_v34 = vpop.permute.xlu1 %326 }
  0x9e   : > { %v346_v37 = vsel %vm345_vm0, %v336_v32, %v338_v33  ;;  %v347_v42 = vsel %vm345_vm0, %v338_v33, %v340_v27  ;;  %v333_v52 = vsel %vm330_vm2, %v325_v30, %v327_v34  ;;  %v334_v57 = vsel %vm330_vm2, %v327_v34, %v329_v29  ;;  %vm568_vm2 = vmor %vm1583_vm15, %vm1579_vm14 }
  0x9f   : > { %v402_v43 = vsel %vm365_vm3, %v331_v41, %v346_v37  ;;  %v405_v49 = vsel %vm365_vm3, %v332_v44, %v347_v42  ;;  %v421_v41 = vld [vmem:[%s1682_s1] sm:$0x1]  ;;  %v1142_v42 = vld [vmem:[%s1682_s1 + $0x1] sm:$0x1]  ;;  %v1160_v44 = vld [vmem:[%s1682_s1 + $0x3] sm:$0x1] }
  0xa1   : > { %v342_v35 = vpop.permute.xlu0 %341  ;;  %v344_v36 = vpop.permute.xlu1 %343 }
  0xa2   : > { %v348_v45 = vsel %vm345_vm0, %v340_v27, %v342_v35  ;;  %v349_v53 = vsel %vm345_vm0, %v342_v35, %v344_v36  ;;  %vm569_vm0 = vcmask 1042434  }
  0xa3   : > { %v408_v55 = vsel %vm365_vm3, %v333_v52, %v348_v45  ;;  %v411_v61 = vsel %vm365_vm3, %v334_v57, %v349_v53  ;;  %v429_v45 = vsub.s32 0, %v1426_v4 }
  0xa5   : > { %v351_v38 = vpop.permute.xlu0 %350  ;;  %v353_v39 = vpop.permute.xlu1 %352 }
  0xa6   : > { %v361_v40 = vsel %vm360_vm1, %v351_v38, %v353_v39 }
  0xa7   : > { %v413_v46 = vsel %vm378_vm4, %v402_v43, %v361_v40  ;;  %v1151_v43 = vld [vmem:[%s1682_s1 + $0x2] sm:$0x1] }
  0xa8   : > { %v1484_v56 = vsel %vm387_vm5, %v413_v46, 0 }
  0xa9   : > { %v355_v47 = vpop.permute.xlu0 %354  ;;  %v357_v48 = vpop.permute.xlu1 %356 }
  0xaa   : > { %v362_v50 = vsel %vm360_vm1, %v353_v39, %v355_v47  ;;  %v363_v51 = vsel %vm360_vm1, %v355_v47, %v357_v48 }
  0xab   : > { %v1478_v54 = vsel %vm378_vm4, %v405_v49, %v362_v50  ;;  %v417_v58 = vsel %vm378_vm4, %v408_v55, %v363_v51 }
  0xac   : > { %1136 = vmatprep.subr.msk.bf16.mxu0 %vm387_vm5, %v1478_v54  ;;  %v1497_v0 = vsel %vm387_vm5, %v417_v58, 0 }
  0xad   : > { %v359_v59 = vpop.permute.xlu0 %358  ;;  %456 = vmatpush1.bf16.msra.mxu0 %v1484_v56  ;;  %v273_v60 = vpop.permute.xlu1 %272 }
  0xae   : > { %v364_v62 = vsel %vm360_vm1, %v357_v48, %v359_v59  ;;  %vm570_vm1 = vsmask.f32 2304 }
  0xaf   : > { %v1492_v63 = vsel %vm378_vm4, %v411_v61, %v364_v62 }
  0xb0   : > { %1138 = vmatprep.subr.msk.bf16.mxu1 %vm387_vm5, %v1492_v63 }
  0xb1   : > { %v275_v1 = vpop.permute.xlu0 %274  ;;  %497 = vmatpush1.bf16.msra.mxu1 %v1497_v0  ;;  %v277_v2 = vpop.permute.xlu1 %276 }
  0xb2   : > { %v282_v15 = vsel %vm280_vm6, %v273_v60, %v275_v1  ;;  %v283_v19 = vsel %vm280_vm6, %v275_v1, %v277_v2 }
  0xb3   : > { %v371_v18 = vsel %vm365_vm3, %v1441_v14, %v282_v15  ;;  %v374_v14 = vsel %vm365_vm3, %v1436_v12, %v283_v19 }
  0xb5   : > { %v279_v3 = vpop.permute.xlu0 %278  ;;  %v271_v5 = vpop.permute.xlu1 %270 }
  0xb6   : > { %v284_v22 = vsel %vm280_vm6, %v277_v2, %v279_v3  ;;  %v281_v24 = vsel %vm280_vm6, %v271_v5, %v273_v60  ;;  %v1340_v60 = vmov 1966171168  }
  0xb7   : > { %v377_v31 = vsel %vm365_vm3, %v1446_v17, %v284_v22  ;;  %v368_v32 = vsel %vm365_vm3, %v1432_v9, %v281_v24  ;;  %v540_v61 = vunpack.c.l.s4 %v1340_v60  ;;  %vm1596_vm3 = vmand %vm569_vm0, %vm570_vm1 }
  0xb8   : > { %vm572_vm6 = vmor %vm1596_vm3, %vm568_vm2 }
  0xb9   : > { %v291_v6 = vpop.permute.xlu0 %290  ;;  %v293_v7 = vpop.permute.xlu1 %292 }
  0xba   : > { %v300_v16 = vsel %vm298_vm7, %v291_v6, %v293_v7 }
  0xbb   : > { %v382_v25 = vsel %vm378_vm4, %v371_v18, %v300_v16 }
  0xbd   : > { %v295_v8 = vpop.permute.xlu0 %294  ;;  %v297_v10 = vpop.permute.xlu1 %296 }
  0xbe   : > { %v302_v27 = vsel %vm298_vm7, %v295_v8, %v297_v10  ;;  %v301_v30 = vsel %vm298_vm7, %v293_v7, %v295_v8  ;;  %v541_v7 = vunpack.c.0.s8 %v540_v61 }
  0xbf   : > { %v386_v36 = vsel %vm378_vm4, %v377_v31, %v302_v27  ;;  %v384_v12 = vsel %vm378_vm4, %v374_v14, %v301_v30 }
  0xc1   : > { %v289_v11 = vpop.permute.xlu0 %288  ;;  %v308_v13 = vpop.permute.xlu1 %307 }
  0xc2   : > { %v299_v28 = vsel %vm298_vm7, %v289_v11, %v291_v6 }
  0xc3   : > { %v380_v37 = vsel %vm378_vm4, %v368_v32, %v299_v28  ;;  %vm573_vm4 = vcmask 1043459  }
  0xc5   : > { %v310_v20 = vpop.permute.xlu0 %309  ;;  %v312_v21 = vpop.permute.xlu1 %311 }
  0xc6   : > { %v317_v26 = vsel %vm315_vm8, %v308_v13, %v310_v20  ;;  %v318_v33 = vsel %vm315_vm8, %v310_v20, %v312_v21  ;;  %v1589_v20 = vsub.s32 %v541_v7, %v1426_v4 }
  0xc7   : > { %v392_v29 = vsel %vm387_vm5, %v382_v25, %v317_v26  ;;  %v395_v9 = vsel %vm387_vm5, %v384_v12, %v318_v33 }
  0xc8   : > { %457 = vmatprep.subr.bf16.mxu0 %v392_v29 }
  0xc9   : > { %v314_v34 = vpop.permute.xlu0 %313  ;;  %v306_v35 = vpop.permute.xlu1 %305 }
  0xca   : > { %v319_v38 = vsel %vm315_vm8, %v312_v21, %v314_v34  ;;  %v316_v39 = vsel %vm315_vm8, %v306_v35, %v308_v13 }
  0xcb   : > { %v389_v40 = vsel %vm387_vm5, %v380_v37, %v316_v39  ;;  %v398_v17 = vsel %vm387_vm5, %v386_v36, %v319_v38 }
  0xcc   : > { %458 = vmatpush1.bf16.msra.mxu0 %v389_v40  ;;  %498 = vmatprep.subr.bf16.mxu1 %v398_v17 }
  0xcd   : > { %499 = vmatpush1.bf16.msra.mxu1 %v395_v9  ;;  %1143 = vmatprep.subr.msk.bf16.mxu0 %vm387_vm5, %v1478_v54 }
  0xce   : > { %1145 = vmatprep.subr.msk.bf16.mxu1 %vm387_vm5, %v1492_v63 }
  0xcf   : > { %1137 = vmatmul.mubr.msk.bf16.vlgmr.msra.gmra.mxu0 %vm431_vm9, %v421_v41 }
  0xd0   : > { %1139 = vmatmul.mubr.msk.bf16.vlgmr.msra.gmra.mxu1 %vm431_vm9, %v421_v41  ;;  %598 = vmatpush1.bf16.msra.mxu0 %v1484_v56 }
  0xd1   : > { %599 = vmatprep.subr.bf16.mxu0 %v392_v29  ;;  %639 = vmatpush1.bf16.msra.mxu1 %v1497_v0 }
  0xd2   : > { %640 = vmatprep.subr.bf16.mxu1 %v398_v17  ;;  %617 = vmatprep.mubr.bf16.mxu0 %v1338_v23 }
  0xd3   : > { %658 = vmatprep.mubr.bf16.mxu1 %v1338_v23 }
  0xd4   : > { %600 = vmatpush1.bf16.msra.mxu0 %v389_v40 }
  0xd5   : > { %641 = vmatpush1.bf16.msra.mxu1 %v395_v9  ;;  %1152 = vmatprep.subr.msk.bf16.mxu0 %vm387_vm5, %v1478_v54 }
  0xd6   : > { %1154 = vmatprep.subr.msk.bf16.mxu1 %vm387_vm5, %v1492_v63  ;;  %v425_v46 = vpop.permute.xlu0 %424 }
  0xd7   : > { %1144 = vmatmul.mubr.msk.bf16.vlgmr.msra.gmra.mxu0 %vm431_vm9, %v1142_v42  ;;  %v1569_v47 = vrot.slane %v425_v46, %v429_v45 }
  0xd8   : > { %1146 = vmatmul.mubr.msk.bf16.vlgmr.msra.gmra.mxu1 %vm431_vm9, %v1142_v42  ;;  %726 = vmatpush1.bf16.msra.mxu0 %v1484_v56 }
  0xd9   : > { %727 = vmatprep.subr.bf16.mxu0 %v392_v29  ;;  %767 = vmatpush1.bf16.msra.mxu1 %v1497_v0 }
  0xda   : > { %768 = vmatprep.subr.bf16.mxu1 %v398_v17  ;;  %745 = vmatprep.mubr.bf16.mxu0 %v1338_v23 }
  0xdb   : > { %786 = vmatprep.mubr.bf16.mxu1 %v1338_v23 }
  0xdc   : > { %728 = vmatpush1.bf16.msra.mxu0 %v389_v40 }
  0xdd   : > { %769 = vmatpush1.bf16.msra.mxu1 %v395_v9  ;;  %1161 = vmatprep.subr.msk.bf16.mxu0 %vm387_vm5, %v1478_v54 }
  0xde   : > { %1163 = vmatprep.subr.msk.bf16.mxu1 %vm387_vm5, %v1492_v63  ;;  %vm574_vm5 = vsmask.f32 3328 }
  0xdf   : > { %1153 = vmatmul.mubr.msk.bf16.vlgmr.msra.gmra.mxu0 %vm431_vm9, %v1151_v43  ;;  %vm575_vm7 = vmand %vm573_vm4, %vm574_vm5 }
  0xe0   : > { %1155 = vmatmul.mubr.msk.bf16.vlgmr.msra.gmra.mxu1 %vm431_vm9, %v1151_v43  ;;  %854 = vmatpush1.bf16.msra.mxu0 %v1484_v56  ;;  %vm1613_vm8 = vmor %vm575_vm7, %vm572_vm6 }
  0xe1   : > { %855 = vmatprep.subr.bf16.mxu0 %v392_v29  ;;  %895 = vmatpush1.bf16.msra.mxu1 %v1497_v0 }
  0xe2   : > { %896 = vmatprep.subr.bf16.mxu1 %v398_v17  ;;  %873 = vmatprep.mubr.bf16.mxu0 %v1338_v23 }
  0xe3   : > { %914 = vmatprep.mubr.bf16.mxu1 %v1338_v23 }
  0xe4   : > { %856 = vmatpush1.bf16.msra.mxu0 %v389_v40 }
  0xe5   : > { %897 = vmatpush1.bf16.msra.mxu1 %v395_v9  ;;  %v577_v9 = vld [vmem:[%s1617_s9] sm:$0xf] }
  0xe7   : > { %1162 = vmatmul.mubr.msk.bf16.vlgmr.msra.gmra.mxu0 %vm431_vm9, %v1160_v44 }
  0xe8   : > { %1164 = vmatmul.mubr.msk.bf16.vlgmr.msra.gmra.mxu1 %vm431_vm9, %v1160_v44 }
 0x18f   : > { %v477_v48 = vpop.f32.mrf.mxu0 }
 0x190   : > { %v478_v49 = vadd.f32 %v477_v48, %v1569_v47  ;;  %v518_v50 = vpop.f32.mrf.mxu1 }
 0x191   : > { %v519_v23 = vadd.f32 %v518_v50, %v1569_v47  ;;  %v479_v51 = vpop.f32.mrf.mxu0 }
 0x192   : > { %1244 = vtanh.f32 %v478_v49  ;;  %v480_v52 = vadd.f32 %v479_v51, %v1569_v47  ;;  %v520_v53 = vpop.f32.mrf.mxu1 }
 0x193   : > { %1246 = vtanh.f32 %v519_v23  ;;  %v521_v54 = vadd.f32 %v520_v53, %v1569_v47  ;;  %v481_v55 = vpop.f32.mrf.mxu0 }
 0x194   : > { %1248 = vtanh.f32 %v480_v52  ;;  %v522_v56 = vpop.f32.mrf.mxu1 }
 0x195   : > { %1250 = vtanh.f32 %v521_v54  ;;  %v482_v57 = vpop.f32.mrf.mxu0 }
 0x196   : > { %v523_v58 = vpop.f32.mrf.mxu1 }
 0x197   : > { %v619_v59 = vpop.f32.mrf.mxu0 }
 0x198   : > { %v620_v62 = vadd.f32 %v619_v59, %v1569_v47  ;;  %v660_v63 = vpop.f32.mrf.mxu1 }
 0x199   : > { %v661_v0 = vadd.f32 %v660_v63, %v1569_v47  ;;  %v621_v1 = vpop.f32.mrf.mxu0  ;;  %v1149_v63 = vld [vmem:[%s1617_s9 + $0x4] sm:$0xf] }
 0x19a   : > { %1252 = vtanh.f32 %v620_v62  ;;  %v622_v2 = vadd.f32 %v621_v1, %v1569_v47  ;;  %v662_v3 = vpop.f32.mrf.mxu1 }
 0x19b   : > { %1254 = vtanh.f32 %v661_v0  ;;  %v663_v5 = vadd.f32 %v662_v3, %v1569_v47  ;;  %v623_v6 = vpop.f32.mrf.mxu0 }
 0x19c   : > { %1256 = vtanh.f32 %v622_v2  ;;  %v664_v10 = vpop.f32.mrf.mxu1 }
 0x19d   : > { %1258 = vtanh.f32 %v663_v5  ;;  %v624_v13 = vpop.f32.mrf.mxu0 }
 0x19e   : > { %v665_v15 = vpop.f32.mrf.mxu1  ;;  %v1158_v13 = vld [vmem:[%s1617_s9 + $0x8] sm:$0xf] }
 0x19f   : > { %v1245_v16 = vpop.eup %1244  ;;  %v747_v18 = vpop.f32.mrf.mxu0 }
 0x1a0   : > { %v1247_v19 = vpop.eup %1246  ;;  %v748_v21 = vadd.f32 %v747_v18, %v1569_v47  ;;  %v788_v22 = vpop.f32.mrf.mxu1 }
 0x1a1   : > { %v1249_v24 = vpop.eup %1248  ;;  %v789_v26 = vadd.f32 %v788_v22, %v1569_v47  ;;  %v749_v27 = vpop.f32.mrf.mxu0 }
 0x1a2   : > { %v1251_v28 = vpop.eup %1250  ;;  %v1140_v4 = vpack.c.bf16 %v1249_v24, %v1245_v16  ;;  %1260 = vtanh.f32 %v748_v21  ;;  %v750_v29 = vadd.f32 %v749_v27, %v1569_v47  ;;  %v790_v30 = vpop.f32.mrf.mxu1  ;;  %v1167_v27 = vld [vmem:[%s1617_s9 + $0xc] sm:$0xf] }
 0x1a3   : > { %v1141_v14 = vpack.c.bf16 %v1251_v28, %v1247_v19  ;;  %1262 = vtanh.f32 %v789_v26  ;;  %v791_v31 = vadd.f32 %v790_v30, %v1569_v47  ;;  %v751_v32 = vpop.f32.mrf.mxu0 }
 0x1a4   : > { %v545_v33 = vrot.slane %v1140_v4, %v1589_v20  ;;  %1264 = vtanh.f32 %v750_v29  ;;  %v792_v34 = vpop.f32.mrf.mxu1 }
 0x1a5   : > { %v552_v35 = vrot.slane %v1141_v14, %v1589_v20  ;;  %1266 = vtanh.f32 %v791_v31  ;;  %v752_v36 = vpop.f32.mrf.mxu0 }
 0x1a6   : > { %v793_v37 = vpop.f32.mrf.mxu1 }
 0x1a7   : > { %v1253_v38 = vpop.eup %1252  ;;  %v553_v39 = vcombine.low %v545_v33, %v552_v35  ;;  %v875_v12 = vpop.f32.mrf.mxu0 }
 0x1a8   : > { %v1255_v40 = vpop.eup %1254  ;;  %v876_v41 = vadd.f32 %v875_v12, %v1569_v47  ;;  %v916_v42 = vpop.f32.mrf.mxu1 }
 0x1a9   : > { %v1257_v43 = vpop.eup %1256  ;;  %v560_v44 = vrot.slane %v553_v39, %v1589_v20  ;;  %v917_v45 = vadd.f32 %v916_v42, %v1569_v47  ;;  %v877_v46 = vpop.f32.mrf.mxu0 }
 0x1aa   : > { %v1259_v48 = vpop.eup %1258  ;;  %v1147_v49 = vpack.c.bf16 %v1257_v43, %v1253_v38  ;;  %1268 = vtanh.f32 %v876_v41  ;;  %v878_v50 = vadd.f32 %v877_v46, %v1569_v47  ;;  %v918_v23 = vpop.f32.mrf.mxu1 }
 0x1ab   : > { %v578_v51 = vsel %vm1613_vm8, %v560_v44, %v577_v9  ;;  %v1148_v52 = vpack.c.bf16 %v1259_v48, %v1255_v40  ;;  %1270 = vtanh.f32 %v917_v45  ;;  %v919_v53 = vadd.f32 %v918_v23, %v1569_v47  ;;  %v879_v54 = vpop.f32.mrf.mxu0 }
 0x1ac   : > { %579 = vst [vmem:[%s1617_s9] sm:$0xf] %v578_v51  ;;  %v687_v55 = vrot.slane %v1147_v49, %v1589_v20  ;;  %1272 = vtanh.f32 %v878_v50  ;;  %v920_v56 = vpop.f32.mrf.mxu1 }
 0x1ad   : > { %v694_v57 = vrot.slane %v1148_v52, %v1589_v20  ;;  %1274 = vtanh.f32 %v919_v53  ;;  %v880_v58 = vpop.f32.mrf.mxu0 }
 0x1ae   : > { %v921_v59 = vpop.f32.mrf.mxu1 }
 0x1af   : > { %v1261_v60 = vpop.eup %1260  ;;  %v695_v61 = vcombine.low %v687_v55, %v694_v57 }
 0x1b0   : > { %v1263_v62 = vpop.eup %1262 }
 0x1b1   : > { %v1265_v0 = vpop.eup %1264  ;;  %v702_v47 = vrot.slane %v695_v61, %v1589_v20 }
 0x1b2   : > { %v1267_v1 = vpop.eup %1266  ;;  %v1156_v2 = vpack.c.bf16 %v1265_v0, %v1261_v60 }
 0x1b3   : > { %v706_v3 = vsel %vm1613_vm8, %v702_v47, %v1149_v63  ;;  %v1157_v5 = vpack.c.bf16 %v1267_v1, %v1263_v62  ;;  %v993_v29 = vld [vmem:[%s1617_s9] sm:$0xf] (%p1410_p5) }
 0x1b4   : > { %1150 = vst [vmem:[%s1617_s9 + $0x4] sm:$0xf] %v706_v3  ;;  %v815_v6 = vrot.slane %v1156_v2, %v1589_v20  ;;  %994 = vst [vmem:[%s976_s23] sm:$0xf] (%p1410_p5), %v993_v29 }
 0x1b5   : > { %v822_v7 = vrot.slane %v1157_v5, %v1589_v20 }
 0x1b7   : > { %v1269_v8 = vpop.eup %1268  ;;  %v823_v10 = vcombine.low %v815_v6, %v822_v7 }
 0x1b8   : > { %v1271_v11 = vpop.eup %1270 }
 0x1b9   : > { %v1273_v15 = vpop.eup %1272  ;;  %v830_v16 = vrot.slane %v823_v10, %v1589_v20 }
 0x1ba   : > { %v1275_v18 = vpop.eup %1274  ;;  %v1165_v19 = vpack.c.bf16 %v1273_v15, %v1269_v8 }
 0x1bb   : > { %v834_v21 = vsel %vm1613_vm8, %v830_v16, %v1158_v13  ;;  %v1166_v22 = vpack.c.bf16 %v1275_v18, %v1271_v11  ;;  %v995_v30 = vld [vmem:[%s1617_s9 + $0x4] sm:$0xf] (%p1410_p5) }
 0x1bc   : > { %1159 = vst [vmem:[%s1617_s9 + $0x8] sm:$0xf] %v834_v21  ;;  %v943_v24 = vrot.slane %v1165_v19, %v1589_v20  ;;  %996 = vst [vmem:[%s976_s23 + $0x20] sm:$0xf] (%p1410_p5), %v995_v30 }
 0x1bd   : > { %v950_v25 = vrot.slane %v1166_v22, %v1589_v20 }
 0x1bf   : > { %v951_v26 = vcombine.low %v943_v24, %v950_v25 }
 0x1c0   : > { %970 = sbr.rel (!%p1410_p5) target bundleno = 461 (0x1cd), region = 36 }
 0x1c1   : > { %v958_v28 = vrot.slane %v951_v26, %v1589_v20 }
 0x1c3   : > { %v962_v4 = vsel %vm1613_vm8, %v958_v28, %v1167_v27  ;;  %v997_v14 = vld [vmem:[%s1617_s9 + $0x8] sm:$0xf] (%p1410_p5) }
 0x1c4   : > { %1168 = vst [vmem:[%s1617_s9 + $0xc] sm:$0xf] %v962_v4  ;;  %998 = vst [vmem:[%s976_s23 + $0x40] sm:$0xf] (%p1410_p5), %v997_v14 }
 0x1cb   : > { %v999_v20 = vld [vmem:[%s1617_s9 + $0xc] sm:$0xf] }
 0x1cc   : > { %1000 = vst [vmem:[%s976_s23 + $0x60] sm:$0xf] %v999_v20 }
 0x1cd PF: > { %s15_s20 = sadd.s32 1, %s1330_s20   ;;  %s1694_s14 = smov %s1310_s15 }
 0x1ce   : > { %p12_p10 = scmp.ge.s32.totalorder %s15_s20, 18   ;;  %s1695_s15 = smov %s1421_s28 }
 0x1cf   : > { %s1696_s16 = smov %s1322_s18  ;;  %s1697_s17 = smov %s1326_s19 }
 0x1d0   : > { %s1698_s18 = smov %s1701_s2  ;;  %s1699_s19 = smov %s1705_s21 }
 0x1d1   :  { %14 = sbr.rel (!%p12_p10) target bundleno = 7 (0x7), region = 116 }

// kernel: wavegan_forward.13
= control target key start
LH: loop header
LB: loop body
LE: loop exit
PB: predicated region body
PF: predicated region fallthrough
CT: control target
= control target key end

     0   :  { %8 = vsyncpa [#allocation3], 0  ;;  %s1132_s0 = inlined_call_operand.vmem [shape: bf16[2,1,129,128], index: 0, kind: input, shape index: {}]   ;;  %s1133_s1 = inlined_call_operand.vmem [shape: bf16[256,128], index: 1, kind: input, shape index: {}]   ;;  %s1134_s2 = inlined_call_operand.vmem [shape: f32[1,128], index: 2, kind: input, shape index: {}]   ;;  %s1135_s3 = inlined_call_operand.hbm [shape: f32[2,1,128,128], index: 3, kind: output, shape index: {}]  }
   0x1   :  { %10 = vsyncpa [#allocation3 + $0x1], 0  ;;  %s909_s12 = smov 0   ;;  %s911_s13 = smov 0  }
   0x2   :  { %s913_s14 = smov 0   ;;  %s915_s15 = smov 0  }
   0x3 LB: > { %s930_s16 = sadd.s32 4294967295, %s884_s15   ;;  %s639_s17 = sadd.s32 4294967294, %s884_s15   ;;  %s884_s15 = sphi %s915_s15, %s1141_s15   ;;  %s880_s14 = sphi %s913_s14, %s1140_s14   ;;  %s876_s13 = sphi %s911_s13, %s1139_s13   ;;  %s872_s12 = sphi %s909_s12, %s1138_s12  }
   0x4   : > { %s934_s18 = sadd.s32 1, %s884_s15   ;;  %s91_s19 = sadd.s32 1, %s880_s14 }
   0x5   : > { %s88_s20 = ssub.s32 %s884_s15, %s934_s18  ;;  %p101_p0 = scmp.ne.s32.totalorder %s880_s14, %s876_s13 }
   0x6   : > { %p89_p1 = scmp.eq.s32.totalorder %s88_s20, 0  ;;  %p102_p2 = scmp.eq.s32.totalorder %s930_s16, 1 }
   0x7   : > { %p107_p3 = scmp.ne.s32.totalorder %s876_s13, %s872_s12  ;;  %p108_p4 = scmp.eq.s32.totalorder %s639_s17, 1 }
   0x8   : > { %s945_s21 = scalar_select %p89_p1, %s880_s14, %s91_s19  }
   0x9   : > { %p947_p5 = por %p102_p2, %p101_p0  ;;  %p951_p6 = por %p108_p4, %p107_p3 }
   0xa   : > { %p642_p7 = scmp.ge.s32.totalorder %s884_s15, 1  ;;  %p140_p8 = scmp.lt.s32.totalorder %s884_s15, 3 }
   0xc   : > { %p141_p9 = pnand %p642_p7, %p140_p8 }
   0xd   : > { %p164_p10 = scmp.lt.s32.totalorder (!%p141_p9), %s930_s16, 1  ;;  %s161_s25 = sand.u32 (!%p141_p9), 1, %s876_s13  }
   0xe   : > { %144 = sbr.rel (%p141_p9) target bundleno = 293 (0x125), region = 32  ;;  %s643_s26 = sshll.u32 (!%p141_p9), %s161_s25, 7 }
   0xf   : > { %s1049_s29 = scalar_lea.vmem (!%p141_p9), [#allocation2], %s643_s26  ;;  %s886_s9 = smov (!%p141_p9), [#allocation2]  }
  0x10   : > { %s577_s4 = sshll.u32 (!%p141_p9), %s1049_s29, 4  ;;  %s828_s10 = sshll.u32 (!%p141_p9), %s886_s9, 4  ;;  %s1084_s4 = int_to_ptr.vmem [resolvable:$true] %s577_s4  ;;  %s829_s10 = int_to_ptr.vmem [resolvable:$false] %s828_s10 }
  0x11   : > { %s824_s8 = scalar_lea.vmem (!%p141_p9), %s1084_s4, 2048  ;;  %s830_s11 = scalar_lea.vmem (!%p141_p9), %s829_s10, 4096 }
  0x12   : > { %p825_p11 = scmp.ne.s32.totalorder (!%p141_p9), %s1084_s4, %s824_s8  ;;  %p831_p0 = scmp.lt.s32.totalorder (!%p141_p9), %s1084_s4, %s829_s10 }
  0x13   : > { %v799_v0 = vld [vmem:[%s1133_s1 + $0x78] sm:$0xff]   ;;  %v801_v2 = vld [vmem:[%s1133_s1 + $0x70] sm:$0xff]   ;;  %v803_v4 = vld [vmem:[%s1133_s1 + $0x68] sm:$0xff]   ;;  %s165_s7 = scalar_select %p164_p10, %s930_s16, 1  ;;  %vm238_vm0 = vsmask.f32 7424 }
  0x14   : > { %v800_v1 = vld [vmem:[%s1133_s1 + $0x38] sm:$0xff]   ;;  %677 = vmatprep.subr.bf16.mxu0 %v799_v0  ;;  %741 = vmatprep.subr.bf16.mxu1 %v799_v0  ;;  %v802_v3 = vld [vmem:[%s1133_s1 + $0x30] sm:$0xff]   ;;  %v804_v5 = vld [vmem:[%s1133_s1 + $0x28] sm:$0xff]   ;;  %p826_p12 = pnand %p825_p11, %p947_p5  ;;  %p832_p1 = scmp.lt.s32.totalorder %s830_s11, %s824_s8 }
  0x15   : > { %678 = vmatpush3.bf16.msra.mxu0 %v800_v1  ;;  %749 = vmatpush3.bf16.msra.mxu1 %v800_v1  ;;  %v805_v6 = vld [vmem:[%s1133_s1 + $0x60] sm:$0xff]   ;;  %s757_s17 = smul.u32 68, %s165_s7  ;;  %v807_v8 = vld [vmem:[%s1133_s1 + $0x58] sm:$0xff]   ;;  %v809_v10 = vld [vmem:[%s1133_s1 + $0x50] sm:$0xff]  }
  0x16   : > { %679 = vmatprep.subr.bf16.mxu0 %v801_v2  ;;  %742 = vmatprep.subr.bf16.mxu1 %v801_v2  ;;  %v806_v7 = vld [vmem:[%s1133_s1 + $0x20] sm:$0xff]   ;;  %v808_v9 = vld [vmem:[%s1133_s1 + $0x18] sm:$0xff]   ;;  %v810_v11 = vld [vmem:[%s1133_s1 + $0x10] sm:$0xff]   ;;  %p827_p13 = pneg %p826_p12  ;;  %p833_p2 = por %p832_p1, %p831_p0 }
  0x17   : > { %s992_s30 = scalar_lea.vmem %s1132_s0, %s757_s17  ;;  %v811_v14 = vld [vmem:[%s1133_s1 + $0x48] sm:$0xff]   ;;  %v813_v27 = vld [vmem:[%s1133_s1 + $0x40] sm:$0xff]  }
  0x18   : > { %v815_v12 = vld [vmem:[%s992_s30] sm:$0xff]   ;;  %v1002_v13 = vld [vmem:[%s992_s30 + $0x8] sm:$0xff]   ;;  %v1014_v25 = vld [vmem:[%s992_s30 + $0x10] sm:$0xff]   ;;  %p834_p3 = pnand %p833_p2, %p827_p13 }
  0x19   : > { %680 = vmatpush3.bf16.msra.mxu0 %v802_v3  ;;  %750 = vmatpush3.bf16.msra.mxu1 %v802_v3  ;;  %v240_v15 = vshrl.u32 %v815_v12, 16  ;;  %v242_v16 = vshll.u32 %v815_v12, 16  ;;  %v247_v17 = vshll.u32 %v1002_v13, 16  ;;  %v817_v18 = vld [vmem:[%s992_s30 + $0x20] sm:$0xff]   ;;  %v818_v19 = vld [vmem:[%s992_s30 + $0x28] sm:$0xff]   ;;  %v820_v26 = vld [vmem:[%s992_s30 + $0x30] sm:$0xff]  }
  0x1a   : > { %681 = vmatprep.subr.bf16.mxu0 %v803_v4  ;;  %743 = vmatprep.subr.bf16.mxu1 %v803_v4  ;;  %v812_v20 = vld [vmem:[%s1133_s1 + $0x8] sm:$0xff]   ;;  %v271_v23 = vshll.u32 %v817_v18, 16  ;;  %v275_v24 = vshrl.u32 %v817_v18, 16  ;;  %v279_v28 = vshll.u32 %v818_v19, 16  ;;  %v251_v31 = vshrl.u32 %v1002_v13, 16  ;;  %v814_v38 = vld [vmem:[%s1133_s1] sm:$0xff]  }
  0x1b   : > { %v244_v21 = vrot.slane %v242_v16, 1  ;;  %v249_v22 = vrot.slane %v247_v17, 1  ;;  %v255_v33 = vshll.u32 %v1014_v25, 16  ;;  %v283_v34 = vshrl.u32 %v818_v19, 16  ;;  %v821_v44 = vld [vmem:[%s992_s30 + $0x18] sm:$0xff]  }
  0x1c   : > { %v273_v30 = vrot.slane %v271_v23, 1  ;;  %v281_v32 = vrot.slane %v279_v28, 1  ;;  %v287_v35 = vshll.u32 %v820_v26, 16  ;;  %v822_v45 = vld [vmem:[%s992_s30 + $0x38] sm:$0xff]   ;;  %v259_v46 = vshrl.u32 %v1014_v25, 16 }
  0x1d   : > { %682 = vmatpush3.bf16.msra.mxu0 %v804_v5  ;;  %751 = vmatpush3.bf16.msra.mxu1 %v804_v5  ;;  %v245_v29 = vor.u32 %v244_v21, %v240_v15  ;;  %v253_v40 = vor.u32 %v251_v31, %v249_v22  ;;  %v257_v41 = vrot.slane %v255_v33, 1  ;;  %v291_v47 = vshrl.u32 %v820_v26, 16  ;;  %v823_v56 = vld [vmem:[%s992_s30 + $0x40] ss:$0 sps:$4 sm:$0x11]   ;;  %s676_s30 = sshll.u32 %s930_s16, 11 }
  0x1e   : > { %683 = vmatprep.subr.bf16.mxu0 %v805_v6  ;;  %744 = vmatprep.subr.bf16.mxu1 %v805_v6  ;;  %v277_v37 = vor.u32 %v275_v24, %v273_v30  ;;  %v285_v42 = vor.u32 %v283_v34, %v281_v32  ;;  %v289_v43 = vrot.slane %v287_v35, 1  ;;  %v263_v50 = vshll.u32 %v821_v44, 16  ;;  %v1045_v5 = vld [vmem:[%s1134_s2] ss:$0 sm:$0xff]  ;;  %s1082_s7 = scalar_lea.hbm %s1135_s3, %s676_s30  ;;  %s1092_s16 = scalar_lea.sflag [#allocation3], %s161_s25 }
  0x1f   : > { %v250_v36 = vsel %vm238_vm0, %v245_v29, %v249_v22  ;;  %v258_v48 = vsel %vm238_vm0, %v253_v40, %v257_v41  ;;  %v295_v51 = vshll.u32 %v822_v45, 16  ;;  %v261_v52 = vor.u32 %v259_v46, %v257_v41 }
  0x20   : > { %482 = vmatprep.mubr.bf16.mxu0 %v250_v36  ;;  %v282_v39 = vsel %vm238_vm0, %v277_v37, %v281_v32  ;;  %v290_v49 = vsel %vm238_vm0, %v285_v42, %v289_v43  ;;  %v265_v53 = vrot.slane %v263_v50, 1  ;;  %v293_v54 = vor.u32 %v291_v47, %v289_v43 }
  0x21   : > { %684 = vmatpush3.bf16.msra.mxu0 %v806_v7  ;;  %752 = vmatpush3.bf16.msra.mxu1 %v806_v7  ;;  %v297_v55 = vrot.slane %v295_v51, 1  ;;  %v267_v57 = vshrl.u32 %v821_v44, 16  ;;  %v299_v60 = vshrl.u32 %v822_v45, 16  ;;  %v303_v61 = vshll.u32 %v823_v56, 16 }
  0x22   : > { %685 = vmatprep.subr.bf16.mxu0 %v807_v8  ;;  %745 = vmatprep.subr.bf16.mxu1 %v807_v8  ;;  %v266_v58 = vsel %vm238_vm0, %v261_v52, %v265_v53 }
  0x23   : > { %514 = vmatprep.mubr.bf16.mxu1 %v282_v39  ;;  %v298_v59 = vsel %vm238_vm0, %v293_v54, %v297_v55  ;;  %v269_v62 = vor.u32 %v267_v57, %v265_v53  ;;  %v301_v63 = vor.u32 %v299_v60, %v297_v55  ;;  %v305_v0 = vrot.slane %v303_v61, 1 }
  0x25   : > { %686 = vmatpush3.bf16.msra.mxu0 %v808_v9  ;;  %753 = vmatpush3.bf16.msra.mxu1 %v808_v9  ;;  %v274_v1 = vsel %vm238_vm0, %v269_v62, %v273_v30  ;;  %v306_v2 = vsel %vm238_vm0, %v301_v63, %v305_v0 }
  0x26   : > { %687 = vmatprep.subr.bf16.mxu0 %v809_v10  ;;  %746 = vmatprep.subr.bf16.mxu1 %v809_v10 }
  0x29   : > { %688 = vmatpush3.bf16.msra.mxu0 %v810_v11  ;;  %754 = vmatpush3.bf16.msra.mxu1 %v810_v11 }
  0x2a   : > { %689 = vmatprep.subr.bf16.mxu0 %v811_v14  ;;  %747 = vmatprep.subr.bf16.mxu1 %v811_v14 }
  0x2d   : > { %690 = vmatpush3.bf16.msra.mxu0 %v812_v20  ;;  %755 = vmatpush3.bf16.msra.mxu1 %v812_v20 }
  0x2e   : > { %691 = vmatprep.subr.bf16.mxu0 %v813_v27  ;;  %748 = vmatprep.subr.bf16.mxu1 %v813_v27 }
  0x31   : > { %692 = vmatpush3.bf16.msra.mxu0 %v814_v38  ;;  %756 = vmatpush3.bf16.msra.mxu1 %v814_v38 }
  0x34   : > { %483 = vmatmul.mubr.bf16.vlgmr.msra.gmra.mxu0 %v815_v12  ;;  %515 = vmatmul.mubr.bf16.vlgmr.msra.gmra.mxu1 %v817_v18 }
  0x35   : > { %490 = vmatprep.mubr.bf16.mxu0 %v258_v48  ;;  %522 = vmatprep.mubr.bf16.mxu1 %v290_v49 }
  0x3c   : > { %491 = vmatmul.mubr.bf16.gmra.mxu0 %v1002_v13  ;;  %523 = vmatmul.mubr.bf16.gmra.mxu1 %v818_v19 }
  0x3d   : > { %498 = vmatprep.mubr.bf16.mxu0 %v266_v58  ;;  %530 = vmatprep.mubr.bf16.mxu1 %v298_v59 }
  0x44   : > { %499 = vmatmul.mubr.bf16.gmra.mxu0 %v1014_v25  ;;  %531 = vmatmul.mubr.bf16.gmra.mxu1 %v820_v26 }
  0x45   : > { %506 = vmatprep.mubr.bf16.mxu0 %v274_v1  ;;  %538 = vmatprep.mubr.bf16.mxu1 %v306_v2 }
  0x4c   : > { %507 = vmatmul.mubr.bf16.gmra.mxu0 %v821_v44  ;;  %539 = vmatmul.mubr.bf16.gmra.mxu1 %v822_v45 }
  0xf4   : > { %v693_v3 = vpop.f32.mrf.mxu0  ;;  %v717_v4 = vpop.f32.mrf.mxu1 }
  0xf6   : > { %v694_v6 = vpop.f32.mrf.mxu0  ;;  %v718_v7 = vpop.f32.mrf.mxu1 }
  0xf7   : > { %v695_v8 = vadd.f32 %v694_v6, %v693_v3  ;;  %v719_v9 = vadd.f32 %v718_v7, %v717_v4 }
  0xf8   : > { %v696_v10 = vpop.f32.mrf.mxu0  ;;  %v720_v11 = vpop.f32.mrf.mxu1 }
  0xf9   : > { %v485_v12 = vadd.f32 %v695_v8, %v1045_v5  ;;  %v517_v13 = vadd.f32 %v719_v9, %v1045_v5 }
  0xfa   : > { %v697_v14 = vpop.f32.mrf.mxu0  ;;  %v721_v15 = vpop.f32.mrf.mxu1 }
  0xfb   : > { %547 = vst [vmem:[%s1049_s29] sm:$0xff] %v485_v12  ;;  %555 = vst [vmem:[%s1049_s29 + $0x40] sm:$0xff] %v517_v13  ;;  %v698_v16 = vadd.f32 %v697_v14, %v696_v10  ;;  %v722_v17 = vadd.f32 %v721_v15, %v720_v11 }
  0xfc   : > { %v699_v18 = vpop.f32.mrf.mxu0  ;;  %v723_v19 = vpop.f32.mrf.mxu1 }
  0xfd   : > { %v488_v20 = vadd.f32 %v698_v16, %v1045_v5  ;;  %v520_v21 = vadd.f32 %v722_v17, %v1045_v5 }
  0xfe   : > { %v700_v22 = vpop.f32.mrf.mxu0  ;;  %v724_v23 = vpop.f32.mrf.mxu1 }
  0xff   : > { %548 = vst [vmem:[%s1049_s29 + $0x8] sm:$0xff] %v488_v20  ;;  %556 = vst [vmem:[%s1049_s29 + $0x48] sm:$0xff] %v520_v21  ;;  %v701_v24 = vadd.f32 %v700_v22, %v699_v18  ;;  %v725_v25 = vadd.f32 %v724_v23, %v723_v19 }
 0x100   : > { %v702_v26 = vpop.f32.mrf.mxu0  ;;  %v726_v27 = vpop.f32.mrf.mxu1 }
 0x101   : > { %v493_v28 = vadd.f32 %v701_v24, %v1045_v5  ;;  %v525_v29 = vadd.f32 %v725_v25, %v1045_v5 }
 0x102   : > { %v703_v30 = vpop.f32.mrf.mxu0  ;;  %v727_v31 = vpop.f32.mrf.mxu1 }
 0x103   : > { %549 = vst [vmem:[%s1049_s29 + $0x10] sm:$0xff] %v493_v28  ;;  %557 = vst [vmem:[%s1049_s29 + $0x50] sm:$0xff] %v525_v29  ;;  %v704_v32 = vadd.f32 %v703_v30, %v702_v26  ;;  %v728_v33 = vadd.f32 %v727_v31, %v726_v27 }
 0x104   : > { %v705_v34 = vpop.f32.mrf.mxu0  ;;  %v729_v35 = vpop.f32.mrf.mxu1 }
 0x105   : > { %v496_v36 = vadd.f32 %v704_v32, %v1045_v5  ;;  %v528_v37 = vadd.f32 %v728_v33, %v1045_v5 }
 0x106   : > { %v706_v38 = vpop.f32.mrf.mxu0  ;;  %v730_v39 = vpop.f32.mrf.mxu1 }
 0x107   : > { %550 = vst [vmem:[%s1049_s29 + $0x18] sm:$0xff] %v496_v36  ;;  %558 = vst [vmem:[%s1049_s29 + $0x58] sm:$0xff] %v528_v37  ;;  %v707_v40 = vadd.f32 %v706_v38, %v705_v34  ;;  %v731_v41 = vadd.f32 %v730_v39, %v729_v35 }
 0x108   : > { %v708_v42 = vpop.f32.mrf.mxu0  ;;  %v732_v43 = vpop.f32.mrf.mxu1 }
 0x109   : > { %v501_v44 = vadd.f32 %v707_v40, %v1045_v5  ;;  %v533_v45 = vadd.f32 %v731_v41, %v1045_v5 }
 0x10a   : > { %v709_v46 = vpop.f32.mrf.mxu0  ;;  %v733_v47 = vpop.f32.mrf.mxu1 }
 0x10b   : > { %551 = vst [vmem:[%s1049_s29 + $0x20] sm:$0xff] %v501_v44  ;;  %559 = vst [vmem:[%s1049_s29 + $0x60] sm:$0xff] %v533_v45  ;;  %v710_v48 = vadd.f32 %v709_v46, %v708_v42  ;;  %v734_v49 = vadd.f32 %v733_v47, %v732_v43 }
 0x10c   : > { %v711_v50 = vpop.f32.mrf.mxu0  ;;  %v735_v51 = vpop.f32.mrf.mxu1 }
 0x10d   : > { %v504_v52 = vadd.f32 %v710_v48, %v1045_v5  ;;  %v536_v53 = vadd.f32 %v734_v49, %v1045_v5 }
 0x10e   : > { %v712_v54 = vpop.f32.mrf.mxu0  ;;  %v736_v55 = vpop.f32.mrf.mxu1 }
 0x10f   : > { %552 = vst [vmem:[%s1049_s29 + $0x28] sm:$0xff] %v504_v52  ;;  %560 = vst [vmem:[%s1049_s29 + $0x68] sm:$0xff] %v536_v53  ;;  %v713_v56 = vadd.f32 %v712_v54, %v711_v50  ;;  %v737_v57 = vadd.f32 %v736_v55, %v735_v51 }
 0x110   : > { %v714_v58 = vpop.f32.mrf.mxu0  ;;  %v738_v59 = vpop.f32.mrf.mxu1 }
 0x111   : > { %v509_v60 = vadd.f32 %v713_v56, %v1045_v5  ;;  %v541_v61 = vadd.f32 %v737_v57, %v1045_v5 }
 0x112   : > { %v715_v62 = vpop.f32.mrf.mxu0  ;;  %v739_v63 = vpop.f32.mrf.mxu1 }
 0x113   : > { %553 = vst [vmem:[%s1049_s29 + $0x30] sm:$0xff] %v509_v60  ;;  %561 = vst [vmem:[%s1049_s29 + $0x70] sm:$0xff] %v541_v61  ;;  %v716_v0 = vadd.f32 %v715_v62, %v714_v58  ;;  %v740_v1 = vadd.f32 %v739_v63, %v738_v59 }
 0x115   : > { %v512_v2 = vadd.f32 %v716_v0, %v1045_v5  ;;  %v544_v3 = vadd.f32 %v740_v1, %v1045_v5 }
 0x117   : > { %554 = vst [vmem:[%s1049_s29 + $0x38] sm:$0xff] %v512_v2  ;;  %562 = vst [vmem:[%s1049_s29 + $0x78] sm:$0xff] %v544_v3 }
 0x118   : > { %837 = shalt.err (!%p834_p3)
}
 0x119   : > { %s838_s17 = scalar_lea.hbm %s1082_s7, 2048  ;;  %s842_s24 = scalar_lea.hbm %s1135_s3, 4096 }
 0x11a   : > { %p839_p4 = scmp.ne.s32.totalorder %s1082_s7, %s838_s17  ;;  %p843_p9 = scmp.lt.s32.totalorder %s1082_s7, %s1135_s3 }
 0x11b   : > { %p844_p10 = scmp.lt.s32.totalorder %s842_s24, %s838_s17 }
 0x11c   : > { %p840_p7 = pnand %p839_p4, %p947_p5 }
 0x11d   : > { %p845_p11 = por %p844_p10, %p843_p9 }
 0x11e   : > { %p841_p8 = pneg %p840_p7 }
 0x120   : > { %p846_p12 = pnand %p845_p11, %p841_p8 }
 0x122   : > { %849 = shalt.err (!%p846_p12)
}
 0x123   : > { %s887_s27 = smov 128   ;;  %s888_s28 = smov 8  }
 0x124   : > { %758 = dma.vmem_to_hbm [thread:$0]  (%p947_p5), %s1084_s4, 2048, %s1082_s7, %s1092_s16, %s887_s27, %s887_s27, %s888_s28  }
 0x125 PF: > { %p764_p13 = scmp.ge.s32.totalorder %s884_s15, 2  ;;  %s592_s29 = sand.u32 1, %s872_s12  }
 0x126   : > { %s593_s30 = scalar_lea.sflag [#allocation3], %s592_s29 }
 0x127   : > { %p761_p0 = pnand %p764_p13, %p951_p6 }
 0x129   : > { %p762_p1 = pneg %p761_p0 }
 0x12b   : > { %867 = dma.done.wait (%p762_p1), %s593_s30, 2048  }
 0x12c   : > { %869 = vsyncadd (%p762_p1), %s593_s30, 4294965248  ;;  %p13_p2 = scmp.ge.s32.totalorder %s934_s18, 4   ;;  %s1138_s12 = smov %s876_s13 }
 0x12d   : > { %s1139_s13 = smov %s880_s14  ;;  %s1140_s14 = smov %s945_s21 }
 0x12e   : > { %s1141_s15 = smov %s934_s18  ;;  %15 = sbr.rel (!%p13_p2) target bundleno = 3 (0x3), region = 67 }
 0x133   :  { %598 = vsyncpa [#allocation3], 1 }
 0x134   :  { %600 = vsyncpa [#allocation3 + $0x1], 1 }

</bundles_post_ra>
